<compile_context>
chip_gen: v5e
topology: v5e:2x2
jax: 0.10.0
libtpu: 0.0.40
codegen_flags: <defaults>
</compile_context>

<pallas_src>
import functools

import jax
import jax.numpy as jnp
from jax.experimental import pallas as pl
from jax.experimental.pallas import tpu as pltpu

# ----------------------------- config ---------------------------------------
HEADS = 4
HEAD_DIM = 16
DIM = HEADS * HEAD_DIM          # 64
DEPTH = 2
MLP_DIM = 2 * DIM               # 128
PATCH = 4
NUM_CLASSES = 1
EPS = 1e-5                      # torch.nn.LayerNorm default

_BLK_KEYS = ("ln1_g", "ln1_b", "wqkv", "bqkv", "wo", "bo",
             "ln2_g", "ln2_b", "w1", "b1", "w2", "b2")


# ----------------------------- in-kernel helpers ------------------------------
def _layernorm(x, g, b):
    mu = jnp.mean(x, axis=-1, keepdims=True)
    var = jnp.mean(jnp.square(x - mu), axis=-1, keepdims=True)
    return (x - mu) * jax.lax.rsqrt(var + EPS) * g + b


def _encoder_block(x, key_mask, blk):
    """One pre-norm transformer block on one image's (n_pad, DIM) token matrix."""
    (ln1_g, ln1_b, wqkv, bqkv, wo, bo, ln2_g, ln2_b, w1, b1, w2, b2) = blk

    # ---- multi-head self-attention ------------------------------------------
    xn = _layernorm(x, ln1_g[...], ln1_b[...])
    xb = xn.astype(jnp.bfloat16)
    # Single 192-wide QKV projection (softmax scale pre-folded into the Q part).
    qkv = jnp.dot(xb, wqkv[...], preferred_element_type=jnp.float32) + bqkv[...]
    q = qkv[:, :DIM].astype(jnp.bfloat16)
    k = qkv[:, DIM:2 * DIM].astype(jnp.bfloat16)
    v = qkv[:, 2 * DIM:].astype(jnp.bfloat16)

    heads_out = []
    for h in range(HEADS):                                   # static unroll
        sl = slice(h * HEAD_DIM, (h + 1) * HEAD_DIM)
        qh, kh, vh = q[:, sl], k[:, sl], v[:, sl]
        # q @ k^T via contraction on the last dims (no explicit transpose)
        s = jax.lax.dot_general(qh, kh, (((1,), (1,)), ((), ())),
                                preferred_element_type=jnp.float32)
        s = s + key_mask                                     # mask pad keys
        s = s - jnp.max(s, axis=-1, keepdims=True)
        p = jnp.exp(s)
        p = p * pl.reciprocal(jnp.sum(p, axis=-1, keepdims=True), approx=True)
        heads_out.append(jnp.dot(p.astype(jnp.bfloat16), vh,
                                 preferred_element_type=jnp.float32))
    # One (N,64)@(64,64) output projection instead of 4 K=16 partial matmuls.
    hv = jnp.concatenate(heads_out, axis=-1).astype(jnp.bfloat16)
    attn = jnp.dot(hv, wo[...], preferred_element_type=jnp.float32) + bo[...]
    x = x + attn

    # ---- MLP ------------------------------------------------------------------
    xn = _layernorm(x, ln2_g[...], ln2_b[...])
    h1 = jnp.dot(xn.astype(jnp.bfloat16), w1[...],
                 preferred_element_type=jnp.float32) + b1[...]
    # TODO(synk): upstream may use exact-erf GELU (nn.GELU default); tanh approximation used.
    h1 = jax.nn.gelu(h1, approximate=True)
    h2 = jnp.dot(h1.astype(jnp.bfloat16), w2[...],
                 preferred_element_type=jnp.float32) + b2[...]
    return x + h2


# ----------------------------- fused kernel -----------------------------------
def _d2_image_kernel(n_tok, *refs):
    """Entire D2_net forward for ONE image per grid step.

    Token layout (n_pad rows): rows [0, n_patches) = patch tokens,
    row n_patches = cls token, remaining rows = zero padding (masked as keys).
    """
    patches_ref, tok_bias_ref, patch_w_ref = refs[:3]
    idx = 3
    blocks = []
    for _ in range(DEPTH):
        blocks.append(refs[idx:idx + len(_BLK_KEYS)])
        idx += len(_BLK_KEYS)
    head_g, head_b, head_w, head_bias = refs[idx:idx + 4]
    o_ref = refs[idx + 4]

    n_pad = tok_bias_ref.shape[0]
    cls_row = n_tok - 1                                      # == n_patches

    # Patch embed; patch bias / cls token / positional embedding are all folded
    # into the precomputed per-token additive term tok_bias (pad rows stay zero).
    x = jnp.dot(patches_ref[...], patch_w_ref[...],
                preferred_element_type=jnp.float32) + tok_bias_ref[...]

    # Pad-key mask generated in-kernel (no HBM mask traffic, no VMEM residency).
    col = jax.lax.broadcasted_iota(jnp.int32, (n_pad, n_pad), 1)
    key_mask = jnp.where(col < n_tok, 0.0, -1e9).astype(jnp.float32)

    for blk in blocks:                                       # static DEPTH unroll
        x = _encoder_block(x, key_mask, blk)

    # classification head on the cls token (single static row slice)
    cls = x[cls_row:cls_row + 1, :]
    cls = _layernorm(cls, head_g[...], head_b[...])
    o_ref[...] = (jnp.dot(cls.astype(jnp.bfloat16), head_w[...],
                          preferred_element_type=jnp.float32) + head_bias[...])


# ----------------------------- wrapper ----------------------------------------
def _const_spec(shape):
    nd = len(shape)
    return pl.BlockSpec(shape, lambda b, nd=nd: (0,) * nd)   # VMEM-resident across steps


@jax.jit
def d2_net_forward(x, params):
    """x: NCHW float32 (B, C, H, W) -> (B, 1)."""
    B, C, H, W = x.shape
    nh, nw = H // PATCH, W // PATCH
    n_patches = nh * nw
    n_tok = n_patches + 1
    n_pad = ((n_tok + 7) // 8) * 8                 # sublane-align token count
    k_dim = C * PATCH * PATCH

    # NCHW -> (B, n_pad, C*P*P): Conv2d(k=P, stride=P) patchify + zero pad rows.
    patches = x.reshape(B, C, nh, PATCH, nw, PATCH)
    patches = patches.transpose(0, 2, 4, 1, 3, 5).reshape(B, n_patches, k_dim)
    patches = jnp.pad(patches, ((0, 0), (0, n_pad - n_patches), (0, 0)))
    patches = patches.astype(jnp.bfloat16)

    # Per-token additive term (shared across batch, broadcast happens per image):
    # rows [0,n_patches)=pos[1:]+patch_b, row n_patches=pos[0]+cls, pad rows = 0.
    pos = params["pos"][0]
    tok_bias = jnp.zeros((n_pad, DIM), jnp.float32)
    tok_bias = tok_bias.at[:n_patches].set(pos[1:] + params["patch_b"])
    tok_bias = tok_bias.at[n_patches].set(pos[0] + params["cls"][0, 0])

    # Fuse Q/K/V weights (192-wide) and fold the 1/sqrt(head_dim) scale into Wq/bq.
    scale = 1.0 / (HEAD_DIM ** 0.5)
    inputs = [patches, tok_bias, params["patch_w"]]
    for blk in params["blocks"]:
        wq = (blk["wq"].astype(jnp.float32) * scale).astype(jnp.bfloat16)
        bq = blk["bq"] * scale
        wqkv = jnp.concatenate([wq, blk["wk"], blk["wv"]], axis=1)     # (DIM, 3*DIM) bf16
        bqkv = jnp.concatenate([bq, blk["bk"], blk["bv"]], axis=1)     # (1, 3*DIM) f32
        fused = {"ln1_g": blk["ln1_g"], "ln1_b": blk["ln1_b"],
                 "wqkv": wqkv, "bqkv": bqkv,
                 "wo": blk["wo"], "bo": blk["bo"],
                 "ln2_g": blk["ln2_g"], "ln2_b": blk["ln2_b"],
                 "w1": blk["w1"], "b1": blk["b1"],
                 "w2": blk["w2"], "b2": blk["b2"]}
        inputs += [fused[key] for key in _BLK_KEYS]
    inputs += [params["head_g"], params["head_b"], params["head_w"], params["head_bias"]]

    in_specs = [pl.BlockSpec((None, n_pad, k_dim), lambda b: (b, 0, 0))]  # per-image patches
    in_specs += [_const_spec(a.shape) for a in inputs[1:]]                # weights stay resident

    kernel = functools.partial(_d2_image_kernel, n_tok)
    out = pl.pallas_call(
        kernel,
        out_shape=jax.ShapeDtypeStruct((B, 1, NUM_CLASSES), jnp.float32),
        grid=(B,),
        in_specs=in_specs,
        out_specs=pl.BlockSpec((None, 1, NUM_CLASSES), lambda b: (b, 0, 0)),
        compiler_params=pltpu.CompilerParams(dimension_semantics=("parallel",)),
    )(*inputs)
    return out.reshape(B, NUM_CLASSES)


# ----------------------------- params -----------------------------------------
def init_params(key, pan_band, h, w):
    n_patches = (h // PATCH) * (w // PATCH)
    k_dim = pan_band * PATCH * PATCH
    keys = jax.random.split(key, 4 + DEPTH * 6)
    ki = iter(keys)

    def nrm(k, shape, dtype=jnp.bfloat16, scale=0.02):
        return (jax.random.normal(k, shape, jnp.float32) * scale).astype(dtype)

    params = {
        "patch_w": nrm(next(ki), (k_dim, DIM)),                       # bf16 (matmul weight)
        "patch_b": jnp.zeros((1, DIM), jnp.float32),
        "cls": nrm(next(ki), (1, 1, DIM), jnp.float32),
        "pos": nrm(next(ki), (1, n_patches + 1, DIM), jnp.float32),
        "head_g": jnp.ones((1, DIM), jnp.float32),
        "head_b": jnp.zeros((1, DIM), jnp.float32),
        "head_w": nrm(next(ki), (DIM, NUM_CLASSES)),                  # bf16 (matmul weight)
        "head_bias": jnp.zeros((1, NUM_CLASSES), jnp.float32),
        "blocks": [],
    }
    for _ in range(DEPTH):
        blk = {
            "ln1_g": jnp.ones((1, DIM), jnp.float32),
            "ln1_b": jnp.zeros((1, DIM), jnp.float32),
            "wq": nrm(next(ki), (DIM, DIM)),
            "bq": jnp.zeros((1, DIM), jnp.float32),
            "wk": nrm(next(ki), (DIM, DIM)),
            "bk": jnp.zeros((1, DIM), jnp.float32),
            "wv": nrm(next(ki), (DIM, DIM)),
            "bv": jnp.zeros((1, DIM), jnp.float32),
            "wo": nrm(next(ki), (DIM, DIM)),
            "bo": jnp.zeros((1, DIM), jnp.float32),
            "ln2_g": jnp.ones((1, DIM), jnp.float32),
            "ln2_b": jnp.zeros((1, DIM), jnp.float32),
            "w1": nrm(next(ki), (DIM, MLP_DIM)),
            "b1": jnp.zeros((1, MLP_DIM), jnp.float32),
            "w2": nrm(next(ki), (MLP_DIM, DIM)),
            "b2": jnp.zeros((1, DIM), jnp.float32),
        }
        params["blocks"].append(blk)
    return params


if __name__ == "__main__":
    key = jax.random.PRNGKey(0)
    kx, kp = jax.random.split(key)

    pan_band = 1
    B, H, W = 2, 16, 16
    x = jax.random.normal(kx, (B, pan_band, H, W), jnp.float32)   # NCHW, like PyTorch

    params = init_params(kp, pan_band, H, W)
    out = d2_net_forward(x, params)
    out = jax.block_until_ready(out)
    assert out.shape == (B, NUM_CLASSES), out.shape
    print("KERNEL_OK")
</pallas_src>

<mosaic_0001>
module attributes {stable_mosaic.version = 11 : i64} {
  func.func @_d2_image_kernel(%arg0: i32, %arg1: memref<1x24x16xbf16, #tpu.memory_space<vmem>>, %arg2: memref<24x64xf32, #tpu.memory_space<vmem>>, %arg3: memref<16x64xbf16, #tpu.memory_space<vmem>>, %arg4: memref<1x64xf32, #tpu.memory_space<vmem>>, %arg5: memref<1x64xf32, #tpu.memory_space<vmem>>, %arg6: memref<64x192xbf16, #tpu.memory_space<vmem>>, %arg7: memref<1x192xf32, #tpu.memory_space<vmem>>, %arg8: memref<64x64xbf16, #tpu.memory_space<vmem>>, %arg9: memref<1x64xf32, #tpu.memory_space<vmem>>, %arg10: memref<1x64xf32, #tpu.memory_space<vmem>>, %arg11: memref<1x64xf32, #tpu.memory_space<vmem>>, %arg12: memref<64x128xbf16, #tpu.memory_space<vmem>>, %arg13: memref<1x128xf32, #tpu.memory_space<vmem>>, %arg14: memref<128x64xbf16, #tpu.memory_space<vmem>>, %arg15: memref<1x64xf32, #tpu.memory_space<vmem>>, %arg16: memref<1x64xf32, #tpu.memory_space<vmem>>, %arg17: memref<1x64xf32, #tpu.memory_space<vmem>>, %arg18: memref<64x192xbf16, #tpu.memory_space<vmem>>, %arg19: memref<1x192xf32, #tpu.memory_space<vmem>>, %arg20: memref<64x64xbf16, #tpu.memory_space<vmem>>, %arg21: memref<1x64xf32, #tpu.memory_space<vmem>>, %arg22: memref<1x64xf32, #tpu.memory_space<vmem>>, %arg23: memref<1x64xf32, #tpu.memory_space<vmem>>, %arg24: memref<64x128xbf16, #tpu.memory_space<vmem>>, %arg25: memref<1x128xf32, #tpu.memory_space<vmem>>, %arg26: memref<128x64xbf16, #tpu.memory_space<vmem>>, %arg27: memref<1x64xf32, #tpu.memory_space<vmem>>, %arg28: memref<1x64xf32, #tpu.memory_space<vmem>>, %arg29: memref<1x64xf32, #tpu.memory_space<vmem>>, %arg30: memref<64x1xbf16, #tpu.memory_space<vmem>>, %arg31: memref<1x1xf32, #tpu.memory_space<vmem>>, %arg32: memref<1x1x1xf32, #tpu.memory_space<vmem>>) attributes {dimension_semantics = [#tpu.dimension_semantics<parallel>], iteration_bounds = array<i64: 2>, scalar_prefetch = 0 : i64, scratch_operands = 0 : i64, tpu.core_type = #tpu.core_type<tc>, window_params = [{transform_indices = @transform_0, window_bounds = array<i64: 1, 24, 16>}, {pipeline_mode = #tpu.pipeline_mode<synchronous>, transform_indices = @transform_1, window_bounds = array<i64: 24, 64>}, {pipeline_mode = #tpu.pipeline_mode<synchronous>, transform_indices = @transform_2, window_bounds = array<i64: 16, 64>}, {pipeline_mode = #tpu.pipeline_mode<synchronous>, transform_indices = @transform_3, window_bounds = array<i64: 1, 64>}, {pipeline_mode = #tpu.pipeline_mode<synchronous>, transform_indices = @transform_4, window_bounds = array<i64: 1, 64>}, {pipeline_mode = #tpu.pipeline_mode<synchronous>, transform_indices = @transform_5, window_bounds = array<i64: 64, 192>}, {pipeline_mode = #tpu.pipeline_mode<synchronous>, transform_indices = @transform_6, window_bounds = array<i64: 1, 192>}, {pipeline_mode = #tpu.pipeline_mode<synchronous>, transform_indices = @transform_7, window_bounds = array<i64: 64, 64>}, {pipeline_mode = #tpu.pipeline_mode<synchronous>, transform_indices = @transform_8, window_bounds = array<i64: 1, 64>}, {pipeline_mode = #tpu.pipeline_mode<synchronous>, transform_indices = @transform_9, window_bounds = array<i64: 1, 64>}, {pipeline_mode = #tpu.pipeline_mode<synchronous>, transform_indices = @transform_10, window_bounds = array<i64: 1, 64>}, {pipeline_mode = #tpu.pipeline_mode<synchronous>, transform_indices = @transform_11, window_bounds = array<i64: 64, 128>}, {pipeline_mode = #tpu.pipeline_mode<synchronous>, transform_indices = @transform_12, window_bounds = array<i64: 1, 128>}, {pipeline_mode = #tpu.pipeline_mode<synchronous>, transform_indices = @transform_13, window_bounds = array<i64: 128, 64>}, {pipeline_mode = #tpu.pipeline_mode<synchronous>, transform_indices = @transform_14, window_bounds = array<i64: 1, 64>}, {pipeline_mode = #tpu.pipeline_mode<synchronous>, transform_indices = @transform_15, window_bounds = array<i64: 1, 64>}, {pipeline_mode = #tpu.pipeline_mode<synchronous>, transform_indices = @transform_16, window_bounds = array<i64: 1, 64>}, {pipeline_mode = #tpu.pipeline_mode<synchronous>, transform_indices = @transform_17, window_bounds = array<i64: 64, 192>}, {pipeline_mode = #tpu.pipeline_mode<synchronous>, transform_indices = @transform_18, window_bounds = array<i64: 1, 192>}, {pipeline_mode = #tpu.pipeline_mode<synchronous>, transform_indices = @transform_19, window_bounds = array<i64: 64, 64>}, {pipeline_mode = #tpu.pipeline_mode<synchronous>, transform_indices = @transform_20, window_bounds = array<i64: 1, 64>}, {pipeline_mode = #tpu.pipeline_mode<synchronous>, transform_indices = @transform_21, window_bounds = array<i64: 1, 64>}, {pipeline_mode = #tpu.pipeline_mode<synchronous>, transform_indices = @transform_22, window_bounds = array<i64: 1, 64>}, {pipeline_mode = #tpu.pipeline_mode<synchronous>, transform_indices = @transform_23, window_bounds = array<i64: 64, 128>}, {pipeline_mode = #tpu.pipeline_mode<synchronous>, transform_indices = @transform_24, window_bounds = array<i64: 1, 128>}, {pipeline_mode = #tpu.pipeline_mode<synchronous>, transform_indices = @transform_25, window_bounds = array<i64: 128, 64>}, {pipeline_mode = #tpu.pipeline_mode<synchronous>, transform_indices = @transform_26, window_bounds = array<i64: 1, 64>}, {pipeline_mode = #tpu.pipeline_mode<synchronous>, transform_indices = @transform_27, window_bounds = array<i64: 1, 64>}, {pipeline_mode = #tpu.pipeline_mode<synchronous>, transform_indices = @transform_28, window_bounds = array<i64: 1, 64>}, {pipeline_mode = #tpu.pipeline_mode<synchronous>, transform_indices = @transform_29, window_bounds = array<i64: 64, 1>}, {pipeline_mode = #tpu.pipeline_mode<synchronous>, transform_indices = @transform_30, window_bounds = array<i64: 1, 1>}, {transform_indices = @transform_31, window_bounds = array<i64: 1, 1, 1>}]} {
    %c0 = arith.constant 0 : index
    %c0_0 = arith.constant 0 : index
    %c0_1 = arith.constant 0 : index
    %0 = vector.load %arg1[%c0, %c0_0, %c0_1] : memref<1x24x16xbf16, #tpu.memory_space<vmem>>, vector<1x24x16xbf16>
    %1 = vector.shape_cast %0 : vector<1x24x16xbf16> to vector<24x16xbf16>
    %c0_2 = arith.constant 0 : index
    %c0_3 = arith.constant 0 : index
    %2 = vector.load %arg3[%c0_2, %c0_3] : memref<16x64xbf16, #tpu.memory_space<vmem>>, vector<16x64xbf16>
    %cst = arith.constant dense<0.000000e+00> : vector<24x64xf32>
    %3 = tpu.matmul %1, %2, %cst {dimension_numbers = #tpu.dot_dimension_numbers<[1], [0], [0], [1], [0, 0, 1, 1], [], []>} : vector<24x16xbf16>, vector<16x64xbf16>, vector<24x64xf32> -> vector<24x64xf32>
    %c0_4 = arith.constant 0 : index
    %c0_5 = arith.constant 0 : index
    %4 = vector.load %arg2[%c0_4, %c0_5] : memref<24x64xf32, #tpu.memory_space<vmem>>, vector<24x64xf32>
    %5 = arith.addf %3, %4 : vector<24x64xf32>
    %6 = tpu.iota {dimensions = array<i32: 1>} : vector<24x24xi32>
    %c17_i32 = arith.constant 17 : i32
    %7 = vector.broadcast %c17_i32 : i32 to vector<24x24xi32>
    %8 = arith.cmpi slt, %6, %7 : vector<24x24xi32>
    %cst_6 = arith.constant 0.000000e+00 : f32
    %cst_7 = arith.constant -1.000000e+09 : f32
    %9 = vector.broadcast %cst_6 : f32 to vector<24x24xf32>
    %10 = vector.broadcast %cst_7 : f32 to vector<24x24xf32>
    %11 = arith.select %8, %9, %10 : vector<24x24xi1>, vector<24x24xf32>
    %c0_8 = arith.constant 0 : index
    %c0_9 = arith.constant 0 : index
    %12 = vector.load %arg4[%c0_8, %c0_9] : memref<1x64xf32, #tpu.memory_space<vmem>>, vector<1x64xf32>
    %c0_10 = arith.constant 0 : index
    %c0_11 = arith.constant 0 : index
    %13 = vector.load %arg5[%c0_10, %c0_11] : memref<1x64xf32, #tpu.memory_space<vmem>>, vector<1x64xf32>
    %cst_12 = arith.constant dense<0.000000e+00> : vector<24xf32>
    %14 = vector.multi_reduction <add>, %5, %cst_12 [1] : vector<24x64xf32> to vector<24xf32>
    %15 = vector.shape_cast %14 : vector<24xf32> to vector<24x1xf32>
    %cst_13 = arith.constant 6.400000e+01 : f32
    %16 = vector.broadcast %cst_13 : f32 to vector<24x1xf32>
    %17 = arith.divf %15, %16 : vector<24x1xf32>
    %18 = vector.broadcast %17 : vector<24x1xf32> to vector<24x64xf32>
    %19 = arith.subf %5, %18 : vector<24x64xf32>
    %20 = arith.mulf %19, %19 : vector<24x64xf32>
    %cst_14 = arith.constant dense<0.000000e+00> : vector<24xf32>
    %21 = vector.multi_reduction <add>, %20, %cst_14 [1] : vector<24x64xf32> to vector<24xf32>
    %22 = vector.shape_cast %21 : vector<24xf32> to vector<24x1xf32>
    %cst_15 = arith.constant 6.400000e+01 : f32
    %23 = vector.broadcast %cst_15 : f32 to vector<24x1xf32>
    %24 = arith.divf %22, %23 : vector<24x1xf32>
    %25 = vector.broadcast %17 : vector<24x1xf32> to vector<24x64xf32>
    %26 = arith.subf %5, %25 : vector<24x64xf32>
    %cst_16 = arith.constant 9.99999974E-6 : f32
    %27 = vector.broadcast %cst_16 : f32 to vector<24x1xf32>
    %28 = arith.addf %24, %27 : vector<24x1xf32>
    %29 = math.rsqrt %28 : vector<24x1xf32>
    %30 = vector.broadcast %29 : vector<24x1xf32> to vector<24x64xf32>
    %31 = arith.mulf %26, %30 : vector<24x64xf32>
    %32 = vector.broadcast %12 : vector<1x64xf32> to vector<24x64xf32>
    %33 = arith.mulf %31, %32 : vector<24x64xf32>
    %34 = vector.broadcast %13 : vector<1x64xf32> to vector<24x64xf32>
    %35 = arith.addf %33, %34 : vector<24x64xf32>
    %36 = arith.truncf %35 : vector<24x64xf32> to vector<24x64xbf16>
    %c0_17 = arith.constant 0 : index
    %c0_18 = arith.constant 0 : index
    %37 = vector.load %arg6[%c0_17, %c0_18] : memref<64x192xbf16, #tpu.memory_space<vmem>>, vector<64x192xbf16>
    %cst_19 = arith.constant dense<0.000000e+00> : vector<24x192xf32>
    %38 = tpu.matmul %36, %37, %cst_19 {dimension_numbers = #tpu.dot_dimension_numbers<[1], [0], [0], [1], [0, 0, 1, 1], [], []>} : vector<24x64xbf16>, vector<64x192xbf16>, vector<24x192xf32> -> vector<24x192xf32>
    %c0_20 = arith.constant 0 : index
    %c0_21 = arith.constant 0 : index
    %39 = vector.load %arg7[%c0_20, %c0_21] : memref<1x192xf32, #tpu.memory_space<vmem>>, vector<1x192xf32>
    %40 = vector.broadcast %39 : vector<1x192xf32> to vector<24x192xf32>
    %41 = arith.addf %38, %40 : vector<24x192xf32>
    %42 = vector.extract_strided_slice %41 {offsets = [0, 0], sizes = [24, 64], strides = [1, 1]} : vector<24x192xf32> to vector<24x64xf32>
    %43 = arith.truncf %42 : vector<24x64xf32> to vector<24x64xbf16>
    %44 = vector.extract_strided_slice %41 {offsets = [0, 64], sizes = [24, 64], strides = [1, 1]} : vector<24x192xf32> to vector<24x64xf32>
    %45 = arith.truncf %44 : vector<24x64xf32> to vector<24x64xbf16>
    %46 = vector.extract_strided_slice %41 {offsets = [0, 128], sizes = [24, 64], strides = [1, 1]} : vector<24x192xf32> to vector<24x64xf32>
    %47 = arith.truncf %46 : vector<24x64xf32> to vector<24x64xbf16>
    %48 = vector.extract_strided_slice %43 {offsets = [0, 0], sizes = [24, 16], strides = [1, 1]} : vector<24x64xbf16> to vector<24x16xbf16>
    %49 = vector.extract_strided_slice %45 {offsets = [0, 0], sizes = [24, 16], strides = [1, 1]} : vector<24x64xbf16> to vector<24x16xbf16>
    %50 = vector.extract_strided_slice %47 {offsets = [0, 0], sizes = [24, 16], strides = [1, 1]} : vector<24x64xbf16> to vector<24x16xbf16>
    %cst_22 = arith.constant dense<0.000000e+00> : vector<24x24xf32>
    %51 = tpu.matmul %48, %49, %cst_22 {dimension_numbers = #tpu.dot_dimension_numbers<[1], [1], [0], [0], [0, 0, 1, 0], [], []>} : vector<24x16xbf16>, vector<24x16xbf16>, vector<24x24xf32> -> vector<24x24xf32>
    %52 = arith.addf %51, %11 : vector<24x24xf32>
    %cst_23 = arith.constant dense<0xFF800000> : vector<24xf32>
    %53 = vector.multi_reduction <maximumf>, %52, %cst_23 [1] : vector<24x24xf32> to vector<24xf32>
    %54 = vector.shape_cast %53 : vector<24xf32> to vector<24x1xf32>
    %55 = vector.broadcast %54 : vector<24x1xf32> to vector<24x24xf32>
    %56 = arith.subf %52, %55 : vector<24x24xf32>
    %57 = math.exp %56 : vector<24x24xf32>
    %cst_24 = arith.constant dense<0.000000e+00> : vector<24xf32>
    %58 = vector.multi_reduction <add>, %57, %cst_24 [1] : vector<24x24xf32> to vector<24xf32>
    %59 = vector.shape_cast %58 : vector<24xf32> to vector<24x1xf32>
    %60 = tpu.reciprocal %59 {approx = true} : vector<24x1xf32> -> vector<24x1xf32>
    %61 = vector.broadcast %60 : vector<24x1xf32> to vector<24x24xf32>
    %62 = arith.mulf %57, %61 : vector<24x24xf32>
    %63 = arith.truncf %62 : vector<24x24xf32> to vector<24x24xbf16>
    %cst_25 = arith.constant dense<0.000000e+00> : vector<24x16xf32>
    %64 = tpu.matmul %63, %50, %cst_25 {dimension_numbers = #tpu.dot_dimension_numbers<[1], [0], [0], [1], [0, 0, 1, 1], [], []>} : vector<24x24xbf16>, vector<24x16xbf16>, vector<24x16xf32> -> vector<24x16xf32>
    %65 = vector.extract_strided_slice %43 {offsets = [0, 16], sizes = [24, 16], strides = [1, 1]} : vector<24x64xbf16> to vector<24x16xbf16>
    %66 = vector.extract_strided_slice %45 {offsets = [0, 16], sizes = [24, 16], strides = [1, 1]} : vector<24x64xbf16> to vector<24x16xbf16>
    %67 = vector.extract_strided_slice %47 {offsets = [0, 16], sizes = [24, 16], strides = [1, 1]} : vector<24x64xbf16> to vector<24x16xbf16>
    %cst_26 = arith.constant dense<0.000000e+00> : vector<24x24xf32>
    %68 = tpu.matmul %65, %66, %cst_26 {dimension_numbers = #tpu.dot_dimension_numbers<[1], [1], [0], [0], [0, 0, 1, 0], [], []>} : vector<24x16xbf16>, vector<24x16xbf16>, vector<24x24xf32> -> vector<24x24xf32>
    %69 = arith.addf %68, %11 : vector<24x24xf32>
    %cst_27 = arith.constant dense<0xFF800000> : vector<24xf32>
    %70 = vector.multi_reduction <maximumf>, %69, %cst_27 [1] : vector<24x24xf32> to vector<24xf32>
    %71 = vector.shape_cast %70 : vector<24xf32> to vector<24x1xf32>
    %72 = vector.broadcast %71 : vector<24x1xf32> to vector<24x24xf32>
    %73 = arith.subf %69, %72 : vector<24x24xf32>
    %74 = math.exp %73 : vector<24x24xf32>
    %cst_28 = arith.constant dense<0.000000e+00> : vector<24xf32>
    %75 = vector.multi_reduction <add>, %74, %cst_28 [1] : vector<24x24xf32> to vector<24xf32>
    %76 = vector.shape_cast %75 : vector<24xf32> to vector<24x1xf32>
    %77 = tpu.reciprocal %76 {approx = true} : vector<24x1xf32> -> vector<24x1xf32>
    %78 = vector.broadcast %77 : vector<24x1xf32> to vector<24x24xf32>
    %79 = arith.mulf %74, %78 : vector<24x24xf32>
    %80 = arith.truncf %79 : vector<24x24xf32> to vector<24x24xbf16>
    %cst_29 = arith.constant dense<0.000000e+00> : vector<24x16xf32>
    %81 = tpu.matmul %80, %67, %cst_29 {dimension_numbers = #tpu.dot_dimension_numbers<[1], [0], [0], [1], [0, 0, 1, 1], [], []>} : vector<24x24xbf16>, vector<24x16xbf16>, vector<24x16xf32> -> vector<24x16xf32>
    %82 = vector.extract_strided_slice %43 {offsets = [0, 32], sizes = [24, 16], strides = [1, 1]} : vector<24x64xbf16> to vector<24x16xbf16>
    %83 = vector.extract_strided_slice %45 {offsets = [0, 32], sizes = [24, 16], strides = [1, 1]} : vector<24x64xbf16> to vector<24x16xbf16>
    %84 = vector.extract_strided_slice %47 {offsets = [0, 32], sizes = [24, 16], strides = [1, 1]} : vector<24x64xbf16> to vector<24x16xbf16>
    %cst_30 = arith.constant dense<0.000000e+00> : vector<24x24xf32>
    %85 = tpu.matmul %82, %83, %cst_30 {dimension_numbers = #tpu.dot_dimension_numbers<[1], [1], [0], [0], [0, 0, 1, 0], [], []>} : vector<24x16xbf16>, vector<24x16xbf16>, vector<24x24xf32> -> vector<24x24xf32>
    %86 = arith.addf %85, %11 : vector<24x24xf32>
    %cst_31 = arith.constant dense<0xFF800000> : vector<24xf32>
    %87 = vector.multi_reduction <maximumf>, %86, %cst_31 [1] : vector<24x24xf32> to vector<24xf32>
    %88 = vector.shape_cast %87 : vector<24xf32> to vector<24x1xf32>
    %89 = vector.broadcast %88 : vector<24x1xf32> to vector<24x24xf32>
    %90 = arith.subf %86, %89 : vector<24x24xf32>
    %91 = math.exp %90 : vector<24x24xf32>
    %cst_32 = arith.constant dense<0.000000e+00> : vector<24xf32>
    %92 = vector.multi_reduction <add>, %91, %cst_32 [1] : vector<24x24xf32> to vector<24xf32>
    %93 = vector.shape_cast %92 : vector<24xf32> to vector<24x1xf32>
    %94 = tpu.reciprocal %93 {approx = true} : vector<24x1xf32> -> vector<24x1xf32>
    %95 = vector.broadcast %94 : vector<24x1xf32> to vector<24x24xf32>
    %96 = arith.mulf %91, %95 : vector<24x24xf32>
    %97 = arith.truncf %96 : vector<24x24xf32> to vector<24x24xbf16>
    %cst_33 = arith.constant dense<0.000000e+00> : vector<24x16xf32>
    %98 = tpu.matmul %97, %84, %cst_33 {dimension_numbers = #tpu.dot_dimension_numbers<[1], [0], [0], [1], [0, 0, 1, 1], [], []>} : vector<24x24xbf16>, vector<24x16xbf16>, vector<24x16xf32> -> vector<24x16xf32>
    %99 = vector.extract_strided_slice %43 {offsets = [0, 48], sizes = [24, 16], strides = [1, 1]} : vector<24x64xbf16> to vector<24x16xbf16>
    %100 = vector.extract_strided_slice %45 {offsets = [0, 48], sizes = [24, 16], strides = [1, 1]} : vector<24x64xbf16> to vector<24x16xbf16>
    %101 = vector.extract_strided_slice %47 {offsets = [0, 48], sizes = [24, 16], strides = [1, 1]} : vector<24x64xbf16> to vector<24x16xbf16>
    %cst_34 = arith.constant dense<0.000000e+00> : vector<24x24xf32>
    %102 = tpu.matmul %99, %100, %cst_34 {dimension_numbers = #tpu.dot_dimension_numbers<[1], [1], [0], [0], [0, 0, 1, 0], [], []>} : vector<24x16xbf16>, vector<24x16xbf16>, vector<24x24xf32> -> vector<24x24xf32>
    %103 = arith.addf %102, %11 : vector<24x24xf32>
    %cst_35 = arith.constant dense<0xFF800000> : vector<24xf32>
    %104 = vector.multi_reduction <maximumf>, %103, %cst_35 [1] : vector<24x24xf32> to vector<24xf32>
    %105 = vector.shape_cast %104 : vector<24xf32> to vector<24x1xf32>
    %106 = vector.broadcast %105 : vector<24x1xf32> to vector<24x24xf32>
    %107 = arith.subf %103, %106 : vector<24x24xf32>
    %108 = math.exp %107 : vector<24x24xf32>
    %cst_36 = arith.constant dense<0.000000e+00> : vector<24xf32>
    %109 = vector.multi_reduction <add>, %108, %cst_36 [1] : vector<24x24xf32> to vector<24xf32>
    %110 = vector.shape_cast %109 : vector<24xf32> to vector<24x1xf32>
    %111 = tpu.reciprocal %110 {approx = true} : vector<24x1xf32> -> vector<24x1xf32>
    %112 = vector.broadcast %111 : vector<24x1xf32> to vector<24x24xf32>
    %113 = arith.mulf %108, %112 : vector<24x24xf32>
    %114 = arith.truncf %113 : vector<24x24xf32> to vector<24x24xbf16>
    %cst_37 = arith.constant dense<0.000000e+00> : vector<24x16xf32>
    %115 = tpu.matmul %114, %101, %cst_37 {dimension_numbers = #tpu.dot_dimension_numbers<[1], [0], [0], [1], [0, 0, 1, 1], [], []>} : vector<24x24xbf16>, vector<24x16xbf16>, vector<24x16xf32> -> vector<24x16xf32>
    %116 = tpu.concatenate %64, %81, %98, %115 in 1 : vector<24x16xf32>, vector<24x16xf32>, vector<24x16xf32>, vector<24x16xf32> -> vector<24x64xf32>
    %117 = arith.truncf %116 : vector<24x64xf32> to vector<24x64xbf16>
    %c0_38 = arith.constant 0 : index
    %c0_39 = arith.constant 0 : index
    %118 = vector.load %arg8[%c0_38, %c0_39] : memref<64x64xbf16, #tpu.memory_space<vmem>>, vector<64x64xbf16>
    %cst_40 = arith.constant dense<0.000000e+00> : vector<24x64xf32>
    %119 = tpu.matmul %117, %118, %cst_40 {dimension_numbers = #tpu.dot_dimension_numbers<[1], [0], [0], [1], [0, 0, 1, 1], [], []>} : vector<24x64xbf16>, vector<64x64xbf16>, vector<24x64xf32> -> vector<24x64xf32>
    %c0_41 = arith.constant 0 : index
    %c0_42 = arith.constant 0 : index
    %120 = vector.load %arg9[%c0_41, %c0_42] : memref<1x64xf32, #tpu.memory_space<vmem>>, vector<1x64xf32>
    %121 = vector.broadcast %120 : vector<1x64xf32> to vector<24x64xf32>
    %122 = arith.addf %119, %121 : vector<24x64xf32>
    %123 = arith.addf %5, %122 : vector<24x64xf32>
    %c0_43 = arith.constant 0 : index
    %c0_44 = arith.constant 0 : index
    %124 = vector.load %arg10[%c0_43, %c0_44] : memref<1x64xf32, #tpu.memory_space<vmem>>, vector<1x64xf32>
    %c0_45 = arith.constant 0 : index
    %c0_46 = arith.constant 0 : index
    %125 = vector.load %arg11[%c0_45, %c0_46] : memref<1x64xf32, #tpu.memory_space<vmem>>, vector<1x64xf32>
    %cst_47 = arith.constant dense<0.000000e+00> : vector<24xf32>
    %126 = vector.multi_reduction <add>, %123, %cst_47 [1] : vector<24x64xf32> to vector<24xf32>
    %127 = vector.shape_cast %126 : vector<24xf32> to vector<24x1xf32>
    %cst_48 = arith.constant 6.400000e+01 : f32
    %128 = vector.broadcast %cst_48 : f32 to vector<24x1xf32>
    %129 = arith.divf %127, %128 : vector<24x1xf32>
    %130 = vector.broadcast %129 : vector<24x1xf32> to vector<24x64xf32>
    %131 = arith.subf %123, %130 : vector<24x64xf32>
    %132 = arith.mulf %131, %131 : vector<24x64xf32>
    %cst_49 = arith.constant dense<0.000000e+00> : vector<24xf32>
    %133 = vector.multi_reduction <add>, %132, %cst_49 [1] : vector<24x64xf32> to vector<24xf32>
    %134 = vector.shape_cast %133 : vector<24xf32> to vector<24x1xf32>
    %cst_50 = arith.constant 6.400000e+01 : f32
    %135 = vector.broadcast %cst_50 : f32 to vector<24x1xf32>
    %136 = arith.divf %134, %135 : vector<24x1xf32>
    %137 = vector.broadcast %129 : vector<24x1xf32> to vector<24x64xf32>
    %138 = arith.subf %123, %137 : vector<24x64xf32>
    %cst_51 = arith.constant 9.99999974E-6 : f32
    %139 = vector.broadcast %cst_51 : f32 to vector<24x1xf32>
    %140 = arith.addf %136, %139 : vector<24x1xf32>
    %141 = math.rsqrt %140 : vector<24x1xf32>
    %142 = vector.broadcast %141 : vector<24x1xf32> to vector<24x64xf32>
    %143 = arith.mulf %138, %142 : vector<24x64xf32>
    %144 = vector.broadcast %124 : vector<1x64xf32> to vector<24x64xf32>
    %145 = arith.mulf %143, %144 : vector<24x64xf32>
    %146 = vector.broadcast %125 : vector<1x64xf32> to vector<24x64xf32>
    %147 = arith.addf %145, %146 : vector<24x64xf32>
    %148 = arith.truncf %147 : vector<24x64xf32> to vector<24x64xbf16>
    %c0_52 = arith.constant 0 : index
    %c0_53 = arith.constant 0 : index
    %149 = vector.load %arg12[%c0_52, %c0_53] : memref<64x128xbf16, #tpu.memory_space<vmem>>, vector<64x128xbf16>
    %cst_54 = arith.constant dense<0.000000e+00> : vector<24x128xf32>
    %150 = tpu.matmul %148, %149, %cst_54 {dimension_numbers = #tpu.dot_dimension_numbers<[1], [0], [0], [1], [0, 0, 1, 1], [], []>} : vector<24x64xbf16>, vector<64x128xbf16>, vector<24x128xf32> -> vector<24x128xf32>
    %c0_55 = arith.constant 0 : index
    %c0_56 = arith.constant 0 : index
    %151 = vector.load %arg13[%c0_55, %c0_56] : memref<1x128xf32, #tpu.memory_space<vmem>>, vector<1x128xf32>
    %152 = vector.broadcast %151 : vector<1x128xf32> to vector<24x128xf32>
    %153 = arith.addf %150, %152 : vector<24x128xf32>
    %154 = arith.mulf %153, %153 : vector<24x128xf32>
    %155 = arith.mulf %153, %154 : vector<24x128xf32>
    %cst_57 = arith.constant 4.471500e-02 : f32
    %156 = vector.broadcast %cst_57 : f32 to vector<24x128xf32>
    %157 = arith.mulf %156, %155 : vector<24x128xf32>
    %158 = arith.addf %153, %157 : vector<24x128xf32>
    %cst_58 = arith.constant 0.797884583 : f32
    %159 = vector.broadcast %cst_58 : f32 to vector<24x128xf32>
    %160 = arith.mulf %159, %158 : vector<24x128xf32>
    %161 = math.tanh %160 : vector<24x128xf32>
    %cst_59 = arith.constant 1.000000e+00 : f32
    %162 = vector.broadcast %cst_59 : f32 to vector<24x128xf32>
    %163 = arith.addf %162, %161 : vector<24x128xf32>
    %cst_60 = arith.constant 5.000000e-01 : f32
    %164 = vector.broadcast %cst_60 : f32 to vector<24x128xf32>
    %165 = arith.mulf %164, %163 : vector<24x128xf32>
    %166 = arith.mulf %153, %165 : vector<24x128xf32>
    %167 = arith.truncf %166 : vector<24x128xf32> to vector<24x128xbf16>
    %c0_61 = arith.constant 0 : index
    %c0_62 = arith.constant 0 : index
    %168 = vector.load %arg14[%c0_61, %c0_62] : memref<128x64xbf16, #tpu.memory_space<vmem>>, vector<128x64xbf16>
    %cst_63 = arith.constant dense<0.000000e+00> : vector<24x64xf32>
    %169 = tpu.matmul %167, %168, %cst_63 {dimension_numbers = #tpu.dot_dimension_numbers<[1], [0], [0], [1], [0, 0, 1, 1], [], []>} : vector<24x128xbf16>, vector<128x64xbf16>, vector<24x64xf32> -> vector<24x64xf32>
    %c0_64 = arith.constant 0 : index
    %c0_65 = arith.constant 0 : index
    %170 = vector.load %arg15[%c0_64, %c0_65] : memref<1x64xf32, #tpu.memory_space<vmem>>, vector<1x64xf32>
    %171 = vector.broadcast %170 : vector<1x64xf32> to vector<24x64xf32>
    %172 = arith.addf %169, %171 : vector<24x64xf32>
    %173 = arith.addf %123, %172 : vector<24x64xf32>
    %c0_66 = arith.constant 0 : index
    %c0_67 = arith.constant 0 : index
    %174 = vector.load %arg16[%c0_66, %c0_67] : memref<1x64xf32, #tpu.memory_space<vmem>>, vector<1x64xf32>
    %c0_68 = arith.constant 0 : index
    %c0_69 = arith.constant 0 : index
    %175 = vector.load %arg17[%c0_68, %c0_69] : memref<1x64xf32, #tpu.memory_space<vmem>>, vector<1x64xf32>
    %cst_70 = arith.constant dense<0.000000e+00> : vector<24xf32>
    %176 = vector.multi_reduction <add>, %173, %cst_70 [1] : vector<24x64xf32> to vector<24xf32>
    %177 = vector.shape_cast %176 : vector<24xf32> to vector<24x1xf32>
    %cst_71 = arith.constant 6.400000e+01 : f32
    %178 = vector.broadcast %cst_71 : f32 to vector<24x1xf32>
    %179 = arith.divf %177, %178 : vector<24x1xf32>
    %180 = vector.broadcast %179 : vector<24x1xf32> to vector<24x64xf32>
    %181 = arith.subf %173, %180 : vector<24x64xf32>
    %182 = arith.mulf %181, %181 : vector<24x64xf32>
    %cst_72 = arith.constant dense<0.000000e+00> : vector<24xf32>
    %183 = vector.multi_reduction <add>, %182, %cst_72 [1] : vector<24x64xf32> to vector<24xf32>
    %184 = vector.shape_cast %183 : vector<24xf32> to vector<24x1xf32>
    %cst_73 = arith.constant 6.400000e+01 : f32
    %185 = vector.broadcast %cst_73 : f32 to vector<24x1xf32>
    %186 = arith.divf %184, %185 : vector<24x1xf32>
    %187 = vector.broadcast %179 : vector<24x1xf32> to vector<24x64xf32>
    %188 = arith.subf %173, %187 : vector<24x64xf32>
    %cst_74 = arith.constant 9.99999974E-6 : f32
    %189 = vector.broadcast %cst_74 : f32 to vector<24x1xf32>
    %190 = arith.addf %186, %189 : vector<24x1xf32>
    %191 = math.rsqrt %190 : vector<24x1xf32>
    %192 = vector.broadcast %191 : vector<24x1xf32> to vector<24x64xf32>
    %193 = arith.mulf %188, %192 : vector<24x64xf32>
    %194 = vector.broadcast %174 : vector<1x64xf32> to vector<24x64xf32>
    %195 = arith.mulf %193, %194 : vector<24x64xf32>
    %196 = vector.broadcast %175 : vector<1x64xf32> to vector<24x64xf32>
    %197 = arith.addf %195, %196 : vector<24x64xf32>
    %198 = arith.truncf %197 : vector<24x64xf32> to vector<24x64xbf16>
    %c0_75 = arith.constant 0 : index
    %c0_76 = arith.constant 0 : index
    %199 = vector.load %arg18[%c0_75, %c0_76] : memref<64x192xbf16, #tpu.memory_space<vmem>>, vector<64x192xbf16>
    %cst_77 = arith.constant dense<0.000000e+00> : vector<24x192xf32>
    %200 = tpu.matmul %198, %199, %cst_77 {dimension_numbers = #tpu.dot_dimension_numbers<[1], [0], [0], [1], [0, 0, 1, 1], [], []>} : vector<24x64xbf16>, vector<64x192xbf16>, vector<24x192xf32> -> vector<24x192xf32>
    %c0_78 = arith.constant 0 : index
    %c0_79 = arith.constant 0 : index
    %201 = vector.load %arg19[%c0_78, %c0_79] : memref<1x192xf32, #tpu.memory_space<vmem>>, vector<1x192xf32>
    %202 = vector.broadcast %201 : vector<1x192xf32> to vector<24x192xf32>
    %203 = arith.addf %200, %202 : vector<24x192xf32>
    %204 = vector.extract_strided_slice %203 {offsets = [0, 0], sizes = [24, 64], strides = [1, 1]} : vector<24x192xf32> to vector<24x64xf32>
    %205 = arith.truncf %204 : vector<24x64xf32> to vector<24x64xbf16>
    %206 = vector.extract_strided_slice %203 {offsets = [0, 64], sizes = [24, 64], strides = [1, 1]} : vector<24x192xf32> to vector<24x64xf32>
    %207 = arith.truncf %206 : vector<24x64xf32> to vector<24x64xbf16>
    %208 = vector.extract_strided_slice %203 {offsets = [0, 128], sizes = [24, 64], strides = [1, 1]} : vector<24x192xf32> to vector<24x64xf32>
    %209 = arith.truncf %208 : vector<24x64xf32> to vector<24x64xbf16>
    %210 = vector.extract_strided_slice %205 {offsets = [0, 0], sizes = [24, 16], strides = [1, 1]} : vector<24x64xbf16> to vector<24x16xbf16>
    %211 = vector.extract_strided_slice %207 {offsets = [0, 0], sizes = [24, 16], strides = [1, 1]} : vector<24x64xbf16> to vector<24x16xbf16>
    %212 = vector.extract_strided_slice %209 {offsets = [0, 0], sizes = [24, 16], strides = [1, 1]} : vector<24x64xbf16> to vector<24x16xbf16>
    %cst_80 = arith.constant dense<0.000000e+00> : vector<24x24xf32>
    %213 = tpu.matmul %210, %211, %cst_80 {dimension_numbers = #tpu.dot_dimension_numbers<[1], [1], [0], [0], [0, 0, 1, 0], [], []>} : vector<24x16xbf16>, vector<24x16xbf16>, vector<24x24xf32> -> vector<24x24xf32>
    %214 = arith.addf %213, %11 : vector<24x24xf32>
    %cst_81 = arith.constant dense<0xFF800000> : vector<24xf32>
    %215 = vector.multi_reduction <maximumf>, %214, %cst_81 [1] : vector<24x24xf32> to vector<24xf32>
    %216 = vector.shape_cast %215 : vector<24xf32> to vector<24x1xf32>
    %217 = vector.broadcast %216 : vector<24x1xf32> to vector<24x24xf32>
    %218 = arith.subf %214, %217 : vector<24x24xf32>
    %219 = math.exp %218 : vector<24x24xf32>
    %cst_82 = arith.constant dense<0.000000e+00> : vector<24xf32>
    %220 = vector.multi_reduction <add>, %219, %cst_82 [1] : vector<24x24xf32> to vector<24xf32>
    %221 = vector.shape_cast %220 : vector<24xf32> to vector<24x1xf32>
    %222 = tpu.reciprocal %221 {approx = true} : vector<24x1xf32> -> vector<24x1xf32>
    %223 = vector.broadcast %222 : vector<24x1xf32> to vector<24x24xf32>
    %224 = arith.mulf %219, %223 : vector<24x24xf32>
    %225 = arith.truncf %224 : vector<24x24xf32> to vector<24x24xbf16>
    %cst_83 = arith.constant dense<0.000000e+00> : vector<24x16xf32>
    %226 = tpu.matmul %225, %212, %cst_83 {dimension_numbers = #tpu.dot_dimension_numbers<[1], [0], [0], [1], [0, 0, 1, 1], [], []>} : vector<24x24xbf16>, vector<24x16xbf16>, vector<24x16xf32> -> vector<24x16xf32>
    %227 = vector.extract_strided_slice %205 {offsets = [0, 16], sizes = [24, 16], strides = [1, 1]} : vector<24x64xbf16> to vector<24x16xbf16>
    %228 = vector.extract_strided_slice %207 {offsets = [0, 16], sizes = [24, 16], strides = [1, 1]} : vector<24x64xbf16> to vector<24x16xbf16>
    %229 = vector.extract_strided_slice %209 {offsets = [0, 16], sizes = [24, 16], strides = [1, 1]} : vector<24x64xbf16> to vector<24x16xbf16>
    %cst_84 = arith.constant dense<0.000000e+00> : vector<24x24xf32>
    %230 = tpu.matmul %227, %228, %cst_84 {dimension_numbers = #tpu.dot_dimension_numbers<[1], [1], [0], [0], [0, 0, 1, 0], [], []>} : vector<24x16xbf16>, vector<24x16xbf16>, vector<24x24xf32> -> vector<24x24xf32>
    %231 = arith.addf %230, %11 : vector<24x24xf32>
    %cst_85 = arith.constant dense<0xFF800000> : vector<24xf32>
    %232 = vector.multi_reduction <maximumf>, %231, %cst_85 [1] : vector<24x24xf32> to vector<24xf32>
    %233 = vector.shape_cast %232 : vector<24xf32> to vector<24x1xf32>
    %234 = vector.broadcast %233 : vector<24x1xf32> to vector<24x24xf32>
    %235 = arith.subf %231, %234 : vector<24x24xf32>
    %236 = math.exp %235 : vector<24x24xf32>
    %cst_86 = arith.constant dense<0.000000e+00> : vector<24xf32>
    %237 = vector.multi_reduction <add>, %236, %cst_86 [1] : vector<24x24xf32> to vector<24xf32>
    %238 = vector.shape_cast %237 : vector<24xf32> to vector<24x1xf32>
    %239 = tpu.reciprocal %238 {approx = true} : vector<24x1xf32> -> vector<24x1xf32>
    %240 = vector.broadcast %239 : vector<24x1xf32> to vector<24x24xf32>
    %241 = arith.mulf %236, %240 : vector<24x24xf32>
    %242 = arith.truncf %241 : vector<24x24xf32> to vector<24x24xbf16>
    %cst_87 = arith.constant dense<0.000000e+00> : vector<24x16xf32>
    %243 = tpu.matmul %242, %229, %cst_87 {dimension_numbers = #tpu.dot_dimension_numbers<[1], [0], [0], [1], [0, 0, 1, 1], [], []>} : vector<24x24xbf16>, vector<24x16xbf16>, vector<24x16xf32> -> vector<24x16xf32>
    %244 = vector.extract_strided_slice %205 {offsets = [0, 32], sizes = [24, 16], strides = [1, 1]} : vector<24x64xbf16> to vector<24x16xbf16>
    %245 = vector.extract_strided_slice %207 {offsets = [0, 32], sizes = [24, 16], strides = [1, 1]} : vector<24x64xbf16> to vector<24x16xbf16>
    %246 = vector.extract_strided_slice %209 {offsets = [0, 32], sizes = [24, 16], strides = [1, 1]} : vector<24x64xbf16> to vector<24x16xbf16>
    %cst_88 = arith.constant dense<0.000000e+00> : vector<24x24xf32>
    %247 = tpu.matmul %244, %245, %cst_88 {dimension_numbers = #tpu.dot_dimension_numbers<[1], [1], [0], [0], [0, 0, 1, 0], [], []>} : vector<24x16xbf16>, vector<24x16xbf16>, vector<24x24xf32> -> vector<24x24xf32>
    %248 = arith.addf %247, %11 : vector<24x24xf32>
    %cst_89 = arith.constant dense<0xFF800000> : vector<24xf32>
    %249 = vector.multi_reduction <maximumf>, %248, %cst_89 [1] : vector<24x24xf32> to vector<24xf32>
    %250 = vector.shape_cast %249 : vector<24xf32> to vector<24x1xf32>
    %251 = vector.broadcast %250 : vector<24x1xf32> to vector<24x24xf32>
    %252 = arith.subf %248, %251 : vector<24x24xf32>
    %253 = math.exp %252 : vector<24x24xf32>
    %cst_90 = arith.constant dense<0.000000e+00> : vector<24xf32>
    %254 = vector.multi_reduction <add>, %253, %cst_90 [1] : vector<24x24xf32> to vector<24xf32>
    %255 = vector.shape_cast %254 : vector<24xf32> to vector<24x1xf32>
    %256 = tpu.reciprocal %255 {approx = true} : vector<24x1xf32> -> vector<24x1xf32>
    %257 = vector.broadcast %256 : vector<24x1xf32> to vector<24x24xf32>
    %258 = arith.mulf %253, %257 : vector<24x24xf32>
    %259 = arith.truncf %258 : vector<24x24xf32> to vector<24x24xbf16>
    %cst_91 = arith.constant dense<0.000000e+00> : vector<24x16xf32>
    %260 = tpu.matmul %259, %246, %cst_91 {dimension_numbers = #tpu.dot_dimension_numbers<[1], [0], [0], [1], [0, 0, 1, 1], [], []>} : vector<24x24xbf16>, vector<24x16xbf16>, vector<24x16xf32> -> vector<24x16xf32>
    %261 = vector.extract_strided_slice %205 {offsets = [0, 48], sizes = [24, 16], strides = [1, 1]} : vector<24x64xbf16> to vector<24x16xbf16>
    %262 = vector.extract_strided_slice %207 {offsets = [0, 48], sizes = [24, 16], strides = [1, 1]} : vector<24x64xbf16> to vector<24x16xbf16>
    %263 = vector.extract_strided_slice %209 {offsets = [0, 48], sizes = [24, 16], strides = [1, 1]} : vector<24x64xbf16> to vector<24x16xbf16>
    %cst_92 = arith.constant dense<0.000000e+00> : vector<24x24xf32>
    %264 = tpu.matmul %261, %262, %cst_92 {dimension_numbers = #tpu.dot_dimension_numbers<[1], [1], [0], [0], [0, 0, 1, 0], [], []>} : vector<24x16xbf16>, vector<24x16xbf16>, vector<24x24xf32> -> vector<24x24xf32>
    %265 = arith.addf %264, %11 : vector<24x24xf32>
    %cst_93 = arith.constant dense<0xFF800000> : vector<24xf32>
    %266 = vector.multi_reduction <maximumf>, %265, %cst_93 [1] : vector<24x24xf32> to vector<24xf32>
    %267 = vector.shape_cast %266 : vector<24xf32> to vector<24x1xf32>
    %268 = vector.broadcast %267 : vector<24x1xf32> to vector<24x24xf32>
    %269 = arith.subf %265, %268 : vector<24x24xf32>
    %270 = math.exp %269 : vector<24x24xf32>
    %cst_94 = arith.constant dense<0.000000e+00> : vector<24xf32>
    %271 = vector.multi_reduction <add>, %270, %cst_94 [1] : vector<24x24xf32> to vector<24xf32>
    %272 = vector.shape_cast %271 : vector<24xf32> to vector<24x1xf32>
    %273 = tpu.reciprocal %272 {approx = true} : vector<24x1xf32> -> vector<24x1xf32>
    %274 = vector.broadcast %273 : vector<24x1xf32> to vector<24x24xf32>
    %275 = arith.mulf %270, %274 : vector<24x24xf32>
    %276 = arith.truncf %275 : vector<24x24xf32> to vector<24x24xbf16>
    %cst_95 = arith.constant dense<0.000000e+00> : vector<24x16xf32>
    %277 = tpu.matmul %276, %263, %cst_95 {dimension_numbers = #tpu.dot_dimension_numbers<[1], [0], [0], [1], [0, 0, 1, 1], [], []>} : vector<24x24xbf16>, vector<24x16xbf16>, vector<24x16xf32> -> vector<24x16xf32>
    %278 = tpu.concatenate %226, %243, %260, %277 in 1 : vector<24x16xf32>, vector<24x16xf32>, vector<24x16xf32>, vector<24x16xf32> -> vector<24x64xf32>
    %279 = arith.truncf %278 : vector<24x64xf32> to vector<24x64xbf16>
    %c0_96 = arith.constant 0 : index
    %c0_97 = arith.constant 0 : index
    %280 = vector.load %arg20[%c0_96, %c0_97] : memref<64x64xbf16, #tpu.memory_space<vmem>>, vector<64x64xbf16>
    %cst_98 = arith.constant dense<0.000000e+00> : vector<24x64xf32>
    %281 = tpu.matmul %279, %280, %cst_98 {dimension_numbers = #tpu.dot_dimension_numbers<[1], [0], [0], [1], [0, 0, 1, 1], [], []>} : vector<24x64xbf16>, vector<64x64xbf16>, vector<24x64xf32> -> vector<24x64xf32>
    %c0_99 = arith.constant 0 : index
    %c0_100 = arith.constant 0 : index
    %282 = vector.load %arg21[%c0_99, %c0_100] : memref<1x64xf32, #tpu.memory_space<vmem>>, vector<1x64xf32>
    %283 = vector.broadcast %282 : vector<1x64xf32> to vector<24x64xf32>
    %284 = arith.addf %281, %283 : vector<24x64xf32>
    %285 = arith.addf %173, %284 : vector<24x64xf32>
    %c0_101 = arith.constant 0 : index
    %c0_102 = arith.constant 0 : index
    %286 = vector.load %arg22[%c0_101, %c0_102] : memref<1x64xf32, #tpu.memory_space<vmem>>, vector<1x64xf32>
    %c0_103 = arith.constant 0 : index
    %c0_104 = arith.constant 0 : index
    %287 = vector.load %arg23[%c0_103, %c0_104] : memref<1x64xf32, #tpu.memory_space<vmem>>, vector<1x64xf32>
    %cst_105 = arith.constant dense<0.000000e+00> : vector<24xf32>
    %288 = vector.multi_reduction <add>, %285, %cst_105 [1] : vector<24x64xf32> to vector<24xf32>
    %289 = vector.shape_cast %288 : vector<24xf32> to vector<24x1xf32>
    %cst_106 = arith.constant 6.400000e+01 : f32
    %290 = vector.broadcast %cst_106 : f32 to vector<24x1xf32>
    %291 = arith.divf %289, %290 : vector<24x1xf32>
    %292 = vector.broadcast %291 : vector<24x1xf32> to vector<24x64xf32>
    %293 = arith.subf %285, %292 : vector<24x64xf32>
    %294 = arith.mulf %293, %293 : vector<24x64xf32>
    %cst_107 = arith.constant dense<0.000000e+00> : vector<24xf32>
    %295 = vector.multi_reduction <add>, %294, %cst_107 [1] : vector<24x64xf32> to vector<24xf32>
    %296 = vector.shape_cast %295 : vector<24xf32> to vector<24x1xf32>
    %cst_108 = arith.constant 6.400000e+01 : f32
    %297 = vector.broadcast %cst_108 : f32 to vector<24x1xf32>
    %298 = arith.divf %296, %297 : vector<24x1xf32>
    %299 = vector.broadcast %291 : vector<24x1xf32> to vector<24x64xf32>
    %300 = arith.subf %285, %299 : vector<24x64xf32>
    %cst_109 = arith.constant 9.99999974E-6 : f32
    %301 = vector.broadcast %cst_109 : f32 to vector<24x1xf32>
    %302 = arith.addf %298, %301 : vector<24x1xf32>
    %303 = math.rsqrt %302 : vector<24x1xf32>
    %304 = vector.broadcast %303 : vector<24x1xf32> to vector<24x64xf32>
    %305 = arith.mulf %300, %304 : vector<24x64xf32>
    %306 = vector.broadcast %286 : vector<1x64xf32> to vector<24x64xf32>
    %307 = arith.mulf %305, %306 : vector<24x64xf32>
    %308 = vector.broadcast %287 : vector<1x64xf32> to vector<24x64xf32>
    %309 = arith.addf %307, %308 : vector<24x64xf32>
    %310 = arith.truncf %309 : vector<24x64xf32> to vector<24x64xbf16>
    %c0_110 = arith.constant 0 : index
    %c0_111 = arith.constant 0 : index
    %311 = vector.load %arg24[%c0_110, %c0_111] : memref<64x128xbf16, #tpu.memory_space<vmem>>, vector<64x128xbf16>
    %cst_112 = arith.constant dense<0.000000e+00> : vector<24x128xf32>
    %312 = tpu.matmul %310, %311, %cst_112 {dimension_numbers = #tpu.dot_dimension_numbers<[1], [0], [0], [1], [0, 0, 1, 1], [], []>} : vector<24x64xbf16>, vector<64x128xbf16>, vector<24x128xf32> -> vector<24x128xf32>
    %c0_113 = arith.constant 0 : index
    %c0_114 = arith.constant 0 : index
    %313 = vector.load %arg25[%c0_113, %c0_114] : memref<1x128xf32, #tpu.memory_space<vmem>>, vector<1x128xf32>
    %314 = vector.broadcast %313 : vector<1x128xf32> to vector<24x128xf32>
    %315 = arith.addf %312, %314 : vector<24x128xf32>
    %316 = arith.mulf %315, %315 : vector<24x128xf32>
    %317 = arith.mulf %315, %316 : vector<24x128xf32>
    %cst_115 = arith.constant 4.471500e-02 : f32
    %318 = vector.broadcast %cst_115 : f32 to vector<24x128xf32>
    %319 = arith.mulf %318, %317 : vector<24x128xf32>
    %320 = arith.addf %315, %319 : vector<24x128xf32>
    %cst_116 = arith.constant 0.797884583 : f32
    %321 = vector.broadcast %cst_116 : f32 to vector<24x128xf32>
    %322 = arith.mulf %321, %320 : vector<24x128xf32>
    %323 = math.tanh %322 : vector<24x128xf32>
    %cst_117 = arith.constant 1.000000e+00 : f32
    %324 = vector.broadcast %cst_117 : f32 to vector<24x128xf32>
    %325 = arith.addf %324, %323 : vector<24x128xf32>
    %cst_118 = arith.constant 5.000000e-01 : f32
    %326 = vector.broadcast %cst_118 : f32 to vector<24x128xf32>
    %327 = arith.mulf %326, %325 : vector<24x128xf32>
    %328 = arith.mulf %315, %327 : vector<24x128xf32>
    %329 = arith.truncf %328 : vector<24x128xf32> to vector<24x128xbf16>
    %c0_119 = arith.constant 0 : index
    %c0_120 = arith.constant 0 : index
    %330 = vector.load %arg26[%c0_119, %c0_120] : memref<128x64xbf16, #tpu.memory_space<vmem>>, vector<128x64xbf16>
    %cst_121 = arith.constant dense<0.000000e+00> : vector<24x64xf32>
    %331 = tpu.matmul %329, %330, %cst_121 {dimension_numbers = #tpu.dot_dimension_numbers<[1], [0], [0], [1], [0, 0, 1, 1], [], []>} : vector<24x128xbf16>, vector<128x64xbf16>, vector<24x64xf32> -> vector<24x64xf32>
    %c0_122 = arith.constant 0 : index
    %c0_123 = arith.constant 0 : index
    %332 = vector.load %arg27[%c0_122, %c0_123] : memref<1x64xf32, #tpu.memory_space<vmem>>, vector<1x64xf32>
    %333 = vector.broadcast %332 : vector<1x64xf32> to vector<24x64xf32>
    %334 = arith.addf %331, %333 : vector<24x64xf32>
    %335 = arith.addf %285, %334 : vector<24x64xf32>
    %336 = vector.extract_strided_slice %335 {offsets = [16, 0], sizes = [1, 64], strides = [1, 1]} : vector<24x64xf32> to vector<1x64xf32>
    %c0_124 = arith.constant 0 : index
    %c0_125 = arith.constant 0 : index
    %337 = vector.load %arg28[%c0_124, %c0_125] : memref<1x64xf32, #tpu.memory_space<vmem>>, vector<1x64xf32>
    %c0_126 = arith.constant 0 : index
    %c0_127 = arith.constant 0 : index
    %338 = vector.load %arg29[%c0_126, %c0_127] : memref<1x64xf32, #tpu.memory_space<vmem>>, vector<1x64xf32>
    %cst_128 = arith.constant dense<0.000000e+00> : vector<1xf32>
    %339 = vector.multi_reduction <add>, %336, %cst_128 [1] : vector<1x64xf32> to vector<1xf32>
    %340 = vector.shape_cast %339 : vector<1xf32> to vector<1x1xf32>
    %cst_129 = arith.constant 6.400000e+01 : f32
    %341 = vector.broadcast %cst_129 : f32 to vector<1x1xf32>
    %342 = arith.divf %340, %341 : vector<1x1xf32>
    %343 = vector.broadcast %342 : vector<1x1xf32> to vector<1x64xf32>
    %344 = arith.subf %336, %343 : vector<1x64xf32>
    %345 = arith.mulf %344, %344 : vector<1x64xf32>
    %cst_130 = arith.constant dense<0.000000e+00> : vector<1xf32>
    %346 = vector.multi_reduction <add>, %345, %cst_130 [1] : vector<1x64xf32> to vector<1xf32>
    %347 = vector.shape_cast %346 : vector<1xf32> to vector<1x1xf32>
    %cst_131 = arith.constant 6.400000e+01 : f32
    %348 = vector.broadcast %cst_131 : f32 to vector<1x1xf32>
    %349 = arith.divf %347, %348 : vector<1x1xf32>
    %350 = vector.broadcast %342 : vector<1x1xf32> to vector<1x64xf32>
    %351 = arith.subf %336, %350 : vector<1x64xf32>
    %cst_132 = arith.constant 9.99999974E-6 : f32
    %352 = vector.broadcast %cst_132 : f32 to vector<1x1xf32>
    %353 = arith.addf %349, %352 : vector<1x1xf32>
    %354 = math.rsqrt %353 : vector<1x1xf32>
    %355 = vector.broadcast %354 : vector<1x1xf32> to vector<1x64xf32>
    %356 = arith.mulf %351, %355 : vector<1x64xf32>
    %357 = arith.mulf %356, %337 : vector<1x64xf32>
    %358 = arith.addf %357, %338 : vector<1x64xf32>
    %359 = arith.truncf %358 : vector<1x64xf32> to vector<1x64xbf16>
    %c0_133 = arith.constant 0 : index
    %c0_134 = arith.constant 0 : index
    %360 = vector.load %arg30[%c0_133, %c0_134] : memref<64x1xbf16, #tpu.memory_space<vmem>>, vector<64x1xbf16>
    %cst_135 = arith.constant dense<0.000000e+00> : vector<1x1xf32>
    %361 = tpu.matmul %359, %360, %cst_135 {dimension_numbers = #tpu.dot_dimension_numbers<[1], [0], [0], [1], [0, 0, 1, 1], [], []>} : vector<1x64xbf16>, vector<64x1xbf16>, vector<1x1xf32> -> vector<1x1xf32>
    %c0_136 = arith.constant 0 : index
    %c0_137 = arith.constant 0 : index
    %362 = vector.load %arg31[%c0_136, %c0_137] : memref<1x1xf32, #tpu.memory_space<vmem>>, vector<1x1xf32>
    %363 = arith.addf %361, %362 : vector<1x1xf32>
    %c0_138 = arith.constant 0 : index
    %c0_139 = arith.constant 0 : index
    %c0_140 = arith.constant 0 : index
    %364 = vector.load %arg32[%c0_138, %c0_139, %c0_140] : memref<1x1x1xf32, #tpu.memory_space<vmem>>, vector<1x1x1xf32>
    %365 = vector.shape_cast %364 : vector<1x1x1xf32> to vector<1x1xf32>
    %366 = vector.shape_cast %363 : vector<1x1xf32> to vector<1x1x1xf32>
    tpu.vector_store %arg32[%c0_138, %c0_139, %c0_140], %366 {strides = array<i32>} : memref<1x1x1xf32, #tpu.memory_space<vmem>>, vector<1x1x1xf32>,
    return
  }
  func.func @transform_0(%arg0: i32) -> (i32, i32, i32) {
    %c0_i32 = arith.constant 0 : i32
    %c0_i32_0 = arith.constant 0 : i32
    %c0_i32_1 = arith.constant 0 : i32
    return %arg0, %c0_i32, %c0_i32_0 : i32, i32, i32
  }
  func.func @transform_1(%arg0: i32) -> (i32, i32) {
    %c0_i32 = arith.constant 0 : i32
    %c0_i32_0 = arith.constant 0 : i32
    %c0_i32_1 = arith.constant 0 : i32
    return %c0_i32, %c0_i32_0 : i32, i32
  }
  func.func @transform_2(%arg0: i32) -> (i32, i32) {
    %c0_i32 = arith.constant 0 : i32
    %c0_i32_0 = arith.constant 0 : i32
    %c0_i32_1 = arith.constant 0 : i32
    return %c0_i32, %c0_i32_0 : i32, i32
  }
  func.func @transform_3(%arg0: i32) -> (i32, i32) {
    %c0_i32 = arith.constant 0 : i32
    %c0_i32_0 = arith.constant 0 : i32
    %c0_i32_1 = arith.constant 0 : i32
    return %c0_i32, %c0_i32_0 : i32, i32
  }
  func.func @transform_4(%arg0: i32) -> (i32, i32) {
    %c0_i32 = arith.constant 0 : i32
    %c0_i32_0 = arith.constant 0 : i32
    %c0_i32_1 = arith.constant 0 : i32
    return %c0_i32, %c0_i32_0 : i32, i32
  }
  func.func @transform_5(%arg0: i32) -> (i32, i32) {
    %c0_i32 = arith.constant 0 : i32
    %c0_i32_0 = arith.constant 0 : i32
    %c0_i32_1 = arith.constant 0 : i32
    return %c0_i32, %c0_i32_0 : i32, i32
  }
  func.func @transform_6(%arg0: i32) -> (i32, i32) {
    %c0_i32 = arith.constant 0 : i32
    %c0_i32_0 = arith.constant 0 : i32
    %c0_i32_1 = arith.constant 0 : i32
    return %c0_i32, %c0_i32_0 : i32, i32
  }
  func.func @transform_7(%arg0: i32) -> (i32, i32) {
    %c0_i32 = arith.constant 0 : i32
    %c0_i32_0 = arith.constant 0 : i32
    %c0_i32_1 = arith.constant 0 : i32
    return %c0_i32, %c0_i32_0 : i32, i32
  }
  func.func @transform_8(%arg0: i32) -> (i32, i32) {
    %c0_i32 = arith.constant 0 : i32
    %c0_i32_0 = arith.constant 0 : i32
    %c0_i32_1 = arith.constant 0 : i32
    return %c0_i32, %c0_i32_0 : i32, i32
  }
  func.func @transform_9(%arg0: i32) -> (i32, i32) {
    %c0_i32 = arith.constant 0 : i32
    %c0_i32_0 = arith.constant 0 : i32
    %c0_i32_1 = arith.constant 0 : i32
    return %c0_i32, %c0_i32_0 : i32, i32
  }
  func.func @transform_10(%arg0: i32) -> (i32, i32) {
    %c0_i32 = arith.constant 0 : i32
    %c0_i32_0 = arith.constant 0 : i32
    %c0_i32_1 = arith.constant 0 : i32
    return %c0_i32, %c0_i32_0 : i32, i32
  }
  func.func @transform_11(%arg0: i32) -> (i32, i32) {
    %c0_i32 = arith.constant 0 : i32
    %c0_i32_0 = arith.constant 0 : i32
    %c0_i32_1 = arith.constant 0 : i32
    return %c0_i32, %c0_i32_0 : i32, i32
  }
  func.func @transform_12(%arg0: i32) -> (i32, i32) {
    %c0_i32 = arith.constant 0 : i32
    %c0_i32_0 = arith.constant 0 : i32
    %c0_i32_1 = arith.constant 0 : i32
    return %c0_i32, %c0_i32_0 : i32, i32
  }
  func.func @transform_13(%arg0: i32) -> (i32, i32) {
    %c0_i32 = arith.constant 0 : i32
    %c0_i32_0 = arith.constant 0 : i32
    %c0_i32_1 = arith.constant 0 : i32
    return %c0_i32, %c0_i32_0 : i32, i32
  }
  func.func @transform_14(%arg0: i32) -> (i32, i32) {
    %c0_i32 = arith.constant 0 : i32
    %c0_i32_0 = arith.constant 0 : i32
    %c0_i32_1 = arith.constant 0 : i32
    return %c0_i32, %c0_i32_0 : i32, i32
  }
  func.func @transform_15(%arg0: i32) -> (i32, i32) {
    %c0_i32 = arith.constant 0 : i32
    %c0_i32_0 = arith.constant 0 : i32
    %c0_i32_1 = arith.constant 0 : i32
    return %c0_i32, %c0_i32_0 : i32, i32
  }
  func.func @transform_16(%arg0: i32) -> (i32, i32) {
    %c0_i32 = arith.constant 0 : i32
    %c0_i32_0 = arith.constant 0 : i32
    %c0_i32_1 = arith.constant 0 : i32
    return %c0_i32, %c0_i32_0 : i32, i32
  }
  func.func @transform_17(%arg0: i32) -> (i32, i32) {
    %c0_i32 = arith.constant 0 : i32
    %c0_i32_0 = arith.constant 0 : i32
    %c0_i32_1 = arith.constant 0 : i32
    return %c0_i32, %c0_i32_0 : i32, i32
  }
  func.func @transform_18(%arg0: i32) -> (i32, i32) {
    %c0_i32 = arith.constant 0 : i32
    %c0_i32_0 = arith.constant 0 : i32
    %c0_i32_1 = arith.constant 0 : i32
    return %c0_i32, %c0_i32_0 : i32, i32
  }
  func.func @transform_19(%arg0: i32) -> (i32, i32) {
    %c0_i32 = arith.constant 0 : i32
    %c0_i32_0 = arith.constant 0 : i32
    %c0_i32_1 = arith.constant 0 : i32
    return %c0_i32, %c0_i32_0 : i32, i32
  }
  func.func @transform_20(%arg0: i32) -> (i32, i32) {
    %c0_i32 = arith.constant 0 : i32
    %c0_i32_0 = arith.constant 0 : i32
    %c0_i32_1 = arith.constant 0 : i32
    return %c0_i32, %c0_i32_0 : i32, i32
  }
  func.func @transform_21(%arg0: i32) -> (i32, i32) {
    %c0_i32 = arith.constant 0 : i32
    %c0_i32_0 = arith.constant 0 : i32
    %c0_i32_1 = arith.constant 0 : i32
    return %c0_i32, %c0_i32_0 : i32, i32
  }
  func.func @transform_22(%arg0: i32) -> (i32, i32) {
    %c0_i32 = arith.constant 0 : i32
    %c0_i32_0 = arith.constant 0 : i32
    %c0_i32_1 = arith.constant 0 : i32
    return %c0_i32, %c0_i32_0 : i32, i32
  }
  func.func @transform_23(%arg0: i32) -> (i32, i32) {
    %c0_i32 = arith.constant 0 : i32
    %c0_i32_0 = arith.constant 0 : i32
    %c0_i32_1 = arith.constant 0 : i32
    return %c0_i32, %c0_i32_0 : i32, i32
  }
  func.func @transform_24(%arg0: i32) -> (i32, i32) {
    %c0_i32 = arith.constant 0 : i32
    %c0_i32_0 = arith.constant 0 : i32
    %c0_i32_1 = arith.constant 0 : i32
    return %c0_i32, %c0_i32_0 : i32, i32
  }
  func.func @transform_25(%arg0: i32) -> (i32, i32) {
    %c0_i32 = arith.constant 0 : i32
    %c0_i32_0 = arith.constant 0 : i32
    %c0_i32_1 = arith.constant 0 : i32
    return %c0_i32, %c0_i32_0 : i32, i32
  }
  func.func @transform_26(%arg0: i32) -> (i32, i32) {
    %c0_i32 = arith.constant 0 : i32
    %c0_i32_0 = arith.constant 0 : i32
    %c0_i32_1 = arith.constant 0 : i32
    return %c0_i32, %c0_i32_0 : i32, i32
  }
  func.func @transform_27(%arg0: i32) -> (i32, i32) {
    %c0_i32 = arith.constant 0 : i32
    %c0_i32_0 = arith.constant 0 : i32
    %c0_i32_1 = arith.constant 0 : i32
    return %c0_i32, %c0_i32_0 : i32, i32
  }
  func.func @transform_28(%arg0: i32) -> (i32, i32) {
    %c0_i32 = arith.constant 0 : i32
    %c0_i32_0 = arith.constant 0 : i32
    %c0_i32_1 = arith.constant 0 : i32
    return %c0_i32, %c0_i32_0 : i32, i32
  }
  func.func @transform_29(%arg0: i32) -> (i32, i32) {
    %c0_i32 = arith.constant 0 : i32
    %c0_i32_0 = arith.constant 0 : i32
    %c0_i32_1 = arith.constant 0 : i32
    return %c0_i32, %c0_i32_0 : i32, i32
  }
  func.func @transform_30(%arg0: i32) -> (i32, i32) {
    %c0_i32 = arith.constant 0 : i32
    %c0_i32_0 = arith.constant 0 : i32
    %c0_i32_1 = arith.constant 0 : i32
    return %c0_i32, %c0_i32_0 : i32, i32
  }
  func.func @transform_31(%arg0: i32) -> (i32, i32, i32) {
    %c0_i32 = arith.constant 0 : i32
    %c0_i32_0 = arith.constant 0 : i32
    %c0_i32_1 = arith.constant 0 : i32
    return %arg0, %c0_i32, %c0_i32_0 : i32, i32, i32
  }
}

</mosaic_0001>

<bundles_post_ra>
// kernel: d2_net_forward.1
= control target key start
LH: loop header
LB: loop body
LE: loop exit
PB: predicated region body
PF: predicated region fallthrough
CT: control target
= control target key end

     0   :  { %s3704_s6 = smov 1   ;;  %s3705_s10 = smov 2   ;;  %s4562_s0 = inlined_call_operand.smem [shape: u32[32], index: -1, kind: input, shape index: {}] }
   0x1   :  { %s3752_s5 = sld [smem:[%s4562_s0]]   ;;  %s3706_s14 = smov 3  }
   0x2   :  { %s3757_s9 = sld [smem:[%s4562_s0 + %s3704_s6]]   ;;  %s3707_s18 = smov 4  }
   0x3   :  { %s3762_s13 = sld [smem:[%s4562_s0 + %s3705_s10]]   ;;  %s3708_s22 = smov 5  }
   0x4   :  { %s3767_s17 = sld [smem:[%s4562_s0 + %s3706_s14]]   ;;  %s3709_s26 = smov 6  }
   0x5   :  { %s3772_s21 = sld [smem:[%s4562_s0 + %s3707_s18]]   ;;  %s3710_s30 = smov 7  }
   0x6   :  { %s3777_s25 = sld [smem:[%s4562_s0 + %s3708_s22]]   ;;  %s3711_s4 = smov 8  }
   0x7   :  { %s3782_s29 = sld [smem:[%s4562_s0 + %s3709_s26]]   ;;  %s3712_s10 = smov 9  }
   0x8   :  { %s3787_s3 = sld [smem:[%s4562_s0 + %s3710_s30]]   ;;  %s3713_s15 = smov 10  }
   0x9   :  { %s3792_s8 = sld [smem:[%s4562_s0 + %s3711_s4]]   ;;  %s3714_s20 = smov 11  }
   0xa   :  { %s3797_s14 = sld [smem:[%s4562_s0 + %s3712_s10]]   ;;  %s3715_s26 = smov 12  }
   0xb   :  { %s3802_s19 = sld [smem:[%s4562_s0 + %s3713_s15]]   ;;  %s3716_s1 = smov 13  }
   0xc   :  { %s3807_s24 = sld [smem:[%s4562_s0 + %s3714_s20]]   ;;  %s3717_s7 = smov 14  }
   0xd   :  { %s3812_s30 = sld [smem:[%s4562_s0 + %s3715_s26]]   ;;  %s3718_s15 = smov 15  }
   0xe   :  { %s3817_s6 = sld [smem:[%s4562_s0 + %s3716_s1]]   ;;  %s3719_s22 = smov 16  }
   0xf   :  { %s3822_s12 = sld [smem:[%s4562_s0 + %s3717_s7]]   ;;  %s3720_s28 = smov 17  }
  0x10   :  { %s3827_s20 = sld [smem:[%s4562_s0 + %s3718_s15]]   ;;  %s3721_s7 = smov 18  }
  0x11   :  { %s3832_s27 = sld [smem:[%s4562_s0 + %s3719_s22]]   ;;  %s3722_s15 = smov 19  }
  0x12   :  { %s3837_s4 = sld [smem:[%s4562_s0 + %s3720_s28]]   ;;  %s3723_s22 = smov 20  }
  0x13   :  { %s3724_s28 = smov 21   ;;  %s3734_s16 = smov 31  }
  0x15   :  { %4567 = sst [smem:[#allocation3_spill]] %s3822_s12 }
  0x16   :  { %4568 = sst [smem:[#allocation4_spill]] %s3827_s20 }
  0x17   :  { %4569 = sst [smem:[#allocation5_spill]] %s3832_s27 }
  0x18   :  { %4570 = sst [smem:[#allocation6_spill]] %s3837_s4 }
  0x19   :  { %s3842_s12 = sld [smem:[%s4562_s0 + %s3721_s7]]   ;;  %s3725_s7 = smov 22  }
  0x1a   :  { %s3847_s20 = sld [smem:[%s4562_s0 + %s3722_s15]]   ;;  %s3726_s15 = smov 23  }
  0x1b   :  { %s3852_s27 = sld [smem:[%s4562_s0 + %s3723_s22]]   ;;  %s3727_s22 = smov 24  }
  0x1c   :  { %s3857_s4 = sld [smem:[%s4562_s0 + %s3724_s28]]   ;;  %s3728_s28 = smov 25  }
  0x1f   :  { %4571 = sst [smem:[#allocation7_spill]] %s3842_s12 }
  0x20   :  { %4572 = sst [smem:[#allocation8_spill]] %s3847_s20 }
  0x21   :  { %4573 = sst [smem:[#allocation9_spill]] %s3852_s27 }
  0x22   :  { %4574 = sst [smem:[#allocation10_spill]] %s3857_s4 }
  0x23   :  { %s3862_s12 = sld [smem:[%s4562_s0 + %s3725_s7]]   ;;  %s3729_s7 = smov 26  }
  0x24   :  { %s3867_s20 = sld [smem:[%s4562_s0 + %s3726_s15]]   ;;  %s3730_s15 = smov 27  }
  0x25   :  { %s3872_s27 = sld [smem:[%s4562_s0 + %s3727_s22]]   ;;  %s3731_s22 = smov 28  }
  0x26   :  { %s3877_s4 = sld [smem:[%s4562_s0 + %s3728_s28]]   ;;  %s3732_s28 = smov 29  }
  0x29   :  { %4575 = sst [smem:[#allocation11_spill]] %s3862_s12 }
  0x2a   :  { %4576 = sst [smem:[#allocation12_spill]] %s3867_s20 }
  0x2b   :  { %4577 = sst [smem:[#allocation13_spill]] %s3872_s27 }
  0x2c   :  { %4578 = sst [smem:[#allocation14_spill]] %s3877_s4 }
  0x2d   :  { %s3882_s12 = sld [smem:[%s4562_s0 + %s3729_s7]]   ;;  %s3733_s7 = smov 30  }
  0x2e   :  { %s3887_s20 = sld [smem:[%s4562_s0 + %s3730_s15]]  }
  0x2f   :  { %s3892_s27 = sld [smem:[%s4562_s0 + %s3731_s22]]   ;;  %s3907_s22 = smov 0  }
  0x30   :  { %s3897_s4 = sld [smem:[%s4562_s0 + %s3732_s28]]  }
  0x33   :  { %4579 = sst [smem:[#allocation15_spill]] %s3882_s12 }
  0x34   :  { %4580 = sst [smem:[#allocation16_spill]] %s3887_s20 }
  0x35   :  { %s3136_s12 = sld [smem:[%s4562_s0 + %s3733_s7]]  }
  0x36   :  { %s3905_s20 = sld [smem:[%s4562_s0 + %s3734_s16]]  }
  0x3b   :  { %v68_v0 = vstv %s3136_s12 }
  0x3c   :  { %69 = vst [vmem:[#allocation2] sm:$0x1] %v68_v0 }
  0x3d LB: > { %s3138_s23 = sadd.s32 4294967295, %s3702_s22   ;;  %p3142_p0 = scmp.ge.s32.totalorder %s3702_s22, 1  ;;  %s3702_s22 = sphi %s3907_s22, %s75_s22  }
  0x3e   : > { %p871_p1 = scmp.lt.s32.totalorder %s3702_s22, 3 }
  0x40   : > { %p872_p2 = pnand %p3142_p0, %p871_p1 }
  0x41   : > { %p949_p3 = scmp.lt.s32.totalorder (!%p872_p2), %s3138_s23, 1  ;;  %s3736_s26 = smov (!%p872_p2), 64  }
  0x42   : > { %875 = sbr.rel (%p872_p2) target bundleno = 4707 (0x1263), region = 144  ;;  %s3737_s28 = smov (!%p872_p2), 112  }
  0x43   : > { %s3738_s1 = smov (!%p872_p2), 48   ;;  %s3739_s2 = smov (!%p872_p2), 16  }
  0x44   : > { %s3740_s7 = smov (!%p872_p2), 32   ;;  %s3741_s10 = smov (!%p872_p2), 96  }
  0x45   : > { %s3742_s11 = smov (!%p872_p2), 80   ;;  %s4581_s16 = sld [smem:[#allocation3_spill]] (!%p872_p2) }
  0x46   : > { %s4582_s15 = sld [smem:[#allocation6_spill]] (!%p872_p2) }
  0x47   : > { %v3414_v1 = vld [vmem:[%s3762_s13] sm:$0xff]  ;;  %s4596_s23 = smov (!%p949_p3, %s3138_s23), 1  ;;  %vm980_vm0 = vcmask 130048   ;;  %vm1011_vm1 = vcmask 523264   ;;  %v964_v10 = vld [vmem:[%s3757_s9 + $0x8] sm:$0xff]  ;;  %v965_v14 = vld [vmem:[%s3757_s9 + $0x10] sm:$0xff] }
  0x48   : > { %994 = vmatpush.bf16.msra.mxu0 %v3414_v1  ;;  %s3467_s0 = smul.u32 12, %s4596_s23  ;;  %v963_v6 = vld [vmem:[%s3757_s9] sm:$0xff]  ;;  %v3735_v19 = vmov 64.0   ;;  %v3180_v41 = vld [vmem:[%s3777_s25 + $0x30] sm:$0xf]  ;;  %vm1294_vm12 = vcmask 1043456  }
  0x49   : > { %3560 = vrcp.f32 %v3735_v19  ;;  %v3422_v42 = vld [vmem:[%s3777_s25 + $0x34] sm:$0xf0]  ;;  %v3421_v43 = vld [vmem:[%s3777_s25 + $0x34] sm:$0xf]  ;;  %v3182_v45 = vld [vmem:[%s3777_s25 + $0x38] sm:$0xf0] }
  0x4a   : > { %s953_s12 = scalar_lea.vmem %s3752_s5, %s3467_s0  ;;  %v3181_v44 = vor.u32 %v3422_v42, %v3180_v41  ;;  %v3185_v46 = vor.u32 %v3421_v43, %v3182_v45  ;;  %v3172_v47 = vld [vmem:[%s3777_s25 + $0x20] sm:$0xf]  ;;  %v3420_v48 = vld [vmem:[%s3777_s25 + $0x24] sm:$0xf0]  ;;  %v3419_v49 = vld [vmem:[%s3777_s25 + $0x24] sm:$0xf] }
  0x4b   : > { %v3413_v2 = vld [vmem:[%s953_s12] sm:$0xff]  ;;  %v960_v3 = vld [vmem:[%s953_s12 + $0x8] sm:$0xf]  ;;  %v3173_v50 = vor.u32 %v3420_v48, %v3172_v47  ;;  %v3174_v51 = vld [vmem:[%s3777_s25 + $0x28] sm:$0xf0]  ;;  %vm1243_vm14 = vcmask 195584  }
  0x4c   : > { %3152 = vmatmul.msk.bf16.vlgmr.msra.gmra.mxu0 %vm980_vm0, %v3413_v2  ;;  %v971_v4 = vunpack.c.l.b16 %v960_v3  ;;  %1163 = vmatpush.bf16.msra.mxu1 %v3181_v44  ;;  %v3177_v52 = vor.u32 %v3419_v49, %v3174_v51  ;;  %v3164_v53 = vld [vmem:[%s3777_s25 + $0x10] sm:$0xf]  ;;  %v3418_v54 = vld [vmem:[%s3777_s25 + $0x14] sm:$0xf0]  ;;  %v3417_v55 = vld [vmem:[%s3777_s25 + $0x14] sm:$0xf] }
  0x4d   : > { %1181 = vmatpush.bf16.msra.mxu2 %v3185_v46  ;;  %v3165_v56 = vor.u32 %v3418_v54, %v3164_v53  ;;  %v3166_v57 = vld [vmem:[%s3777_s25 + $0x18] sm:$0xf0]  ;;  %v3156_v61 = vld [vmem:[%s3777_s25] sm:$0xf]  ;;  %v3416_v62 = vld [vmem:[%s3777_s25 + $0x4] sm:$0xf0] }
  0x4e   : > { %v973_v5 = vpack.c.b16 %v971_v4, %v971_v4  ;;  %v3169_v58 = vor.u32 %v3417_v55, %v3166_v57  ;;  %v3415_v63 = vld [vmem:[%s3777_s25 + $0x4] sm:$0xf]  ;;  %v3157_v0 = vor.u32 %v3416_v62, %v3156_v61  ;;  %v3158_v1 = vld [vmem:[%s3777_s25 + $0x8] sm:$0xf0]  ;;  %v1107_v49 = vld [vmem:[%s3782_s29] sm:$0x3] }
  0x4f   : > { %v3561_v20 = vpop.eup %3560  ;;  %v3161_v3 = vor.u32 %v3415_v63, %v3158_v1  ;;  %v1109_v51 = vperm.slane %v1107_v49, 0  ;;  %vm1670_vm15 = vcmask 261120   ;;  %s4583_s18 = sld [smem:[#allocation4_spill]] }
  0x50   : > { %v1022_v21 = vmul.f32 64.0, %v3561_v20  ;;  %vm1026_vm2 = vweird.f32 %v3561_v20  ;;  %1164 = vmatpush.bf16.msra.mxu1 %v3173_v50  ;;  %s4584_s0 = sld [smem:[#allocation5_spill]] }
  0x51   : > { %1182 = vmatpush.bf16.msra.mxu2 %v3177_v52  ;;  %s4585_s12 = sld [smem:[#allocation7_spill]] }
  0x52   : > { %v1023_v22 = vsub.f32 1.0, %v1022_v21 }
  0x54   : > { %v1024_v23 = vmul.f32 %v3561_v20, %v1023_v22  ;;  %1165 = vmatpush.bf16.msra.mxu1 %v3165_v56 }
  0x55   : > { %1183 = vmatpush.bf16.msra.mxu2 %v3169_v58 }
  0x56   : > { %v1025_v24 = vadd.f32 %v3561_v20, %v1024_v23 }
  0x58   : > { %v3937_v25 = vsel %vm1026_vm2, %v3561_v20, %v1025_v24  ;;  %1166 = vmatpush.bf16.msra.mxu1 %v3157_v0  ;;  %v1110_v0 = vperm.slane %v1107_v49, 1  ;;  %vm1674_vm2 = vcmask 392192  }
  0x59   : > { %1184 = vmatpush.bf16.msra.mxu2 %v3161_v3 }
  0x5c   : > { %3153 = vmatmul.msk.bf16.gmra.mxu0 %vm980_vm0, %v973_v5 }
  0xc9   : > { %v996_v7 = vpop.f32.mrf.mxu0 }
  0xca   : > { %v3923_v8 = vadd.f32 %v996_v7, %v963_v6 }
  0xcc   : > { %v1012_v9 = vsel %vm1011_vm1, %v3923_v8, 0.0 }
  0xcd   : > { %1013 = vadd.xlane.f32.xlu0 %v1012_v9 }
  0xd1   : > { %v998_v11 = vpop.f32.mrf.mxu0 }
  0xd2   : > { %v3928_v12 = vadd.f32 %v998_v11, %v964_v10 }
  0xd4   : > { %v1015_v13 = vsel %vm1011_vm1, %v3928_v12, 0.0 }
  0xd5   : > { %1016 = vadd.xlane.f32.xlu0 %v1015_v13 }
  0xd9   : > { %v1001_v15 = vpop.f32.mrf.mxu0 }
  0xda   : > { %v3933_v16 = vadd.f32 %v1001_v15, %v965_v14 }
  0xdc   : > { %v1018_v17 = vsel %vm1011_vm1, %v3933_v16, 0.0 }
  0xdd   : > { %1019 = vadd.xlane.f32.xlu1 %v1018_v17 }
  0xe1   : > { %v1003_v18 = vpop.f32.mrf.mxu0 }
 0x140   : > { %v1014_v26 = vpop.xlane.xlu0 %1013 }
 0x141   : > { %v1028_v27 = vmul.f32 %v3937_v25, %v1014_v26 }
 0x143   : > { %v3941_v28 = vsub.f32 %v3923_v8, %v1028_v27 }
 0x145   : > { %v1034_v29 = vmul.f32 %v3941_v28, %v3941_v28 }
 0x147   : > { %v1037_v30 = vsel %vm1011_vm1, %v1034_v29, 0.0  ;;  %v3546_v29 = vld [vmem:[%s3767_s17] ss:$0 sm:$0xff] }
 0x148   : > { %1038 = vadd.xlane.f32.xlu1 %v1037_v30  ;;  %v1017_v31 = vpop.xlane.xlu0 %1016 }
 0x149   : > { %v1029_v32 = vmul.f32 %v3937_v25, %v1017_v31 }
 0x14b   : > { %v3948_v33 = vsub.f32 %v3928_v12, %v1029_v32 }
 0x14d   : > { %v1035_v34 = vmul.f32 %v3948_v33, %v3948_v33 }
 0x14f   : > { %v1040_v35 = vsel %vm1011_vm1, %v1035_v34, 0.0 }
 0x150   : > { %v1020_v36 = vpop.xlane.xlu1 %1019  ;;  %1041 = vadd.xlane.f32.xlu2 %v1040_v35 }
 0x151   : > { %v1030_v37 = vmul.f32 %v3937_v25, %v1020_v36 }
 0x153   : > { %v3955_v38 = vsub.f32 %v3933_v16, %v1030_v37  ;;  %v3547_v37 = vld [vmem:[%s3772_s21] ss:$0 sm:$0xff] }
 0x155   : > { %v1036_v39 = vmul.f32 %v3955_v38, %v3955_v38 }
 0x157   : > { %v1043_v40 = vsel %vm1011_vm1, %v1036_v39, 0.0 }
 0x158   : > { %1044 = vadd.xlane.f32.xlu2 %v1043_v40 }
 0x1bb   : > { %v1039_v59 = vpop.xlane.xlu1 %1038 }
 0x1bc   : > { %v1046_v60 = vmul.f32 %v1039_v59, %v3937_v25 }
 0x1be   : > { %v1049_v2 = vadd.f32 1e-05, %v1046_v60 }
 0x1c0   : > { %3562 = vrsqrt.f32 %v1049_v2  ;;  %vm1058_vm4 = vweird.f32 %v1049_v2 }
 0x1c3   : > { %v1042_v4 = vpop.xlane.xlu2 %1041 }
 0x1c4   : > { %v1047_v5 = vmul.f32 %v1042_v4, %v3937_v25 }
 0x1c6   : > { %v3563_v6 = vpop.eup %3562  ;;  %v1050_v7 = vadd.f32 1e-05, %v1047_v5 }
 0x1c7   : > { %v1053_v9 = vmul.f32 %v3563_v6, %v1049_v2  ;;  %vm1059_vm3 = vweird.f32 %v3563_v6 }
 0x1c8   : > { %3564 = vrsqrt.f32 %v1050_v7  ;;  %vm1060_vm5 = vmor %vm1058_vm4, %vm1059_vm3  ;;  %vm1068_vm7 = vweird.f32 %v1050_v7 }
 0x1c9   : > { %v1054_v10 = vmul.f32 %v3563_v6, %v1053_v9 }
 0x1cb   : > { %v1055_v11 = vmul.f32 0.5, %v1054_v10  ;;  %v1045_v13 = vpop.xlane.xlu2 %1044 }
 0x1cc   : > { %v1048_v14 = vmul.f32 %v1045_v13, %v3937_v25 }
 0x1cd   : > { %v1056_v15 = vsub.f32 1.5, %v1055_v11 }
 0x1ce   : > { %v3565_v17 = vpop.eup %3564  ;;  %v1051_v18 = vadd.f32 1e-05, %v1048_v14 }
 0x1cf   : > { %v1057_v19 = vmul.f32 %v3563_v6, %v1056_v15  ;;  %v1063_v20 = vmul.f32 %v3565_v17, %v1050_v7  ;;  %vm1069_vm6 = vweird.f32 %v3565_v17 }
 0x1d0   : > { %3566 = vrsqrt.f32 %v1051_v18  ;;  %vm1070_vm8 = vmor %vm1068_vm7, %vm1069_vm6  ;;  %vm1078_vm10 = vweird.f32 %v1051_v18 }
 0x1d1   : > { %v1064_v21 = vmul.f32 %v3565_v17, %v1063_v20  ;;  %v1061_v22 = vsel %vm1060_vm5, %v3563_v6, %v1057_v19 }
 0x1d2   : > { %v1082_v27 = vmul.f32 %v1061_v22, %v3941_v28 }
 0x1d3   : > { %v1065_v23 = vmul.f32 0.5, %v1064_v21 }
 0x1d4   : > { %v1088_v36 = vmul.f32 %v3546_v29, %v1082_v27 }
 0x1d5   : > { %v1066_v24 = vsub.f32 1.5, %v1065_v23 }
 0x1d6   : > { %v3567_v26 = vpop.eup %3566  ;;  %v1094_v42 = vadd.f32 %v3547_v37, %v1088_v36 }
 0x1d7   : > { %v1067_v30 = vmul.f32 %v3565_v17, %v1066_v24  ;;  %v1073_v31 = vmul.f32 %v3567_v26, %v1051_v18  ;;  %vm1079_vm9 = vweird.f32 %v3567_v26 }
 0x1d8   : > { %vm1080_vm11 = vmor %vm1078_vm10, %vm1079_vm9 }
 0x1d9   : > { %v1071_v32 = vsel %vm1070_vm8, %v3565_v17, %v1067_v30  ;;  %v1074_v34 = vmul.f32 %v3567_v26, %v1073_v31 }
 0x1da   : > { %v1083_v35 = vmul.f32 %v1071_v32, %v3948_v33 }
 0x1db   : > { %v1075_v39 = vmul.f32 0.5, %v1074_v34 }
 0x1dc   : > { %v1089_v40 = vmul.f32 %v3546_v29, %v1083_v35 }
 0x1dd   : > { %v1076_v41 = vsub.f32 1.5, %v1075_v39 }
 0x1de   : > { %v1095_v43 = vadd.f32 %v3547_v37, %v1089_v40 }
 0x1df   : > { %v1077_v44 = vmul.f32 %v3567_v26, %v1076_v41 }
 0x1e0   : > { %v1097_v28 = vpack.c.bf16 %v1095_v43, %v1094_v42 }
 0x1e1   : > { %v1081_v45 = vsel %vm1080_vm11, %v3567_v26, %v1077_v44 }
 0x1e2   : > { %3186 = vmatmul.msk.bf16.vlgmr.msra.gmra.mxu1 %vm1011_vm1, %v1097_v28  ;;  %3188 = vmatmul.msk.bf16.vlgmr.msra.gmra.mxu2 %vm1011_vm1, %v1097_v28  ;;  %v1084_v33 = vmul.f32 %v1081_v45, %v3955_v38 }
 0x1e4   : > { %v1090_v46 = vmul.f32 %v3546_v29, %v1084_v33  ;;  %v1005_v33 = vlaneseq }
 0x1e6   : > { %v1096_v47 = vadd.f32 %v3547_v37, %v1090_v46  ;;  %v1006_v46 = vand.u32 127, %v1005_v33 }
 0x1e8   : > { %v1098_v48 = vpack.c.bf16 %v1096_v47, %v1096_v47  ;;  %vm1007_vm13 = vcmp.lt.s32.totalorder %v1006_v46, 17  ;;  %v3743_v47 = vmov -1e+09  }
 0x1f2   : > { %3187 = vmatmul.msk.bf16.gmra.mxu1 %vm1011_vm1, %v1098_v48  ;;  %3189 = vmatmul.msk.bf16.gmra.mxu2 %vm1011_vm1, %v1098_v48  ;;  %v4046_v48 = vsel %vm1007_vm13, 0.0, %v3743_v47 }
 0x25f   : > { %v1168_v50 = vpop.f32.mrf.mxu1 }
 0x260   : > { %v1169_v52 = vadd.f32 %v1168_v50, %v1109_v51 }
 0x262   : > { %v1195_v55 = vpack.c.bf16 %v1169_v52, %v1169_v52 }
 0x264   : > { %v1204_v58 = vunpack.c.l.b16 %v1195_v55 }
 0x265   : > { %v1186_v53 = vpop.f32.mrf.mxu2 }
 0x266   : > { %v1187_v6 = vadd.f32 %v1186_v53, %v1110_v0 }
 0x267   : > { %v1170_v54 = vpop.f32.mrf.mxu1 }
 0x268   : > { %v1171_v56 = vadd.f32 %v1170_v54, %v1109_v51  ;;  %v1198_v13 = vpack.c.bf16 %v1187_v6, %v1187_v6 }
 0x26a   : > { %v1196_v57 = vpack.c.bf16 %v1171_v56, %v1171_v56  ;;  %v1282_v19 = vunpack.c.l.b16 %v1198_v13 }
 0x26c   : > { %v1205_v59 = vunpack.c.l.b16 %v1196_v57 }
 0x26d   : > { %v1188_v60 = vpop.f32.mrf.mxu2 }
 0x26e   : > { %v3989_v38 = vpack.c.b16 %v1205_v59, %v1204_v58  ;;  %v1189_v2 = vadd.f32 %v1188_v60, %v1110_v0 }
 0x26f   : > { %v1173_v61 = vpop.f32.mrf.mxu1 }
 0x270   : > { %v1174_v62 = vadd.f32 %v1173_v61, %v1109_v51  ;;  %1209 = vrot.lane.b32.xlu2 %v3989_v38, %s3736_s26  ;;  %v1199_v10 = vpack.c.bf16 %v1189_v2, %v1189_v2 }
 0x272   : > { %v1197_v63 = vpack.c.bf16 %v1174_v62, %v1174_v62  ;;  %v1283_v15 = vunpack.c.l.b16 %v1199_v10 }
 0x274   : > { %v1206_v1 = vunpack.c.l.b16 %v1197_v63  ;;  %v4009_v20 = vpack.c.b16 %v1283_v15, %v1282_v19 }
 0x275   : > { %v1191_v3 = vpop.f32.mrf.mxu2 }
 0x276   : > { %v3993_v4 = vpack.c.b16 %v1206_v1, %v1206_v1  ;;  %v1192_v5 = vadd.f32 %v1191_v3, %v1110_v0 }
 0x277   : > { %v1175_v7 = vpop.f32.mrf.mxu1 }
 0x278   : > { %v1200_v9 = vpack.c.bf16 %v1192_v5, %v1192_v5  ;;  %1316 = vrot.lane.b32.xlu2 %v3989_v38, %s3737_s28  ;;  %1322 = vrot.lane.b32.xlu1 %v3993_v4, %s3738_s1 }
 0x279   : > { %1211 = vrot.lane.b32.xlu0 %v3993_v4, %s3736_s26 }
 0x27a   : > { %v1284_v11 = vunpack.c.l.b16 %v1200_v9 }
 0x27c   : > { %v4001_v14 = vpack.c.b16 %v1284_v11, %v1284_v11 }
 0x27d   : > { %v1193_v17 = vpop.f32.mrf.mxu2 }
 0x27e   : > { %v1296_v18 = vsel %vm1294_vm12, %v4001_v14, 0 }
 0x27f   : > { %1304 = vmatpush.bf16.msrb.mxu0 %v1296_v18 }
 0x280   : > { %1532 = vrot.lane.b32.xlu2 %v3993_v4, %s3739_s2  ;;  %1427 = vrot.lane.b32.xlu1 %v3993_v4, %s3740_s7 }
 0x281   : > { %1320 = vrot.lane.b32.xlu0 %v3989_v38, %s3738_s1 }
 0x283   : > { %1305 = vmatpush.bf16.msrb.mxu0 %v4009_v20 }
 0x288   : > { %1421 = vrot.lane.b32.xlu2 %v3989_v38, %s3741_s10  ;;  %1425 = vrot.lane.b32.xlu1 %v3989_v38, %s3740_s7 }
 0x289   : > { %1318 = vrot.lane.b32.xlu0 %v3993_v4, %s3737_s28 }
 0x290   : > { %1528 = vrot.lane.b32.xlu2 %v3993_v4, %s3742_s11  ;;  %1526 = vrot.lane.b32.xlu1 %v3989_v38, %s3742_s11 }
 0x291   : > { %1530 = vrot.lane.b32.xlu0 %v3989_v38, %s3739_s2 }
 0x299   : > { %1423 = vrot.lane.b32.xlu0 %v3993_v4, %s3741_s10 }
 0x2ca   : > { %v1210_v21 = vpop.permute.xlu2 %1209 }
 0x2cb   : > { %v1220_v34 = vsel %vm980_vm0, %v1210_v21, 0 }
 0x2d2   : > { %v1317_v22 = vpop.permute.xlu2 %1316 }
 0x2da   : > { %v1533_v29 = vpop.permute.xlu2 %1532 }
 0x2db   : > { %v1544_v36 = vsel %vm980_vm0, %v1533_v29, 0 }
 0x2e2   : > { %v1422_v43 = vpop.permute.xlu2 %1421 }
 0x2ea   : > { %v1323_v23 = vpop.permute.xlu1 %1322  ;;  %v1529_v28 = vpop.permute.xlu2 %1528 }
 0x2eb   : > { %v1212_v24 = vpop.permute.xlu0 %1211  ;;  %v1334_v26 = vsel %vm980_vm0, %v1323_v23, 0 }
 0x2ec   : > { %v1223_v27 = vsel %vm980_vm0, %v1212_v24, 0  ;;  %1342 = vmatpush.bf16.xpose.msrb.mxu1 %v1334_v26 }
 0x2ed   : > { %1231 = vmatpush.bf16.xpose.msra.mxu3 %v1223_v27 }
 0x2f2   : > { %v1428_v30 = vpop.permute.xlu1 %1427 }
 0x2f3   : > { %v1321_v31 = vpop.permute.xlu0 %1320  ;;  %v1439_v32 = vsel %vm980_vm0, %v1428_v30, 0 }
 0x2f4   : > { %v1331_v35 = vsel %vm980_vm0, %v1321_v31, 0 }
 0x2f5   : > { %1232 = vmatpush.bf16.xpose.msra.mxu3 %v1220_v34  ;;  %1343 = vmatpush.bf16.xpose.msrb.mxu1 %v1331_v35 }
 0x2fa   : > { %v1426_v37 = vpop.permute.xlu1 %1425 }
 0x2fb   : > { %v1319_v39 = vpop.permute.xlu0 %1318  ;;  %v1436_v40 = vsel %vm980_vm0, %v1426_v37, 0 }
 0x2fc   : > { %3190 = vmatmul.msk.bf16.vlgmr.msra.gmra.mxu3 %vm980_vm0, %v3989_v38  ;;  %3194 = vmatmul.msk.bf16.vlgmr.msrb.gmra.mxu1 %vm980_vm0, %v1317_v22 }
 0x2fd   : > { %1447 = vmatpush.bf16.xpose.msrb.mxu3 %v1439_v32  ;;  %1552 = vmatpush.bf16.xpose.msra.mxu1 %v1544_v36 }
 0x302   : > { %v1527_v44 = vpop.permute.xlu1 %1526 }
 0x303   : > { %v1531_v41 = vpop.permute.xlu0 %1530 }
 0x304   : > { %v1541_v42 = vsel %vm980_vm0, %v1531_v41, 0 }
 0x305   : > { %1448 = vmatpush.bf16.xpose.msrb.mxu3 %v1436_v40  ;;  %1553 = vmatpush.bf16.xpose.msra.mxu1 %v1541_v42 }
 0x30b   : > { %v1424_v45 = vpop.permute.xlu0 %1423 }
 0x30c   : > { %3191 = vmatmul.msk.bf16.gmra.mxu3 %vm980_vm0, %v3993_v4  ;;  %3195 = vmatmul.msk.bf16.gmra.mxu1 %vm980_vm0, %v1319_v39 }
 0x31c   : > { %3198 = vmatmul.msk.bf16.vlgmr.msrb.gmra.mxu3 %vm980_vm0, %v1422_v43  ;;  %3202 = vmatmul.msk.bf16.vlgmr.msra.gmra.mxu1 %vm980_vm0, %v1527_v44 }
 0x32c   : > { %3199 = vmatmul.msk.bf16.gmra.mxu3 %vm980_vm0, %v1424_v45  ;;  %3203 = vmatmul.msk.bf16.gmra.mxu1 %vm980_vm0, %v1529_v28 }
 0x379   : > { %v1345_v49 = vpop.f32.mrf.mxu1 }
 0x37a   : > { %v1346_v50 = vadd.f32 %v1345_v49, %v4046_v48 }
 0x37c   : > { %v1354_v51 = vsel %vm1243_vm14, %v1346_v50, -inf }
 0x37d   : > { %1355 = vmax.xlane.f32.xlu1 %v1354_v51 }
 0x37f   : > { %v1234_v52 = vpop.f32.mrf.mxu3 }
 0x380   : > { %v1235_v53 = vadd.f32 %v1234_v52, %v4046_v48 }
 0x381   : > { %v1347_v54 = vpop.f32.mrf.mxu1 }
 0x382   : > { %v1348_v55 = vadd.f32 %v1347_v54, %v4046_v48  ;;  %v1244_v56 = vsel %vm1243_vm14, %v1235_v53, -inf }
 0x383   : > { %1245 = vmax.xlane.f32.xlu2 %v1244_v56 }
 0x384   : > { %v1357_v57 = vsel %vm1243_vm14, %v1348_v55, -inf }
 0x385   : > { %1358 = vmax.xlane.f32.xlu0 %v1357_v57 }
 0x387   : > { %v1236_v58 = vpop.f32.mrf.mxu3 }
 0x388   : > { %v1237_v59 = vadd.f32 %v1236_v58, %v4046_v48 }
 0x389   : > { %v1350_v60 = vpop.f32.mrf.mxu1 }
 0x38a   : > { %v1247_v38 = vsel %vm1243_vm14, %v1237_v59, -inf  ;;  %v1351_v11 = vadd.f32 %v1350_v60, %v4046_v48 }
 0x38b   : > { %1248 = vmax.xlane.f32.xlu1 %v1247_v38 }
 0x38c   : > { %v1360_v13 = vsel %vm1243_vm14, %v1351_v11, -inf }
 0x38f   : > { %v1239_v61 = vpop.f32.mrf.mxu3 }
 0x390   : > { %v4057_v62 = vadd.f32 %v1239_v61, %v4046_v48 }
 0x391   : > { %v1352_v63 = vpop.f32.mrf.mxu1 }
 0x392   : > { %v1250_v0 = vsel %vm1243_vm14, %v4057_v62, -inf }
 0x393   : > { %1251 = vmax.xlane.f32.xlu2 %v1250_v0 }
 0x397   : > { %v1241_v1 = vpop.f32.mrf.mxu3 }
 0x399   : > { %1389 = vrot.lane.b32.xlu0 %v4009_v20, %s3737_s28  ;;  %v1555_v2 = vpop.f32.mrf.mxu1 }
 0x39a   : > { %v4073_v17 = vadd.f32 %v1555_v2, %v4046_v48 }
 0x39c   : > { %v1564_v19 = vsel %vm1243_vm14, %v4073_v17, -inf }
 0x39f   : > { %v1450_v3 = vpop.f32.mrf.mxu3 }
 0x3a0   : > { %v4080_v21 = vadd.f32 %v1450_v3, %v4046_v48 }
 0x3a1   : > { %v1557_v4 = vpop.f32.mrf.mxu1 }
 0x3a2   : > { %v4070_v15 = vadd.f32 %v1557_v4, %v4046_v48  ;;  %v1459_v23 = vsel %vm1243_vm14, %v4080_v21, -inf }
 0x3a4   : > { %1391 = vrot.lane.b32.xlu1 %v4001_v14, %s3737_s28  ;;  %v1567_v18 = vsel %vm1243_vm14, %v4070_v15, -inf }
 0x3a7   : > { %v1452_v5 = vpop.f32.mrf.mxu3 }
 0x3a8   : > { %v4083_v22 = vadd.f32 %v1452_v5, %v4046_v48 }
 0x3a9   : > { %v1560_v6 = vpop.f32.mrf.mxu1 }
 0x3aa   : > { %v1462_v24 = vsel %vm1243_vm14, %v4083_v22, -inf  ;;  %v4093_v27 = vadd.f32 %v1560_v6, %v4046_v48 }
 0x3ab   : > { %1601 = vrot.lane.b32.xlu2 %v4001_v14, %s3742_s11 }
 0x3ac   : > { %v1570_v30 = vsel %vm1243_vm14, %v4093_v27, -inf }
 0x3af   : > { %v1455_v7 = vpop.f32.mrf.mxu3 }
 0x3b0   : > { %v4090_v26 = vadd.f32 %v1455_v7, %v4046_v48 }
 0x3b1   : > { %v1562_v9 = vpop.f32.mrf.mxu1 }
 0x3b2   : > { %v1465_v29 = vsel %vm1243_vm14, %v4090_v26, -inf }
 0x3b7   : > { %v1457_v10 = vpop.f32.mrf.mxu3 }
 0x3c3   : > { %1361 = vmax.xlane.f32.xlu0 %v1360_v13 }
 0x3cb   : > { %1568 = vmax.xlane.f32.xlu0 %v1567_v18 }
 0x3ce   : > { %1565 = vmax.xlane.f32.xlu1 %v1564_v19 }
 0x3d4   : > { %1460 = vmax.xlane.f32.xlu2 %v1459_v23 }
 0x3d6   : > { %1463 = vmax.xlane.f32.xlu1 %v1462_v24 }
 0x3dc   : > { %1466 = vmax.xlane.f32.xlu2 %v1465_v29 }
 0x3de   : > { %1571 = vmax.xlane.f32.xlu1 %v1570_v30 }
 0x3f0   : > { %v1356_v31 = vpop.xlane.xlu1 %1355 }
 0x3f1   : > { %v1363_v32 = vsub.f32 %v1346_v50, %v1356_v31 }
 0x3f3   : > { %v1366_v34 = vmul.f32 1.442695, %v1363_v32 }
 0x3f5   : > { %3568 = vpow2.f32 %v1366_v34 }
 0x3f6   : > { %v1246_v35 = vpop.xlane.xlu2 %1245 }
 0x3f7   : > { %v1253_v36 = vsub.f32 %v1235_v53, %v1246_v35 }
 0x3f8   : > { %v1359_v37 = vpop.xlane.xlu0 %1358 }
 0x3f9   : > { %v1256_v39 = vmul.f32 1.442695, %v1253_v36  ;;  %v1364_v40 = vsub.f32 %v1348_v55, %v1359_v37 }
 0x3fb   : > { %v4099_v41 = vpop.eup %3568  ;;  %3570 = vpow2.f32 %v1256_v39  ;;  %v1368_v42 = vmul.f32 1.442695, %v1364_v40 }
 0x3fc   : > { %v1372_v43 = vsel %vm1243_vm14, %v4099_v41, 0.0 }
 0x3fd   : > { %3572 = vpow2.f32 %v1368_v42  ;;  %1373 = vadd.xlane.f32.xlu0 %v1372_v43 }
 0x3fe   : > { %v1249_v44 = vpop.xlane.xlu1 %1248 }
 0x3ff   : > { %v1254_v28 = vsub.f32 %v1237_v59, %v1249_v44 }
 0x401   : > { %v4103_v45 = vpop.eup %3570  ;;  %v1258_v33 = vmul.f32 1.442695, %v1254_v28 }
 0x402   : > { %v1262_v49 = vsel %vm1243_vm14, %v4103_v45, 0.0 }
 0x403   : > { %v4105_v46 = vpop.eup %3572  ;;  %3574 = vpow2.f32 %v1258_v33 }
 0x404   : > { %v1375_v47 = vsel %vm1243_vm14, %v4105_v46, 0.0 }
 0x405   : > { %1376 = vadd.xlane.f32.xlu2 %v1375_v47  ;;  %1263 = vadd.xlane.f32.xlu0 %v1262_v49 }
 0x406   : > { %v1252_v52 = vpop.xlane.xlu2 %1251 }
 0x407   : > { %v1255_v60 = vsub.f32 %v4057_v62, %v1252_v52 }
 0x409   : > { %v4111_v50 = vpop.eup %3574  ;;  %v1260_v61 = vmul.f32 1.442695, %v1255_v60 }
 0x40a   : > { %v1265_v51 = vsel %vm1243_vm14, %v4111_v50, 0.0 }
 0x40b   : > { %v1390_v56 = vpop.permute.xlu0 %1389 }
 0x40d   : > { %1266 = vadd.xlane.f32.xlu2 %v1265_v51 }
 0x40e   : > { %v1602_v55 = vpop.permute.xlu2 %1601 }
 0x40f   : > { %v1611_v57 = vsel %vm1294_vm12, %v1602_v55, 0 }
 0x416   : > { %v1392_v53 = vpop.permute.xlu1 %1391 }
 0x417   : > { %v1401_v54 = vsel %vm1294_vm12, %v1392_v53, 0 }
 0x418   : > { %1409 = vmatpush.bf16.msrb.mxu2 %v1401_v54 }
 0x41c   : > { %1410 = vmatpush.bf16.msrb.mxu2 %v1390_v56 }
 0x420   : > { %1619 = vmatpush.bf16.msra.mxu2 %v1611_v57 }
 0x436   : > { %v1362_v58 = vpop.xlane.xlu0 %1361 }
 0x437   : > { %v1365_v59 = vsub.f32 %v1351_v11, %v1362_v58 }
 0x439   : > { %v1370_v38 = vmul.f32 1.442695, %v1365_v59 }
 0x43b   : > { %3576 = vpow2.f32 %v1370_v38 }
 0x43c   : > { %3578 = vpow2.f32 %v1260_v61 }
 0x43e   : > { %v1569_v63 = vpop.xlane.xlu0 %1568 }
 0x43f   : > { %v1574_v0 = vsub.f32 %v4070_v15, %v1569_v63 }
 0x441   : > { %v4119_v1 = vpop.eup %3576  ;;  %v1578_v2 = vmul.f32 1.442695, %v1574_v0  ;;  %v1566_v3 = vpop.xlane.xlu1 %1565 }
 0x442   : > { %v1573_v4 = vsub.f32 %v4073_v17, %v1566_v3  ;;  %v1378_v5 = vsel %vm1243_vm14, %v4119_v1, 0.0  ;;  %v4124_v62 = vpop.eup %3578 }
 0x443   : > { %3580 = vpow2.f32 %v1578_v2  ;;  %1379 = vadd.xlane.f32.xlu2 %v1378_v5  ;;  %v1268_v18 = vsel %vm1243_vm14, %v4124_v62, 0.0 }
 0x444   : > { %v1576_v6 = vmul.f32 1.442695, %v1573_v4 }
 0x446   : > { %3582 = vpow2.f32 %v1576_v6 }
 0x447   : > { %v1461_v7 = vpop.xlane.xlu2 %1460 }
 0x448   : > { %v1468_v9 = vsub.f32 %v4080_v21, %v1461_v7 }
 0x449   : > { %v4127_v10 = vpop.eup %3580  ;;  %v1464_v11 = vpop.xlane.xlu1 %1463 }
 0x44a   : > { %v1471_v13 = vmul.f32 1.442695, %v1468_v9  ;;  %v1469_v15 = vsub.f32 %v4083_v22, %v1464_v11  ;;  %v1585_v17 = vsel %vm1243_vm14, %v4127_v10, 0.0 }
 0x44b   : > { %1586 = vadd.xlane.f32.xlu0 %v1585_v17  ;;  %1269 = vadd.xlane.f32.xlu2 %v1268_v18 }
 0x44c   : > { %3584 = vpow2.f32 %v1471_v13  ;;  %v1473_v19 = vmul.f32 1.442695, %v1469_v15  ;;  %v4134_v23 = vpop.eup %3582 }
 0x44d   : > { %v1582_v24 = vsel %vm1243_vm14, %v4134_v23, 0.0 }
 0x44e   : > { %3586 = vpow2.f32 %v1473_v19 }
 0x44f   : > { %v1467_v31 = vpop.xlane.xlu2 %1466 }
 0x450   : > { %v1470_v37 = vsub.f32 %v4090_v26, %v1467_v31 }
 0x451   : > { %v1572_v43 = vpop.xlane.xlu1 %1571 }
 0x452   : > { %v4136_v21 = vpop.eup %3584  ;;  %v1475_v44 = vmul.f32 1.442695, %v1470_v37  ;;  %v1575_v33 = vsub.f32 %v4093_v27, %v1572_v43 }
 0x453   : > { %1583 = vadd.xlane.f32.xlu2 %v1582_v24  ;;  %v1477_v22 = vsel %vm1243_vm14, %v4136_v21, 0.0 }
 0x454   : > { %1478 = vadd.xlane.f32.xlu1 %v1477_v22  ;;  %v4142_v29 = vpop.eup %3586  ;;  %v1580_v51 = vmul.f32 1.442695, %v1575_v33 }
 0x455   : > { %v1480_v30 = vsel %vm1243_vm14, %v4142_v29, 0.0 }
 0x45b   : > { %1481 = vadd.xlane.f32.xlu2 %v1480_v30 }
 0x45f   : > { %1496 = vrot.lane.b32.xlu0 %v4001_v14, %s3741_s10 }
 0x467   : > { %1494 = vrot.lane.b32.xlu0 %v4009_v20, %s3741_s10 }
 0x46d   : > { %1599 = vrot.lane.b32.xlu1 %v4009_v20, %s3742_s11 }
 0x470   : > { %v1374_v32 = vpop.xlane.xlu0 %1373 }
 0x471   : > { %3588 = vrcp.f32 %v1374_v32 }
 0x477   : > { %v3589_v36 = vpop.eup %3588 }
 0x478   : > { %v1377_v34 = vpop.xlane.xlu2 %1376  ;;  %v1264_v35 = vpop.xlane.xlu0 %1263  ;;  %v1384_v14 = vmul.f32 %v3589_v36, %v4099_v41 }
 0x479   : > { %3590 = vrcp.f32 %v1377_v34 }
 0x47a   : > { %3592 = vrcp.f32 %v1264_v35 }
 0x47f   : > { %v3591_v39 = vpop.eup %3590 }
 0x480   : > { %v1267_v40 = vpop.xlane.xlu2 %1266  ;;  %v1385_v42 = vmul.f32 %v3591_v39, %v4105_v46  ;;  %v3593_v28 = vpop.eup %3592 }
 0x481   : > { %3594 = vrcp.f32 %v1267_v40  ;;  %v1274_v26 = vmul.f32 %v3593_v28, %v4103_v45 }
 0x482   : > { %v1387_v20 = vpack.c.bf16 %v1385_v42, %v1384_v14  ;;  %3596 = vpow2.f32 %v1475_v44 }
 0x483   : > { %3598 = vpow2.f32 %v1580_v51  ;;  %v3426_v51 = vld [vmem:[%s3787_s3 + $0x18] sm:$0xff] }
 0x484   : > { %3196 = vmatmul.msk.bf16.vlgmr.msrb.gmra.mxu2 %vm1243_vm14, %v1387_v20  ;;  %1726 = vmatpush.bf16.msra.mxu3 %v3426_v51  ;;  %v3427_v51 = vld [vmem:[%s3807_s24] sm:$0xff] }
 0x487   : > { %v3595_v47 = vpop.eup %3594 }
 0x488   : > { %v1275_v49 = vmul.f32 %v3595_v47, %v4111_v50  ;;  %v3597_v41 = vpop.eup %3596 }
 0x489   : > { %v1483_v46 = vsel %vm1243_vm14, %v3597_v41, 0.0  ;;  %v3599_v53 = vpop.eup %3598 }
 0x48a   : > { %v1277_v52 = vpack.c.bf16 %v1275_v49, %v1274_v26  ;;  %v1588_v27 = vsel %vm1243_vm14, %v3599_v53, 0.0 }
 0x48c   : > { %3192 = vmatmul.msk.bf16.vlgmr.msrb.gmra.mxu0 %vm1243_vm14, %v1277_v52  ;;  %v3425_v52 = vld [vmem:[%s3787_s3 + $0x10] sm:$0xff] }
 0x48d   : > { %1727 = vmatpush.bf16.msra.mxu3 %v3425_v52 }
 0x491   : > { %1484 = vadd.xlane.f32.xlu0 %v1483_v46  ;;  %v3423_v46 = vld [vmem:[%s3787_s3] sm:$0xff] }
 0x497   : > { %1589 = vadd.xlane.f32.xlu1 %v1588_v27 }
 0x4b6   : > { %v1380_v54 = vpop.xlane.xlu2 %1379 }
 0x4b7   : > { %3600 = vrcp.f32 %v1380_v54 }
 0x4bd   : > { %v3601_v55 = vpop.eup %3600 }
 0x4be   : > { %v1270_v56 = vpop.xlane.xlu2 %1269  ;;  %v1386_v45 = vmul.f32 %v3601_v55, %v4119_v1  ;;  %v1587_v60 = vpop.xlane.xlu0 %1586 }
 0x4bf   : > { %3602 = vrcp.f32 %v1270_v56 }
 0x4c0   : > { %v1388_v50 = vpack.c.bf16 %v1386_v45, %v1386_v45 }
 0x4c2   : > { %3197 = vmatmul.msk.bf16.gmra.mxu2 %vm1243_vm14, %v1388_v50 }
 0x4c5   : > { %v3603_v57 = vpop.eup %3602 }
 0x4c6   : > { %v1584_v58 = vpop.xlane.xlu2 %1583  ;;  %v1276_v59 = vmul.f32 %v3603_v57, %v4124_v62 }
 0x4c7   : > { %v1479_v61 = vpop.xlane.xlu1 %1478 }
 0x4c8   : > { %v1278_v38 = vpack.c.bf16 %v1276_v59, %v1276_v59 }
 0x4ca   : > { %3193 = vmatmul.msk.bf16.gmra.mxu0 %vm1243_vm14, %v1278_v38 }
 0x4ce   : > { %v1482_v63 = vpop.xlane.xlu2 %1481 }
 0x4cf   : > { %3604 = vrcp.f32 %v1482_v63 }
 0x4d0   : > { %3606 = vrcp.f32 %v1479_v61 }
 0x4d1   : > { %v1497_v0 = vpop.permute.xlu0 %1496  ;;  %3608 = vrcp.f32 %v1584_v58 }
 0x4d2   : > { %v1506_v2 = vsel %vm1294_vm12, %v1497_v0, 0  ;;  %3610 = vrcp.f32 %v1587_v60 }
 0x4d3   : > { %1514 = vmatpush.bf16.msra.mxu0 %v1506_v2 }
 0x4d5   : > { %v3605_v1 = vpop.eup %3604 }
 0x4d6   : > { %v3607_v3 = vpop.eup %3606  ;;  %v1490_v4 = vmul.f32 %v3605_v1, %v4142_v29 }
 0x4d7   : > { %v1489_v5 = vmul.f32 %v3607_v3, %v4136_v21  ;;  %v3609_v62 = vpop.eup %3608 }
 0x4d8   : > { %v3611_v9 = vpop.eup %3610  ;;  %v1594_v11 = vmul.f32 %v3609_v62, %v4134_v23 }
 0x4d9   : > { %v1495_v6 = vpop.permute.xlu0 %1494  ;;  %v1492_v7 = vpack.c.bf16 %v1490_v4, %v1489_v5  ;;  %v1595_v13 = vmul.f32 %v3611_v9, %v4127_v10  ;;  %v3548_v9 = vld [vmem:[%s3792_s8] ss:$0 sm:$0xff] }
 0x4da   : > { %1515 = vmatpush.bf16.msra.mxu0 %v1495_v6 }
 0x4db   : > { %v1597_v17 = vpack.c.bf16 %v1595_v13, %v1594_v11 }
 0x4dd   : > { %3200 = vmatmul.msk.bf16.vlgmr.msra.gmra.mxu0 %vm1243_vm14, %v1492_v7 }
 0x4df   : > { %v1600_v15 = vpop.permute.xlu1 %1599 }
 0x4e0   : > { %1620 = vmatpush.bf16.msra.mxu2 %v1600_v15 }
 0x4e3   : > { %3204 = vmatmul.msk.bf16.vlgmr.msra.gmra.mxu2 %vm1243_vm14, %v1597_v17 }
 0x504   : > { %v1485_v18 = vpop.xlane.xlu0 %1484 }
 0x505   : > { %3612 = vrcp.f32 %v1485_v18 }
 0x507   : > { %v1412_v19 = vpop.f32.mrf.mxu2 }
 0x509   : > { %v1307_v34 = vpop.f32.mrf.mxu0 }
 0x50a   : > { %v1590_v21 = vpop.xlane.xlu1 %1589 }
 0x50b   : > { %v3613_v24 = vpop.eup %3612  ;;  %3614 = vrcp.f32 %v1590_v21 }
 0x50c   : > { %v1491_v22 = vmul.f32 %v3613_v24, %v3597_v41  ;;  %v3424_v41 = vld [vmem:[%s3787_s3 + $0x8] sm:$0xff] }
 0x50d   : > { %1728 = vmatpush.bf16.msra.mxu3 %v3424_v41 }
 0x50e   : > { %v1493_v29 = vpack.c.bf16 %v1491_v22, %v1491_v22 }
 0x50f   : > { %v1414_v30 = vpop.f32.mrf.mxu2 }
 0x510   : > { %3201 = vmatmul.msk.bf16.gmra.mxu0 %vm1243_vm14, %v1493_v29  ;;  %v3516_v31 = vpack.i.bf16 %v1414_v30, %v1412_v19 }
 0x511   : > { %v3615_v23 = vpop.eup %3614  ;;  %v1309_v35 = vpop.f32.mrf.mxu0  ;;  %1729 = vmatpush.bf16.msra.mxu3 %v3423_v46 }
 0x512   : > { %v1596_v32 = vmul.f32 %v3615_v23, %v3599_v53  ;;  %3517 = vrot.lane.b32.xlu2 %v3516_v31, %s3739_s2 }
 0x514   : > { %v1598_v10 = vpack.c.bf16 %v1596_v32, %v1596_v32 }
 0x516   : > { %3205 = vmatmul.msk.bf16.gmra.mxu2 %vm1243_vm14, %v1598_v10 }
 0x545   : > { %v1417_v36 = vpop.f32.mrf.mxu2 }
 0x546   : > { %1638 = vrot.lane.b32.xlu0 %v1417_v36, %s3739_s2 }
 0x547   : > { %v1312_v37 = vpop.f32.mrf.mxu0 }
 0x54d   : > { %v1419_v39 = vpop.f32.mrf.mxu2 }
 0x54f   : > { %v1314_v40 = vpop.f32.mrf.mxu0 }
 0x55a   : > { %v1517_v14 = vpop.f32.mrf.mxu0 }
 0x562   : > { %v1519_v42 = vpop.f32.mrf.mxu0 }
 0x563   : > { %v3521_v43 = vpack.i.bf16 %v1519_v42, %v1517_v14 }
 0x565   : > { %3522 = vrot.lane.b32.xlu2 %v3521_v43, %s3740_s7 }
 0x566   : > { %v1622_v44 = vpop.f32.mrf.mxu2 }
 0x56c   : > { %v3518_v53 = vpop.permute.xlu2 %3517 }
 0x56d   : > { %v3520_v54 = vunpack.i.h.bf16 %v3518_v53  ;;  %v3519_v55 = vunpack.i.l.bf16 %v3518_v53 }
 0x56e   : > { %v1624_v20 = vpop.f32.mrf.mxu2 }
 0x56f   : > { %v3526_v28 = vpack.i.bf16 %v1624_v20, %v1622_v44  ;;  %v1668_v57 = vsel %vm980_vm0, %v1309_v35, %v3520_v54  ;;  %v1667_v58 = vsel %vm980_vm0, %v1307_v34, %v3519_v55  ;;  %v3430_v20 = vld [vmem:[%s3807_s24 + $0x18] sm:$0xff] }
 0x570   : > { %1871 = vmatpush.bf16.msrb.mxu0 %v3430_v20 }
 0x571   : > { %3527 = vrot.lane.b32.xlu1 %v3526_v28, %s3738_s1  ;;  %v3429_v28 = vld [vmem:[%s3807_s24 + $0x10] sm:$0xff] }
 0x574   : > { %1872 = vmatpush.bf16.msrb.mxu0 %v3429_v28 }
 0x58d   : > { %v1522_v33 = vpop.f32.mrf.mxu0 }
 0x58e   : > { %1650 = vrot.lane.b32.xlu2 %v1522_v33, %s3740_s7  ;;  %v3428_v33 = vld [vmem:[%s3807_s24 + $0x8] sm:$0xff] }
 0x58f   : > { %1873 = vmatpush.bf16.msrb.mxu0 %v3428_v33 }
 0x593   : > { %1874 = vmatpush.bf16.msrb.mxu0 %v3427_v51 }
 0x595   : > { %v1524_v47 = vpop.f32.mrf.mxu0 }
 0x599   : > { %v1627_v26 = vpop.f32.mrf.mxu2 }
 0x59a   : > { %1662 = vrot.lane.b32.xlu2 %v1627_v26, %s3738_s1 }
 0x5a1   : > { %v1629_v49 = vpop.f32.mrf.mxu2 }
 0x5b8   : > { %v1639_v3 = vpop.permute.xlu0 %1638 }
 0x5b9   : > { %v1669_v4 = vsel %vm980_vm0, %v1312_v37, %v1639_v3 }
 0x5bf   : > { %v3523_v27 = vpop.permute.xlu2 %3522 }
 0x5c0   : > { %v3525_v56 = vunpack.i.h.bf16 %v3523_v27  ;;  %v3524_v45 = vunpack.i.l.bf16 %v3523_v27 }
 0x5c2   : > { %v1671_v38 = vsel %vm1670_vm15, %v1667_v58, %v3524_v45  ;;  %v1672_v61 = vsel %vm1670_vm15, %v1668_v57, %v3525_v56 }
 0x5e3   : > { %v3528_v50 = vpop.permute.xlu1 %3527 }
 0x5e4   : > { %v3530_v59 = vunpack.i.h.bf16 %v3528_v50  ;;  %v3529_v60 = vunpack.i.l.bf16 %v3528_v50 }
 0x5e6   : > { %v1675_v63 = vsel %vm1674_vm2, %v1671_v38, %v3529_v60  ;;  %v1676_v0 = vsel %vm1674_vm2, %v1672_v61, %v3530_v59 }
 0x5e7   : > { %v1678_v2 = vpack.c.bf16 %v1676_v0, %v1675_v63 }
 0x5e8   : > { %v1651_v1 = vpop.permute.xlu2 %1650 }
 0x5e9   : > { %3222 = vmatmul.msk.bf16.vlgmr.msra.gmra.mxu3 %vm1011_vm1, %v1678_v2  ;;  %v1673_v5 = vsel %vm1670_vm15, %v1669_v4, %v1651_v1  ;;  %v3549_v1 = vld [vmem:[%s3797_s14] ss:$0 sm:$0xff] }
 0x5f4   : > { %v1663_v6 = vpop.permute.xlu2 %1662 }
 0x5f5   : > { %v1677_v62 = vsel %vm1674_vm2, %v1673_v5, %v1663_v6 }
 0x5f6   : > { %v1679_v7 = vpack.c.bf16 %v1677_v62, %v1677_v62 }
 0x5f9   : > { %3223 = vmatmul.msk.bf16.gmra.mxu3 %vm1011_vm1, %v1679_v7  ;;  %v3550_v7 = vld [vmem:[%s3802_s19] ss:$0 sm:$0xff] }
 0x66c   : > { %v1731_v11 = vpop.f32.mrf.mxu3 }
 0x66d   : > { %v1732_v13 = vadd.f32 %v3548_v9, %v1731_v11 }
 0x66f   : > { %v4198_v15 = vadd.f32 %v1732_v13, %v3923_v8 }
 0x671   : > { %v1745_v17 = vsel %vm1011_vm1, %v4198_v15, 0.0 }
 0x672   : > { %1746 = vadd.xlane.f32.xlu2 %v1745_v17 }
 0x674   : > { %v1733_v18 = vpop.f32.mrf.mxu3 }
 0x675   : > { %v1734_v19 = vadd.f32 %v3548_v9, %v1733_v18 }
 0x677   : > { %v4203_v21 = vadd.f32 %v1734_v19, %v3928_v12 }
 0x679   : > { %v1748_v24 = vsel %vm1011_vm1, %v4203_v21, 0.0 }
 0x67a   : > { %1749 = vadd.xlane.f32.xlu0 %v1748_v24 }
 0x67c   : > { %v1736_v22 = vpop.f32.mrf.mxu3 }
 0x67d   : > { %v1737_v29 = vadd.f32 %v3548_v9, %v1736_v22 }
 0x67f   : > { %v4208_v30 = vadd.f32 %v1737_v29, %v3933_v16 }
 0x681   : > { %v1751_v8 = vsel %vm1011_vm1, %v4208_v30, 0.0 }
 0x682   : > { %1752 = vadd.xlane.f32.xlu1 %v1751_v8 }
 0x684   : > { %v1738_v23 = vpop.f32.mrf.mxu3 }
 0x6e5   : > { %v1747_v31 = vpop.xlane.xlu2 %1746 }
 0x6e6   : > { %v1754_v32 = vmul.f32 %v1747_v31, %v3937_v25 }
 0x6e8   : > { %v1757_v12 = vsub.f32 %v4198_v15, %v1754_v32 }
 0x6ea   : > { %v1760_v10 = vmul.f32 %v1757_v12, %v1757_v12 }
 0x6ec   : > { %v1763_v34 = vsel %vm1011_vm1, %v1760_v10, 0.0  ;;  %v3438_v10 = vld [vmem:[%s3817_s6 + $0x38] sm:$0xff] }
 0x6ed   : > { %v1750_v35 = vpop.xlane.xlu0 %1749  ;;  %1764 = vadd.xlane.f32.xlu2 %v1763_v34  ;;  %1982 = vmatpush.bf16.msrb.mxu1 %v3438_v10  ;;  %v3437_v34 = vld [vmem:[%s3817_s6 + $0x30] sm:$0xff] }
 0x6ee   : > { %v1755_v16 = vmul.f32 %v1750_v35, %v3937_v25  ;;  %v3436_v35 = vld [vmem:[%s3817_s6 + $0x28] sm:$0xff] }
 0x6f0   : > { %v1758_v36 = vsub.f32 %v4203_v21, %v1755_v16  ;;  %v3435_v16 = vld [vmem:[%s3817_s6 + $0x20] sm:$0xff] }
 0x6f1   : > { %1983 = vmatpush.bf16.msrb.mxu1 %v3437_v34 }
 0x6f2   : > { %v1761_v37 = vmul.f32 %v1758_v36, %v1758_v36 }
 0x6f4   : > { %v1766_v39 = vsel %vm1011_vm1, %v1761_v37, 0.0  ;;  %v3433_v37 = vld [vmem:[%s3817_s6 + $0x10] sm:$0xff] }
 0x6f5   : > { %v1753_v40 = vpop.xlane.xlu1 %1752  ;;  %1767 = vadd.xlane.f32.xlu0 %v1766_v39  ;;  %1984 = vmatpush.bf16.msrb.mxu1 %v3436_v35  ;;  %v3432_v39 = vld [vmem:[%s3817_s6 + $0x8] sm:$0xff] }
 0x6f6   : > { %v1756_v14 = vmul.f32 %v1753_v40, %v3937_v25  ;;  %v3551_v40 = vld [vmem:[%s3812_s30] ss:$0 sm:$0xff] }
 0x6f8   : > { %v4220_v42 = vsub.f32 %v4208_v30, %v1756_v14 }
 0x6f9   : > { %1985 = vmatpush.bf16.msrb.mxu1 %v3435_v16 }
 0x6fa   : > { %v1762_v43 = vmul.f32 %v4220_v42, %v4220_v42 }
 0x6fc   : > { %v1769_v44 = vsel %vm1011_vm1, %v1762_v43, 0.0 }
 0x6fd   : > { %1770 = vadd.xlane.f32.xlu2 %v1769_v44 }
 0x760   : > { %v1765_v47 = vpop.xlane.xlu2 %1764 }
 0x761   : > { %v1772_v26 = vmul.f32 %v1765_v47, %v3937_v25 }
 0x763   : > { %v1775_v49 = vadd.f32 1e-05, %v1772_v26 }
 0x765   : > { %3616 = vrsqrt.f32 %v1775_v49  ;;  %vm1784_vm4 = vweird.f32 %v1775_v49 }
 0x768   : > { %v1768_v52 = vpop.xlane.xlu0 %1767 }
 0x769   : > { %v1773_v41 = vmul.f32 %v1768_v52, %v3937_v25 }
 0x76b   : > { %v3617_v46 = vpop.eup %3616  ;;  %v1776_v53 = vadd.f32 1e-05, %v1773_v41 }
 0x76c   : > { %v1779_v27 = vmul.f32 %v3617_v46, %v1775_v49  ;;  %vm1785_vm3 = vweird.f32 %v3617_v46 }
 0x76d   : > { %3618 = vrsqrt.f32 %v1776_v53  ;;  %vm1786_vm5 = vmor %vm1784_vm4, %vm1785_vm3  ;;  %vm1794_vm7 = vweird.f32 %v1776_v53 }
 0x76e   : > { %v1780_v54 = vmul.f32 %v3617_v46, %v1779_v27 }
 0x770   : > { %v1781_v55 = vmul.f32 0.5, %v1780_v54  ;;  %v1771_v56 = vpop.xlane.xlu2 %1770 }
 0x771   : > { %v1774_v45 = vmul.f32 %v1771_v56, %v3937_v25 }
 0x772   : > { %v1782_v50 = vsub.f32 1.5, %v1781_v55 }
 0x773   : > { %v3619_v57 = vpop.eup %3618  ;;  %v1777_v58 = vadd.f32 1e-05, %v1774_v45 }
 0x774   : > { %v1783_v59 = vmul.f32 %v3617_v46, %v1782_v50  ;;  %v1789_v60 = vmul.f32 %v3619_v57, %v1776_v53  ;;  %vm1795_vm6 = vweird.f32 %v3619_v57 }
 0x775   : > { %3620 = vrsqrt.f32 %v1777_v58  ;;  %vm1796_vm8 = vmor %vm1794_vm7, %vm1795_vm6  ;;  %vm1804_vm10 = vweird.f32 %v1777_v58 }
 0x776   : > { %v1790_v38 = vmul.f32 %v3619_v57, %v1789_v60  ;;  %v1787_v61 = vsel %vm1786_vm5, %v3617_v46, %v1783_v59 }
 0x777   : > { %v1808_v3 = vmul.f32 %v1787_v61, %v1757_v12 }
 0x778   : > { %v1791_v63 = vmul.f32 0.5, %v1790_v38 }
 0x779   : > { %v1814_v9 = vmul.f32 %v3549_v1, %v1808_v3 }
 0x77a   : > { %v1792_v0 = vsub.f32 1.5, %v1791_v63 }
 0x77b   : > { %v3621_v2 = vpop.eup %3620  ;;  %v1820_v19 = vadd.f32 %v3550_v7, %v1814_v9  ;;  %v3552_v9 = vld [vmem:[%s4581_s16] ss:$0 sm:$0xff]  ;;  %s4593_s16 = sld [smem:[#allocation15_spill]] }
 0x77c   : > { %v1793_v4 = vmul.f32 %v3619_v57, %v1792_v0  ;;  %v1799_v5 = vmul.f32 %v3621_v2, %v1777_v58  ;;  %vm1805_vm9 = vweird.f32 %v3621_v2 }
 0x77d   : > { %vm1806_vm11 = vmor %vm1804_vm10, %vm1805_vm9 }
 0x77e   : > { %v1797_v6 = vsel %vm1796_vm8, %v3619_v57, %v1793_v4  ;;  %v1800_v62 = vmul.f32 %v3621_v2, %v1799_v5 }
 0x77f   : > { %v1809_v11 = vmul.f32 %v1797_v6, %v1758_v36  ;;  %v3434_v36 = vld [vmem:[%s3817_s6 + $0x18] sm:$0xff] }
 0x780   : > { %v1801_v13 = vmul.f32 0.5, %v1800_v62  ;;  %1986 = vmatpush.bf16.msrb.mxu1 %v3434_v36 }
 0x781   : > { %v1815_v17 = vmul.f32 %v3549_v1, %v1809_v11 }
 0x782   : > { %v1802_v18 = vsub.f32 1.5, %v1801_v13 }
 0x783   : > { %v1821_v24 = vadd.f32 %v3550_v7, %v1815_v17 }
 0x784   : > { %v1803_v22 = vmul.f32 %v3621_v2, %v1802_v18  ;;  %1987 = vmatpush.bf16.msrb.mxu1 %v3433_v37 }
 0x785   : > { %v1823_v29 = vpack.c.bf16 %v1821_v24, %v1820_v19 }
 0x786   : > { %v1807_v8 = vsel %vm1806_vm11, %v3621_v2, %v1803_v22 }
 0x787   : > { %3240 = vmatmul.msk.bf16.vlgmr.msrb.gmra.mxu0 %vm1011_vm1, %v1823_v29  ;;  %v1810_v23 = vmul.f32 %v1807_v8, %v4220_v42  ;;  %v3431_v42 = vld [vmem:[%s3817_s6] sm:$0xff] }
 0x788   : > { %1988 = vmatpush.bf16.msrb.mxu1 %v3432_v39 }
 0x789   : > { %v1816_v31 = vmul.f32 %v3549_v1, %v1810_v23 }
 0x78b   : > { %v1822_v32 = vadd.f32 %v3550_v7, %v1816_v31 }
 0x78c   : > { %1989 = vmatpush.bf16.msrb.mxu1 %v3431_v42 }
 0x78d   : > { %v1824_v12 = vpack.c.bf16 %v1822_v32, %v1822_v32 }
 0x797   : > { %3241 = vmatmul.msk.bf16.gmra.mxu0 %vm1011_vm1, %v1824_v12 }
 0x804   : > { %v1876_v14 = vpop.f32.mrf.mxu0 }
 0x805   : > { %v1877_v43 = vadd.f32 %v3551_v40, %v1876_v14 }
 0x807   : > { %v1885_v44 = vmul.f32 %v1877_v43, %v1877_v43 }
 0x809   : > { %v1888_v20 = vmul.f32 %v1885_v44, %v1877_v43 }
 0x80b   : > { %v1891_v28 = vmul.f32 0.044715, %v1888_v20  ;;  %v3300_v20 = vld [vmem:[%s4582_s15 + $0x30] sm:$0xf] }
 0x80c   : > { %v1878_v33 = vpop.f32.mrf.mxu0 }
 0x80d   : > { %v1894_v47 = vadd.f32 %v1891_v28, %v1877_v43  ;;  %v1879_v26 = vadd.f32 %v3551_v40, %v1878_v33  ;;  %v3446_v28 = vld [vmem:[%s4582_s15 + $0x34] sm:$0xf0]  ;;  %v3445_v33 = vld [vmem:[%s4582_s15 + $0x34] sm:$0xf] }
 0x80f   : > { %v1897_v49 = vmul.f32 0.7978846, %v1894_v47  ;;  %v1886_v51 = vmul.f32 %v1879_v26, %v1879_v26  ;;  %v3301_v47 = vor.u32 %v3446_v28, %v3300_v20 }
 0x811   : > { %v1889_v52 = vmul.f32 %v1886_v51, %v1879_v26  ;;  %3622 = vtanh.f32 %v1897_v49  ;;  %2149 = vmatpush.bf16.msrb.mxu2 %v3301_v47  ;;  %v3292_v51 = vld [vmem:[%s4582_s15 + $0x20] sm:$0xf] }
 0x813   : > { %v1892_v41 = vmul.f32 0.044715, %v1889_v52  ;;  %v3444_v52 = vld [vmem:[%s4582_s15 + $0x24] sm:$0xf0] }
 0x814   : > { %v1881_v46 = vpop.f32.mrf.mxu0 }
 0x815   : > { %v1895_v53 = vadd.f32 %v1892_v41, %v1879_v26  ;;  %v1882_v27 = vadd.f32 %v3551_v40, %v1881_v46  ;;  %v3443_v41 = vld [vmem:[%s4582_s15 + $0x24] sm:$0xf]  ;;  %v3293_v46 = vor.u32 %v3444_v52, %v3292_v51 }
 0x817   : > { %v1898_v54 = vmul.f32 0.7978846, %v1895_v53  ;;  %v1887_v55 = vmul.f32 %v1882_v27, %v1882_v27  ;;  %v3623_v56 = vpop.eup %3622  ;;  %v3294_v53 = vld [vmem:[%s4582_s15 + $0x28] sm:$0xf0]  ;;  %2150 = vmatpush.bf16.msrb.mxu2 %v3293_v46  ;;  %v2093_v46 = vld [vmem:[%s4585_s12] sm:$0x3] }
 0x818   : > { %v1903_v57 = vadd.f32 1.0, %v3623_v56  ;;  %v3441_v56 = vld [vmem:[%s4582_s15 + $0x14] sm:$0xf] }
 0x819   : > { %3624 = vtanh.f32 %v1898_v54  ;;  %v1890_v45 = vmul.f32 %v1887_v55, %v1882_v27  ;;  %v3284_v54 = vld [vmem:[%s4582_s15 + $0x10] sm:$0xf]  ;;  %v3442_v55 = vld [vmem:[%s4582_s15 + $0x14] sm:$0xf0] }
 0x81a   : > { %v1906_v61 = vmul.f32 0.5, %v1903_v57 }
 0x81b   : > { %v1893_v50 = vmul.f32 0.044715, %v1890_v45  ;;  %v3285_v45 = vor.u32 %v3442_v55, %v3284_v54  ;;  %v2095_v54 = vperm.slane %v2093_v46, 0 }
 0x81c   : > { %v1883_v58 = vpop.f32.mrf.mxu0  ;;  %v1909_v2 = vmul.f32 %v1906_v61, %v1877_v43  ;;  %v3439_v61 = vld [vmem:[%s4582_s15 + $0x4] sm:$0xf] }
 0x81d   : > { %v1896_v59 = vadd.f32 %v1893_v50, %v1882_v27  ;;  %v3286_v50 = vld [vmem:[%s4582_s15 + $0x18] sm:$0xf0]  ;;  %2151 = vmatpush.bf16.msrb.mxu2 %v3285_v45 }
 0x81e   : > { %v3289_v58 = vor.u32 %v3441_v56, %v3286_v50 }
 0x81f   : > { %v3625_v60 = vpop.eup %3624  ;;  %v1899_v38 = vmul.f32 0.7978846, %v1896_v59 }
 0x820   : > { %v1904_v63 = vadd.f32 1.0, %v3625_v60  ;;  %v3276_v60 = vld [vmem:[%s4582_s15] sm:$0xf] }
 0x821   : > { %3626 = vtanh.f32 %v1899_v38  ;;  %v3440_v38 = vld [vmem:[%s4582_s15 + $0x4] sm:$0xf0] }
 0x822   : > { %v1907_v0 = vmul.f32 0.5, %v1904_v63 }
 0x824   : > { %v1910_v1 = vmul.f32 %v1907_v0, %v1879_v26  ;;  %v3302_v26 = vld [vmem:[%s4582_s15 + $0x38] sm:$0xf0]  ;;  %v3277_v0 = vor.u32 %v3440_v38, %v3276_v60 }
 0x825   : > { %v3305_v49 = vor.u32 %v3445_v33, %v3302_v26 }
 0x826   : > { %v1912_v3 = vpack.c.bf16 %v1910_v1, %v1909_v2  ;;  %v3278_v2 = vld [vmem:[%s4582_s15 + $0x8] sm:$0xf0]  ;;  %2152 = vmatpush.bf16.msrb.mxu2 %v3277_v0 }
 0x827   : > { %v3627_v4 = vpop.eup %3626  ;;  %2167 = vmatpush.bf16.msrb.mxu3 %v3305_v49  ;;  %v3281_v1 = vor.u32 %v3439_v61, %v3278_v2 }
 0x828   : > { %1990 = vmatmul.bf16.vlgmr.msrb.gmra.mxu1 %v1912_v3  ;;  %v1905_v5 = vadd.f32 1.0, %v3627_v4 }
 0x82a   : > { %v1908_v6 = vmul.f32 0.5, %v1905_v5 }
 0x82c   : > { %v1911_v62 = vmul.f32 %v1908_v6, %v1882_v27  ;;  %v3297_v27 = vor.u32 %v3443_v41, %v3294_v53 }
 0x82e   : > { %v1913_v7 = vpack.c.bf16 %v1911_v62, %v1911_v62  ;;  %2168 = vmatpush.bf16.msrb.mxu3 %v3297_v27 }
 0x832   : > { %2169 = vmatpush.bf16.msrb.mxu3 %v3289_v58 }
 0x836   : > { %2170 = vmatpush.bf16.msrb.mxu3 %v3281_v1 }
 0x838   : > { %1995 = vmatmul.bf16.gmra.mxu1 %v1913_v7 }
 0x8a5   : > { %v1991_v11 = vpop.f32.mrf.mxu1 }
 0x8a6   : > { %v1992_v13 = vadd.f32 %v3552_v9, %v1991_v11 }
 0x8a8   : > { %v4248_v17 = vadd.f32 %v1992_v13, %v4198_v15 }
 0x8aa   : > { %v2005_v18 = vsel %vm1011_vm1, %v4248_v17, 0.0 }
 0x8ab   : > { %2006 = vadd.xlane.f32.xlu1 %v2005_v18 }
 0x8ad   : > { %v1993_v19 = vpop.f32.mrf.mxu1 }
 0x8ae   : > { %v1994_v24 = vadd.f32 %v3552_v9, %v1993_v19 }
 0x8b0   : > { %v4253_v22 = vadd.f32 %v1994_v24, %v4203_v21 }
 0x8b2   : > { %v2008_v29 = vsel %vm1011_vm1, %v4253_v22, 0.0 }
 0x8b3   : > { %2009 = vadd.xlane.f32.xlu0 %v2008_v29 }
 0x8b5   : > { %v1996_v8 = vpop.f32.mrf.mxu1 }
 0x8b6   : > { %v1997_v23 = vadd.f32 %v3552_v9, %v1996_v8 }
 0x8b8   : > { %v4258_v31 = vadd.f32 %v1997_v23, %v4208_v30 }
 0x8ba   : > { %v2011_v15 = vsel %vm1011_vm1, %v4258_v31, 0.0 }
 0x8bb   : > { %2012 = vadd.xlane.f32.xlu2 %v2011_v15 }
 0x8bd   : > { %v1998_v32 = vpop.f32.mrf.mxu1 }
 0x91e   : > { %v2007_v12 = vpop.xlane.xlu1 %2006 }
 0x91f   : > { %v2014_v10 = vmul.f32 %v2007_v12, %v3937_v25 }
 0x921   : > { %v4264_v21 = vsub.f32 %v4248_v17, %v2014_v10 }
 0x923   : > { %v2020_v34 = vmul.f32 %v4264_v21, %v4264_v21 }
 0x925   : > { %v2023_v35 = vsel %vm1011_vm1, %v2020_v34, 0.0  ;;  %v3553_v34 = vld [vmem:[%s4583_s18] ss:$0 sm:$0xff]  ;;  %s4594_s18 = sld [smem:[#allocation16_spill]] }
 0x926   : > { %v2010_v30 = vpop.xlane.xlu0 %2009  ;;  %2024 = vadd.xlane.f32.xlu1 %v2023_v35 }
 0x927   : > { %v2015_v16 = vmul.f32 %v2010_v30, %v3937_v25 }
 0x929   : > { %v4271_v36 = vsub.f32 %v4253_v22, %v2015_v16 }
 0x92b   : > { %v2021_v37 = vmul.f32 %v4271_v36, %v4271_v36 }
 0x92d   : > { %v2026_v39 = vsel %vm1011_vm1, %v2021_v37, 0.0 }
 0x92e   : > { %2027 = vadd.xlane.f32.xlu0 %v2026_v39  ;;  %v2013_v40 = vpop.xlane.xlu2 %2012 }
 0x92f   : > { %v2016_v14 = vmul.f32 %v2013_v40, %v3937_v25  ;;  %v3554_v40 = vld [vmem:[%s4584_s0] ss:$0 sm:$0xff]  ;;  %s956_s0 = scalar_lea.vmem %s3905_s20, %s4596_s23 }
 0x931   : > { %v4278_v42 = vsub.f32 %v4258_v31, %v2016_v14 }
 0x933   : > { %v2022_v43 = vmul.f32 %v4278_v42, %v4278_v42 }
 0x935   : > { %v2029_v44 = vsel %vm1011_vm1, %v2022_v43, 0.0 }
 0x936   : > { %2030 = vadd.xlane.f32.xlu2 %v2029_v44 }
 0x999   : > { %v2025_v57 = vpop.xlane.xlu1 %2024 }
 0x99a   : > { %v2032_v59 = vmul.f32 %v2025_v57, %v3937_v25 }
 0x99c   : > { %v2035_v63 = vadd.f32 1e-05, %v2032_v59 }
 0x99e   : > { %3628 = vrsqrt.f32 %v2035_v63  ;;  %vm2044_vm3 = vweird.f32 %v2035_v63 }
 0x9a1   : > { %v2028_v3 = vpop.xlane.xlu0 %2027 }
 0x9a2   : > { %v2033_v4 = vmul.f32 %v2028_v3, %v3937_v25 }
 0x9a4   : > { %v3629_v5 = vpop.eup %3628  ;;  %v2036_v6 = vadd.f32 1e-05, %v2033_v4 }
 0x9a5   : > { %v2039_v62 = vmul.f32 %v3629_v5, %v2035_v63  ;;  %vm2045_vm13 = vweird.f32 %v3629_v5 }
 0x9a6   : > { %3630 = vrsqrt.f32 %v2036_v6  ;;  %vm2046_vm4 = vmor %vm2044_vm3, %vm2045_vm13  ;;  %vm2054_vm6 = vweird.f32 %v2036_v6 }
 0x9a7   : > { %v2040_v7 = vmul.f32 %v3629_v5, %v2039_v62 }
 0x9a9   : > { %v2041_v9 = vmul.f32 0.5, %v2040_v7  ;;  %v2031_v11 = vpop.xlane.xlu2 %2030 }
 0x9aa   : > { %v2034_v13 = vmul.f32 %v2031_v11, %v3937_v25 }
 0x9ab   : > { %v2042_v18 = vsub.f32 1.5, %v2041_v9 }
 0x9ac   : > { %v3631_v19 = vpop.eup %3630  ;;  %v2037_v24 = vadd.f32 1e-05, %v2034_v13 }
 0x9ad   : > { %v2043_v29 = vmul.f32 %v3629_v5, %v2042_v18  ;;  %v2049_v8 = vmul.f32 %v3631_v19, %v2036_v6  ;;  %vm2055_vm5 = vweird.f32 %v3631_v19 }
 0x9ae   : > { %3632 = vrsqrt.f32 %v2037_v24  ;;  %vm2056_vm7 = vmor %vm2054_vm6, %vm2055_vm5  ;;  %vm2064_vm9 = vweird.f32 %v2037_v24  ;;  %vm2983_vm5 = vcmask 516096  }
 0x9af   : > { %v2050_v23 = vmul.f32 %v3631_v19, %v2049_v8  ;;  %v2047_v15 = vsel %vm2046_vm4, %v3629_v5, %v2043_v29 }
 0x9b0   : > { %v2068_v35 = vmul.f32 %v2047_v15, %v4264_v21 }
 0x9b1   : > { %v2051_v32 = vmul.f32 0.5, %v2050_v23 }
 0x9b2   : > { %v2074_v14 = vmul.f32 %v3553_v34, %v2068_v35 }
 0x9b3   : > { %v2052_v12 = vsub.f32 1.5, %v2051_v32 }
 0x9b4   : > { %v3633_v10 = vpop.eup %3632  ;;  %v2080_v33 = vadd.f32 %v3554_v40, %v2074_v14 }
 0x9b5   : > { %v2053_v30 = vmul.f32 %v3631_v19, %v2052_v12  ;;  %v2059_v16 = vmul.f32 %v3633_v10, %v2037_v24  ;;  %vm2065_vm8 = vweird.f32 %v3633_v10 }
 0x9b6   : > { %vm2066_vm10 = vmor %vm2064_vm9, %vm2065_vm8  ;;  %vm3058_vm9 = vcmask 0  }
 0x9b7   : > { %v2057_v37 = vsel %vm2056_vm7, %v3631_v19, %v2053_v30  ;;  %v2060_v39 = vmul.f32 %v3633_v10, %v2059_v16 }
 0x9b8   : > { %v2069_v43 = vmul.f32 %v2057_v37, %v4271_v36 }
 0x9b9   : > { %v2061_v44 = vmul.f32 0.5, %v2060_v39 }
 0x9ba   : > { %v2075_v20 = vmul.f32 %v3553_v34, %v2069_v43 }
 0x9bb   : > { %v2062_v28 = vsub.f32 1.5, %v2061_v44 }
 0x9bc   : > { %v2081_v47 = vadd.f32 %v3554_v40, %v2075_v20 }
 0x9bd   : > { %v2063_v26 = vmul.f32 %v3633_v10, %v2062_v28 }
 0x9be   : > { %v2083_v21 = vpack.c.bf16 %v2081_v47, %v2080_v33 }
 0x9bf   : > { %v2067_v49 = vsel %vm2066_vm10, %v3633_v10, %v2063_v26 }
 0x9c0   : > { %3306 = vmatmul.msk.bf16.vlgmr.msrb.gmra.mxu2 %vm1011_vm1, %v2083_v21  ;;  %3308 = vmatmul.msk.bf16.vlgmr.msrb.gmra.mxu3 %vm1011_vm1, %v2083_v21  ;;  %v2070_v51 = vmul.f32 %v2067_v49, %v4278_v42  ;;  %v2096_v42 = vperm.slane %v2093_v46, 1 }
 0x9c2   : > { %v2076_v52 = vmul.f32 %v3553_v34, %v2070_v51 }
 0x9c4   : > { %v2082_v36 = vadd.f32 %v3554_v40, %v2076_v52 }
 0x9c6   : > { %v2084_v41 = vpack.c.bf16 %v2082_v36, %v2082_v36 }
 0x9d0   : > { %3307 = vmatmul.msk.bf16.gmra.mxu2 %vm1011_vm1, %v2084_v41  ;;  %3309 = vmatmul.msk.bf16.gmra.mxu3 %vm1011_vm1, %v2084_v41 }
 0xa43   : > { %v2154_v53 = vpop.f32.mrf.mxu2  ;;  %v2172_v27 = vpop.f32.mrf.mxu3 }
 0xa44   : > { %v2155_v55 = vadd.f32 %v2154_v53, %v2095_v54  ;;  %v2173_v3 = vadd.f32 %v2172_v27, %v2096_v42 }
 0xa46   : > { %v2181_v50 = vpack.c.bf16 %v2155_v55, %v2155_v55  ;;  %v2184_v9 = vpack.c.bf16 %v2173_v3, %v2173_v3 }
 0xa48   : > { %v2190_v59 = vunpack.c.l.b16 %v2181_v50  ;;  %v2267_v8 = vunpack.c.l.b16 %v2184_v9 }
 0xa4b   : > { %v2156_v56 = vpop.f32.mrf.mxu2  ;;  %v2174_v45 = vpop.f32.mrf.mxu3 }
 0xa4c   : > { %v2157_v57 = vadd.f32 %v2156_v56, %v2095_v54  ;;  %v2175_v61 = vadd.f32 %v2174_v45, %v2096_v42 }
 0xa4e   : > { %v2182_v58 = vpack.c.bf16 %v2157_v57, %v2157_v57  ;;  %v2185_v6 = vpack.c.bf16 %v2175_v61, %v2175_v61 }
 0xa50   : > { %v2191_v60 = vunpack.c.l.b16 %v2182_v58  ;;  %v2268_v18 = vunpack.c.l.b16 %v2185_v6 }
 0xa52   : > { %v2193_v38 = vpack.c.b16 %v2191_v60, %v2190_v59  ;;  %v4320_v23 = vpack.c.b16 %v2268_v18, %v2267_v8 }
 0xa53   : > { %v2159_v63 = vpop.f32.mrf.mxu2  ;;  %v2177_v0 = vpop.f32.mrf.mxu3 }
 0xa54   : > { %v2160_v2 = vadd.f32 %v2159_v63, %v2095_v54  ;;  %v2178_v1 = vadd.f32 %v2177_v0, %v2096_v42  ;;  %2304 = vrot.lane.b32.xlu0 %v2193_v38, %s3738_s1 }
 0xa56   : > { %v2183_v4 = vpack.c.bf16 %v2160_v2, %v2160_v2  ;;  %v2186_v5 = vpack.c.bf16 %v2178_v1, %v2178_v1 }
 0xa58   : > { %v2192_v62 = vunpack.c.l.b16 %v2183_v4  ;;  %v2269_v7 = vunpack.c.l.b16 %v2186_v5 }
 0xa5a   : > { %v2194_v11 = vpack.c.b16 %v2192_v62, %v2192_v62  ;;  %v4313_v13 = vpack.c.b16 %v2269_v7, %v2269_v7 }
 0xa5b   : > { %v2161_v19 = vpop.f32.mrf.mxu2  ;;  %v2179_v24 = vpop.f32.mrf.mxu3 }
 0xa5c   : > { %2300 = vrot.lane.b32.xlu0 %v2193_v38, %s3737_s28  ;;  %2197 = vrot.lane.b32.xlu2 %v2194_v11, %s3736_s26  ;;  %v2280_v29 = vsel %vm1294_vm12, %v4313_v13, 0 }
 0xa5d   : > { %2306 = vrot.lane.b32.xlu1 %v2194_v11, %s3738_s1  ;;  %2288 = vmatpush.bf16.msra.mxu1 %v2280_v29 }
 0xa61   : > { %2289 = vmatpush.bf16.msra.mxu1 %v4320_v23 }
 0xa64   : > { %2516 = vrot.lane.b32.xlu0 %v2194_v11, %s3739_s2  ;;  %2302 = vrot.lane.b32.xlu2 %v2194_v11, %s3737_s28 }
 0xa65   : > { %2195 = vrot.lane.b32.xlu1 %v2193_v38, %s3736_s26  ;;  %s4586_s26 = sld [smem:[#allocation8_spill]] }
 0xa6c   : > { %2510 = vrot.lane.b32.xlu0 %v2193_v38, %s3742_s11  ;;  %2411 = vrot.lane.b32.xlu2 %v2194_v11, %s3740_s7 }
 0xa6d   : > { %2514 = vrot.lane.b32.xlu1 %v2193_v38, %s3739_s2 }
 0xa74   : > { %2512 = vrot.lane.b32.xlu0 %v2194_v11, %s3742_s11  ;;  %2405 = vrot.lane.b32.xlu2 %v2193_v38, %s3741_s10 }
 0xa75   : > { %2409 = vrot.lane.b32.xlu1 %v2193_v38, %s3740_s7 }
 0xa7d   : > { %2407 = vrot.lane.b32.xlu1 %v2194_v11, %s3741_s10 }
 0xab6   : > { %v2198_v15 = vpop.permute.xlu2 %2197 }
 0xab7   : > { %v2209_v32 = vsel %vm980_vm0, %v2198_v15, 0 }
 0xab8   : > { %2217 = vmatpush.bf16.xpose.msra.mxu0 %v2209_v32 }
 0xabe   : > { %v2303_v10 = vpop.permute.xlu2 %2302 }
 0xac6   : > { %v2305_v12 = vpop.permute.xlu0 %2304  ;;  %v2412_v16 = vpop.permute.xlu2 %2411 }
 0xac7   : > { %v2315_v14 = vsel %vm980_vm0, %v2305_v12, 0  ;;  %v2423_v44 = vsel %vm980_vm0, %v2412_v16, 0 }
 0xace   : > { %v2301_v34 = vpop.permute.xlu0 %2300  ;;  %v2406_v26 = vpop.permute.xlu2 %2405 }
 0xacf   : > { %v2307_v35 = vpop.permute.xlu1 %2306 }
 0xad0   : > { %v2318_v30 = vsel %vm980_vm0, %v2307_v35, 0 }
 0xad1   : > { %2326 = vmatpush.bf16.xpose.msra.mxu2 %v2318_v30 }
 0xad6   : > { %v2517_v37 = vpop.permute.xlu0 %2516 }
 0xad7   : > { %v2528_v39 = vsel %vm980_vm0, %v2517_v37, 0  ;;  %v2196_v40 = vpop.permute.xlu1 %2195 }
 0xad8   : > { %v2206_v43 = vsel %vm980_vm0, %v2196_v40, 0 }
 0xad9   : > { %2218 = vmatpush.bf16.xpose.msra.mxu0 %v2206_v43  ;;  %2327 = vmatpush.bf16.xpose.msra.mxu2 %v2315_v14 }
 0xade   : > { %v2511_v21 = vpop.permute.xlu0 %2510 }
 0xadf   : > { %v2515_v20 = vpop.permute.xlu1 %2514 }
 0xae0   : > { %v2525_v28 = vsel %vm980_vm0, %v2515_v20, 0  ;;  %3310 = vmatmul.msk.bf16.vlgmr.msra.gmra.mxu0 %vm980_vm0, %v2193_v38  ;;  %3314 = vmatmul.msk.bf16.vlgmr.msra.gmra.mxu2 %vm980_vm0, %v2301_v34 }
 0xae1   : > { %2431 = vmatpush.bf16.xpose.msrb.mxu0 %v2423_v44  ;;  %2536 = vmatpush.bf16.xpose.msrb.mxu2 %v2528_v39 }
 0xae6   : > { %v2513_v49 = vpop.permute.xlu0 %2512 }
 0xae7   : > { %v2410_v33 = vpop.permute.xlu1 %2409 }
 0xae8   : > { %v2420_v47 = vsel %vm980_vm0, %v2410_v33, 0 }
 0xae9   : > { %2537 = vmatpush.bf16.xpose.msrb.mxu2 %v2525_v28  ;;  %2432 = vmatpush.bf16.xpose.msrb.mxu0 %v2420_v47 }
 0xaef   : > { %v2408_v51 = vpop.permute.xlu1 %2407 }
 0xaf0   : > { %3311 = vmatmul.msk.bf16.gmra.mxu0 %vm980_vm0, %v2194_v11  ;;  %3315 = vmatmul.msk.bf16.gmra.mxu2 %vm980_vm0, %v2303_v10 }
 0xb00   : > { %3318 = vmatmul.msk.bf16.vlgmr.msrb.gmra.mxu0 %vm980_vm0, %v2406_v26  ;;  %3322 = vmatmul.msk.bf16.vlgmr.msrb.gmra.mxu2 %vm980_vm0, %v2511_v21 }
 0xb10   : > { %3319 = vmatmul.msk.bf16.gmra.mxu0 %vm980_vm0, %v2408_v51  ;;  %3323 = vmatmul.msk.bf16.gmra.mxu2 %vm980_vm0, %v2513_v49 }
 0xb5d   : > { %v2220_v52 = vpop.f32.mrf.mxu0 }
 0xb5e   : > { %v2221_v36 = vadd.f32 %v2220_v52, %v4046_v48 }
 0xb60   : > { %v2229_v41 = vsel %vm1243_vm14, %v2221_v36, -inf }
 0xb61   : > { %2230 = vmax.xlane.f32.xlu1 %v2229_v41 }
 0xb63   : > { %v2329_v46 = vpop.f32.mrf.mxu2 }
 0xb64   : > { %v2330_v53 = vadd.f32 %v2329_v46, %v4046_v48 }
 0xb65   : > { %v2222_v27 = vpop.f32.mrf.mxu0 }
 0xb66   : > { %v2338_v54 = vsel %vm1243_vm14, %v2330_v53, -inf  ;;  %v2223_v55 = vadd.f32 %v2222_v27, %v4046_v48 }
 0xb67   : > { %2339 = vmax.xlane.f32.xlu2 %v2338_v54 }
 0xb68   : > { %v2232_v59 = vsel %vm1243_vm14, %v2223_v55, -inf }
 0xb6b   : > { %v2331_v56 = vpop.f32.mrf.mxu2 }
 0xb6c   : > { %v4355_v45 = vadd.f32 %v2331_v56, %v4046_v48 }
 0xb6d   : > { %v2225_v50 = vpop.f32.mrf.mxu0 }
 0xb6e   : > { %v2226_v57 = vadd.f32 %v2225_v50, %v4046_v48  ;;  %v2341_v58 = vsel %vm1243_vm14, %v4355_v45, -inf }
 0xb6f   : > { %2342 = vmax.xlane.f32.xlu0 %v2341_v58  ;;  %2233 = vmax.xlane.f32.xlu2 %v2232_v59 }
 0xb70   : > { %v2235_v60 = vsel %vm1243_vm14, %v2226_v57, -inf }
 0xb71   : > { %2236 = vmax.xlane.f32.xlu1 %v2235_v60 }
 0xb73   : > { %v2334_v42 = vpop.f32.mrf.mxu2 }
 0xb74   : > { %v4382_v24 = vadd.f32 %v2334_v42, %v4046_v48 }
 0xb75   : > { %v2227_v38 = vpop.f32.mrf.mxu0 }
 0xb76   : > { %v2344_v8 = vsel %vm1243_vm14, %v4382_v24, -inf }
 0xb7b   : > { %v2336_v61 = vpop.f32.mrf.mxu2 }
 0xb7d   : > { %v2434_v63 = vpop.f32.mrf.mxu0 }
 0xb7e   : > { %v4363_v0 = vadd.f32 %v2434_v63, %v4046_v48 }
 0xb80   : > { %v2443_v2 = vsel %vm1243_vm14, %v4363_v0, -inf }
 0xb81   : > { %2444 = vmax.xlane.f32.xlu1 %v2443_v2 }
 0xb83   : > { %2373 = vrot.lane.b32.xlu0 %v4320_v23, %s3737_s28  ;;  %v2539_v1 = vpop.f32.mrf.mxu2 }
 0xb84   : > { %v4385_v29 = vadd.f32 %v2539_v1, %v4046_v48 }
 0xb85   : > { %v2436_v3 = vpop.f32.mrf.mxu0 }
 0xb86   : > { %v2548_v15 = vsel %vm1243_vm14, %v4385_v29, -inf  ;;  %v4395_v12 = vadd.f32 %v2436_v3, %v4046_v48 }
 0xb87   : > { %2375 = vrot.lane.b32.xlu2 %v4313_v13, %s3737_s28  ;;  %s4587_s28 = sld [smem:[#allocation9_spill]] }
 0xb88   : > { %v2446_v34 = vsel %vm1243_vm14, %v4395_v12, -inf }
 0xb8b   : > { %v2541_v4 = vpop.f32.mrf.mxu2 }
 0xb8c   : > { %v4392_v32 = vadd.f32 %v2541_v4, %v4046_v48 }
 0xb8d   : > { %v2439_v5 = vpop.f32.mrf.mxu0 }
 0xb8e   : > { %v4372_v6 = vadd.f32 %v2439_v5, %v4046_v48  ;;  %v2551_v10 = vsel %vm1243_vm14, %v4392_v32, -inf }
 0xb90   : > { %v2449_v62 = vsel %vm1243_vm14, %v4372_v6, -inf }
 0xb91   : > { %2450 = vmax.xlane.f32.xlu1 %v2449_v62 }
 0xb93   : > { %v2544_v7 = vpop.f32.mrf.mxu2 }
 0xb94   : > { %v4377_v9 = vadd.f32 %v2544_v7, %v4046_v48 }
 0xb95   : > { %v2441_v11 = vpop.f32.mrf.mxu0 }
 0xb96   : > { %v2554_v18 = vsel %vm1243_vm14, %v4377_v9, -inf }
 0xb99   : > { %2555 = vmax.xlane.f32.xlu1 %v2554_v18 }
 0xb9b   : > { %v2546_v19 = vpop.f32.mrf.mxu2 }
 0xbad   : > { %2345 = vmax.xlane.f32.xlu0 %v2344_v8 }
 0xbb0   : > { %2549 = vmax.xlane.f32.xlu2 %v2548_v15 }
 0xbb5   : > { %2552 = vmax.xlane.f32.xlu0 %v2551_v10 }
 0xbb8   : > { %2447 = vmax.xlane.f32.xlu2 %v2446_v34 }
 0xbd4   : > { %v2231_v35 = vpop.xlane.xlu1 %2230 }
 0xbd5   : > { %v2238_v30 = vsub.f32 %v2221_v36, %v2231_v35 }
 0xbd7   : > { %v2241_v16 = vmul.f32 1.442695, %v2238_v30 }
 0xbd9   : > { %3634 = vpow2.f32 %v2241_v16 }
 0xbda   : > { %v2340_v37 = vpop.xlane.xlu2 %2339 }
 0xbdb   : > { %v2347_v39 = vsub.f32 %v2330_v53, %v2340_v37 }
 0xbdd   : > { %v2350_v40 = vmul.f32 1.442695, %v2347_v39 }
 0xbdf   : > { %v4401_v14 = vpop.eup %3634  ;;  %3636 = vpow2.f32 %v2350_v40 }
 0xbe0   : > { %v2247_v48 = vsel %vm1243_vm14, %v4401_v14, 0.0 }
 0xbe1   : > { %2248 = vadd.xlane.f32.xlu0 %v2247_v48 }
 0xbe2   : > { %v2234_v43 = vpop.xlane.xlu2 %2233  ;;  %v2343_v44 = vpop.xlane.xlu0 %2342 }
 0xbe3   : > { %v2239_v20 = vsub.f32 %v2223_v55, %v2234_v43  ;;  %v2348_v21 = vsub.f32 %v4355_v45, %v2343_v44 }
 0xbe4   : > { %v2237_v28 = vpop.xlane.xlu1 %2236 }
 0xbe5   : > { %v4405_v33 = vpop.eup %3636  ;;  %v2243_v47 = vmul.f32 1.442695, %v2239_v20  ;;  %v2240_v26 = vsub.f32 %v2226_v57, %v2237_v28  ;;  %v2352_v52 = vmul.f32 1.442695, %v2348_v21 }
 0xbe6   : > { %v2356_v51 = vsel %vm1243_vm14, %v4405_v33, 0.0 }
 0xbe7   : > { %v2245_v49 = vmul.f32 1.442695, %v2240_v26  ;;  %3638 = vpow2.f32 %v2243_v47 }
 0xbe9   : > { %3640 = vpow2.f32 %v2245_v49  ;;  %2357 = vadd.xlane.f32.xlu0 %v2356_v51 }
 0xbea   : > { %v2376_v36 = vpop.permute.xlu2 %2375  ;;  %3642 = vpow2.f32 %v2352_v52 }
 0xbeb   : > { %v2385_v41 = vsel %vm1294_vm12, %v2376_v36, 0 }
 0xbec   : > { %2393 = vmatpush.bf16.msra.mxu3 %v2385_v41 }
 0xbed   : > { %v4411_v46 = vpop.eup %3638 }
 0xbee   : > { %v2250_v27 = vsel %vm1243_vm14, %v4411_v46, 0.0 }
 0xbef   : > { %v4413_v53 = vpop.eup %3640  ;;  %2251 = vadd.xlane.f32.xlu1 %v2250_v27 }
 0xbf0   : > { %v2253_v54 = vsel %vm1243_vm14, %v4413_v53, 0.0  ;;  %v4419_v55 = vpop.eup %3642 }
 0xbf1   : > { %2254 = vadd.xlane.f32.xlu2 %v2253_v54  ;;  %v2359_v58 = vsel %vm1243_vm14, %v4419_v55, 0.0 }
 0xbf4   : > { %v2445_v56 = vpop.xlane.xlu1 %2444 }
 0xbf5   : > { %v2452_v45 = vsub.f32 %v4363_v0, %v2445_v56  ;;  %v2374_v50 = vpop.permute.xlu0 %2373 }
 0xbf6   : > { %2394 = vmatpush.bf16.msra.mxu3 %v2374_v50 }
 0xbf7   : > { %v2455_v57 = vmul.f32 1.442695, %v2452_v45  ;;  %2360 = vadd.xlane.f32.xlu1 %v2359_v58 }
 0xbf9   : > { %3644 = vpow2.f32 %v2455_v57 }
 0xbff   : > { %v4424_v59 = vpop.eup %3644 }
 0xc00   : > { %v2461_v60 = vsel %vm1243_vm14, %v4424_v59, 0.0 }
 0xc01   : > { %2462 = vadd.xlane.f32.xlu2 %v2461_v60 }
 0xc04   : > { %v2451_v61 = vpop.xlane.xlu1 %2450 }
 0xc05   : > { %v2454_v10 = vsub.f32 %v4372_v6, %v2451_v61 }
 0xc07   : > { %v2459_v16 = vmul.f32 1.442695, %v2454_v10 }
 0xc0c   : > { %v2556_v5 = vpop.xlane.xlu1 %2555 }
 0xc0d   : > { %v2559_v11 = vsub.f32 %v4377_v9, %v2556_v5 }
 0xc0f   : > { %v2564_v18 = vmul.f32 1.442695, %v2559_v11 }
 0xc19   : > { %2583 = vrot.lane.b32.xlu2 %v4320_v23, %s3742_s11 }
 0xc20   : > { %v2346_v42 = vpop.xlane.xlu0 %2345 }
 0xc21   : > { %v2349_v38 = vsub.f32 %v4382_v24, %v2346_v42 }
 0xc23   : > { %v2354_v63 = vmul.f32 1.442695, %v2349_v38  ;;  %v2550_v0 = vpop.xlane.xlu2 %2549 }
 0xc24   : > { %v2557_v2 = vsub.f32 %v4385_v29, %v2550_v0 }
 0xc25   : > { %3646 = vpow2.f32 %v2354_v63 }
 0xc26   : > { %v2560_v1 = vmul.f32 1.442695, %v2557_v2 }
 0xc28   : > { %3648 = vpow2.f32 %v2560_v1  ;;  %v2553_v29 = vpop.xlane.xlu0 %2552 }
 0xc29   : > { %3650 = vpow2.f32 %v2564_v18  ;;  %v2558_v8 = vsub.f32 %v4392_v32, %v2553_v29 }
 0xc2b   : > { %v4432_v3 = vpop.eup %3646  ;;  %v2562_v15 = vmul.f32 1.442695, %v2558_v8  ;;  %v2448_v34 = vpop.xlane.xlu2 %2447 }
 0xc2c   : > { %v2362_v4 = vsel %vm1243_vm14, %v4432_v3, 0.0  ;;  %v2453_v30 = vsub.f32 %v4395_v12, %v2448_v34 }
 0xc2d   : > { %2363 = vadd.xlane.f32.xlu1 %v2362_v4 }
 0xc2e   : > { %v4436_v62 = vpop.eup %3648  ;;  %v2457_v40 = vmul.f32 1.442695, %v2453_v30 }
 0xc2f   : > { %v2566_v7 = vsel %vm1243_vm14, %v4436_v62, 0.0  ;;  %v4441_v19 = vpop.eup %3650 }
 0xc30   : > { %2567 = vadd.xlane.f32.xlu0 %v2566_v7  ;;  %v2572_v24 = vsel %vm1243_vm14, %v4441_v19, 0.0 }
 0xc42   : > { %2573 = vadd.xlane.f32.xlu2 %v2572_v24 }
 0xc44   : > { %2480 = vrot.lane.b32.xlu0 %v4313_v13, %s3741_s10 }
 0xc46   : > { %2585 = vrot.lane.b32.xlu1 %v4313_v13, %s3742_s11  ;;  %s4592_s11 = sld [smem:[#allocation13_spill]] }
 0xc4c   : > { %2478 = vrot.lane.b32.xlu0 %v4320_v23, %s3741_s10  ;;  %s4591_s10 = sld [smem:[#allocation14_spill]] }
 0xc54   : > { %v2249_v9 = vpop.xlane.xlu0 %2248 }
 0xc55   : > { %3652 = vrcp.f32 %v2249_v9 }
 0xc5b   : > { %v3653_v13 = vpop.eup %3652 }
 0xc5c   : > { %v2358_v37 = vpop.xlane.xlu0 %2357  ;;  %v2259_v23 = vmul.f32 %v3653_v13, %v4401_v14 }
 0xc62   : > { %v2252_v35 = vpop.xlane.xlu1 %2251 }
 0xc63   : > { %3654 = vrcp.f32 %v2252_v35 }
 0xc64   : > { %3656 = vpow2.f32 %v2562_v15  ;;  %v2255_v44 = vpop.xlane.xlu2 %2254 }
 0xc65   : > { %3658 = vrcp.f32 %v2358_v37 }
 0xc66   : > { %3660 = vpow2.f32 %v2459_v16 }
 0xc69   : > { %v3655_v39 = vpop.eup %3654 }
 0xc6a   : > { %v2260_v32 = vmul.f32 %v3655_v39, %v4411_v46  ;;  %v2361_v48 = vpop.xlane.xlu1 %2360  ;;  %v3657_v43 = vpop.eup %3656 }
 0xc6b   : > { %3662 = vrcp.f32 %v2361_v48  ;;  %v2569_v12 = vsel %vm1243_vm14, %v3657_v43, 0.0  ;;  %v3659_v20 = vpop.eup %3658 }
 0xc6c   : > { %v2262_v6 = vpack.c.bf16 %v2260_v32, %v2259_v23  ;;  %3664 = vpow2.f32 %v2457_v40  ;;  %v4458_v28 = vpop.eup %3660  ;;  %v2368_v14 = vmul.f32 %v3659_v20, %v4405_v33 }
 0xc6d   : > { %3666 = vrcp.f32 %v2255_v44  ;;  %v2467_v51 = vsel %vm1243_vm14, %v4458_v28, 0.0 }
 0xc6e   : > { %3312 = vmatmul.msk.bf16.vlgmr.msra.gmra.mxu1 %vm1243_vm14, %v2262_v6 }
 0xc70   : > { %2570 = vadd.xlane.f32.xlu1 %v2569_v12 }
 0xc71   : > { %v3663_v47 = vpop.eup %3662 }
 0xc72   : > { %v2369_v26 = vmul.f32 %v3663_v47, %v4419_v55  ;;  %v3665_v21 = vpop.eup %3664 }
 0xc73   : > { %v3667_v52 = vpop.eup %3666  ;;  %v2464_v36 = vsel %vm1243_vm14, %v3665_v21, 0.0 }
 0xc74   : > { %v2371_v49 = vpack.c.bf16 %v2369_v26, %v2368_v14  ;;  %v2261_v41 = vmul.f32 %v3667_v52, %v4413_v53  ;;  %v2463_v45 = vpop.xlane.xlu2 %2462  ;;  %v3450_v14 = vld [vmem:[%s4586_s26 + $0x18] sm:$0xff]  ;;  %v3449_v26 = vld [vmem:[%s4586_s26 + $0x10] sm:$0xff] }
 0xc75   : > { %2708 = vmatpush.bf16.msra.mxu0 %v3450_v14 }
 0xc76   : > { %2468 = vadd.xlane.f32.xlu0 %v2467_v51  ;;  %3316 = vmatmul.msk.bf16.vlgmr.msra.gmra.mxu3 %vm1243_vm14, %v2371_v49  ;;  %v2263_v46 = vpack.c.bf16 %v2261_v41, %v2261_v41  ;;  %v3447_v49 = vld [vmem:[%s4586_s26] sm:$0xff] }
 0xc78   : > { %2465 = vadd.xlane.f32.xlu1 %v2464_v36 }
 0xc79   : > { %2709 = vmatpush.bf16.msra.mxu0 %v3449_v26 }
 0xc7c   : > { %v2584_v60 = vpop.permute.xlu2 %2583 }
 0xc7e   : > { %3313 = vmatmul.msk.bf16.gmra.mxu1 %vm1243_vm14, %v2263_v46 }
 0xca0   : > { %v2364_v33 = vpop.xlane.xlu1 %2363 }
 0xca1   : > { %3668 = vrcp.f32 %v2364_v33 }
 0xca3   : > { %v2568_v56 = vpop.xlane.xlu0 %2567 }
 0xca4   : > { %3670 = vrcp.f32 %v2568_v56 }
 0xca7   : > { %v3669_v27 = vpop.eup %3668 }
 0xca8   : > { %v2370_v54 = vmul.f32 %v3669_v27, %v4432_v3 }
 0xcaa   : > { %v2372_v55 = vpack.c.bf16 %v2370_v54, %v2370_v54  ;;  %v3671_v61 = vpop.eup %3670 }
 0xcab   : > { %v2578_v0 = vmul.f32 %v3671_v61, %v4436_v62 }
 0xcac   : > { %3317 = vmatmul.msk.bf16.gmra.mxu3 %vm1243_vm14, %v2372_v55 }
 0xcb5   : > { %v2574_v4 = vpop.xlane.xlu2 %2573 }
 0xcb6   : > { %v2481_v50 = vpop.permute.xlu0 %2480 }
 0xcb7   : > { %v2490_v57 = vsel %vm1294_vm12, %v2481_v50, 0 }
 0xcb8   : > { %2498 = vmatpush.bf16.msrb.mxu1 %v2490_v57  ;;  %v2586_v58 = vpop.permute.xlu1 %2585 }
 0xcb9   : > { %v2595_v53 = vsel %vm1294_vm12, %v2586_v58, 0 }
 0xcba   : > { %2603 = vmatpush.bf16.msrb.mxu3 %v2595_v53 }
 0xcbe   : > { %v2479_v42 = vpop.permute.xlu0 %2478  ;;  %2604 = vmatpush.bf16.msrb.mxu3 %v2584_v60 }
 0xcbf   : > { %2499 = vmatpush.bf16.msrb.mxu1 %v2479_v42 }
 0xce3   : > { %v2571_v38 = vpop.xlane.xlu1 %2570 }
 0xce4   : > { %3672 = vrcp.f32 %v2571_v38 }
 0xce5   : > { %3674 = vrcp.f32 %v2463_v45 }
 0xce9   : > { %v2469_v9 = vpop.xlane.xlu0 %2468 }
 0xcea   : > { %v3673_v63 = vpop.eup %3672 }
 0xceb   : > { %v2579_v2 = vmul.f32 %v3673_v63, %v3657_v43  ;;  %v2466_v1 = vpop.xlane.xlu1 %2465  ;;  %v4473_v3 = vpop.f32.mrf.mxu1 }
 0xcec   : > { %3676 = vrcp.f32 %v2466_v1  ;;  %v3675_v7 = vpop.eup %3674 }
 0xced   : > { %v2581_v5 = vpack.c.bf16 %v2579_v2, %v2578_v0  ;;  %3678 = vrcp.f32 %v2574_v4  ;;  %v2473_v18 = vmul.f32 %v3675_v7, %v4424_v59 }
 0xcee   : > { %3680 = vrcp.f32 %v2469_v9 }
 0xcef   : > { %3324 = vmatmul.msk.bf16.vlgmr.msrb.gmra.mxu3 %vm1243_vm14, %v2581_v5 }
 0xcf2   : > { %v3677_v11 = vpop.eup %3676 }
 0xcf3   : > { %v2474_v24 = vmul.f32 %v3677_v11, %v3665_v21  ;;  %v2293_v29 = vpop.f32.mrf.mxu1  ;;  %v3679_v15 = vpop.eup %3678  ;;  %v3448_v21 = vld [vmem:[%s4586_s26 + $0x8] sm:$0xff] }
 0xcf4   : > { %v2580_v62 = vmul.f32 %v3679_v15, %v4441_v19  ;;  %v3681_v30 = vpop.eup %3680  ;;  %2710 = vmatpush.bf16.msra.mxu0 %v3448_v21 }
 0xcf5   : > { %v2476_v8 = vpack.c.bf16 %v2474_v24, %v2473_v18  ;;  %v2475_v16 = vmul.f32 %v3681_v30, %v4458_v28 }
 0xcf6   : > { %v2582_v35 = vpack.c.bf16 %v2580_v62, %v2580_v62 }
 0xcf7   : > { %3320 = vmatmul.msk.bf16.vlgmr.msrb.gmra.mxu1 %vm1243_vm14, %v2476_v8  ;;  %v2477_v39 = vpack.c.bf16 %v2475_v16, %v2475_v16 }
 0xcf8   : > { %2711 = vmatpush.bf16.msra.mxu0 %v3447_v49 }
 0xcf9   : > { %v2396_v10 = vpop.f32.mrf.mxu3 }
 0xcfb   : > { %v2296_v34 = vpop.f32.mrf.mxu1 }
 0xcff   : > { %3325 = vmatmul.msk.bf16.gmra.mxu3 %vm1243_vm14, %v2582_v35 }
 0xd01   : > { %v2398_v37 = vpop.f32.mrf.mxu3 }
 0xd02   : > { %v3531_v59 = vpack.i.bf16 %v2398_v37, %v2396_v10 }
 0xd03   : > { %v2298_v13 = vpop.f32.mrf.mxu1 }
 0xd04   : > { %3532 = vrot.lane.b32.xlu1 %v3531_v59, %s3739_s2 }
 0xd07   : > { %3321 = vmatmul.msk.bf16.gmra.mxu1 %vm1243_vm14, %v2477_v39 }
 0xd2f   : > { %v2401_v40 = vpop.f32.mrf.mxu3 }
 0xd30   : > { %2622 = vrot.lane.b32.xlu0 %v2401_v40, %s3739_s2  ;;  %s4589_s2 = sld [smem:[#allocation10_spill]] }
 0xd37   : > { %v2403_v19 = vpop.f32.mrf.mxu3 }
 0xd72   : > { %v2606_v23 = vpop.f32.mrf.mxu3 }
 0xd74   : > { %v2501_v32 = vpop.f32.mrf.mxu1 }
 0xd76   : > { %v3533_v51 = vpop.permute.xlu1 %3532 }
 0xd77   : > { %v3535_v52 = vunpack.i.h.bf16 %v3533_v51  ;;  %v3534_v36 = vunpack.i.l.bf16 %v3533_v51 }
 0xd79   : > { %v2652_v54 = vsel %vm980_vm0, %v2293_v29, %v3535_v52  ;;  %v2651_v55 = vsel %vm980_vm0, %v4473_v3, %v3534_v36  ;;  %v3555_v3 = vld [vmem:[%s4587_s28] ss:$0 sm:$0xff] }
 0xd7a   : > { %v2608_v48 = vpop.f32.mrf.mxu3 }
 0xd7b   : > { %v3541_v43 = vpack.i.bf16 %v2608_v48, %v2606_v23 }
 0xd7c   : > { %v2503_v6 = vpop.f32.mrf.mxu1 }
 0xd7d   : > { %v3536_v44 = vpack.i.bf16 %v2503_v6, %v2501_v32  ;;  %3542 = vrot.lane.b32.xlu2 %v3541_v43, %s3738_s1 }
 0xd7f   : > { %3537 = vrot.lane.b32.xlu1 %v3536_v44, %s3740_s7 }
 0xd82   : > { %v2611_v12 = vpop.f32.mrf.mxu3 }
 0xd84   : > { %v2506_v20 = vpop.f32.mrf.mxu1 }
 0xd87   : > { %2634 = vrot.lane.b32.xlu1 %v2506_v20, %s3740_s7  ;;  %s4590_s7 = sld [smem:[#allocation11_spill]] }
 0xd8a   : > { %v2613_v28 = vpop.f32.mrf.mxu3 }
 0xd8c   : > { %v2508_v47 = vpop.f32.mrf.mxu1 }
 0xd8f   : > { %2646 = vrot.lane.b32.xlu1 %v2611_v12, %s3738_s1  ;;  %s4588_s1 = sld [smem:[#allocation12_spill]] }
 0xd95   : > { %v3454_v43 = vld [vmem:[%s4588_s1 + $0x18] sm:$0xff]  ;;  %v3453_v6 = vld [vmem:[%s4588_s1 + $0x10] sm:$0xff]  ;;  %v3452_v44 = vld [vmem:[%s4588_s1 + $0x8] sm:$0xff] }
 0xd96   : > { %2853 = vmatpush.bf16.msra.mxu1 %v3454_v43  ;;  %v3451_v47 = vld [vmem:[%s4588_s1] sm:$0xff] }
 0xd9a   : > { %2854 = vmatpush.bf16.msra.mxu1 %v3453_v6 }
 0xd9e   : > { %2855 = vmatpush.bf16.msra.mxu1 %v3452_v44 }
 0xda2   : > { %v2623_v38 = vpop.permute.xlu0 %2622  ;;  %2856 = vmatpush.bf16.msra.mxu1 %v3451_v47 }
 0xda3   : > { %v2653_v61 = vsel %vm980_vm0, %v2296_v34, %v2623_v38 }
 0xdd7   : > { %v3543_v41 = vpop.permute.xlu2 %3542 }
 0xdd8   : > { %v3545_v56 = vunpack.i.h.bf16 %v3543_v41  ;;  %v3544_v45 = vunpack.i.l.bf16 %v3543_v41 }
 0xdf1   : > { %v3538_v46 = vpop.permute.xlu1 %3537 }
 0xdf2   : > { %v3540_v33 = vunpack.i.h.bf16 %v3538_v46  ;;  %v3539_v27 = vunpack.i.l.bf16 %v3538_v46 }
 0xdf4   : > { %v2654_v50 = vsel %vm1670_vm15, %v2651_v55, %v3539_v27  ;;  %v2655_v57 = vsel %vm1670_vm15, %v2652_v54, %v3540_v33 }
 0xdf5   : > { %v2657_v58 = vsel %vm1674_vm2, %v2654_v50, %v3544_v45  ;;  %v2658_v53 = vsel %vm1674_vm2, %v2655_v57, %v3545_v56 }
 0xdf6   : > { %v2660_v60 = vpack.c.bf16 %v2658_v53, %v2657_v58 }
 0xdf8   : > { %3342 = vmatmul.msk.bf16.vlgmr.msra.gmra.mxu0 %vm1011_vm1, %v2660_v60  ;;  %v3556_v60 = vld [vmem:[%s4589_s2] ss:$0 sm:$0xff] }
 0xdf9   : > { %v2635_v42 = vpop.permute.xlu1 %2634 }
 0xdfa   : > { %v2656_v0 = vsel %vm1670_vm15, %v2653_v61, %v2635_v42 }
 0xe01   : > { %v2647_v63 = vpop.permute.xlu1 %2646 }
 0xe02   : > { %v2659_v2 = vsel %vm1674_vm2, %v2656_v0, %v2647_v63 }
 0xe03   : > { %v2661_v1 = vpack.c.bf16 %v2659_v2, %v2659_v2  ;;  %v3557_v2 = vld [vmem:[%s4590_s7] ss:$0 sm:$0xff] }
 0xe08   : > { %3343 = vmatmul.msk.bf16.gmra.mxu0 %vm1011_vm1, %v2661_v1 }
 0xe75   : > { %v2713_v4 = vpop.f32.mrf.mxu0 }
 0xe76   : > { %v2714_v5 = vadd.f32 %v3555_v3, %v2713_v4 }
 0xe78   : > { %v2722_v7 = vadd.f32 %v2714_v5, %v4248_v17 }
 0xe7a   : > { %v2727_v11 = vsel %vm1011_vm1, %v2722_v7, 0.0 }
 0xe7b   : > { %2728 = vadd.xlane.f32.xlu1 %v2727_v11 }
 0xe7d   : > { %v2715_v18 = vpop.f32.mrf.mxu0 }
 0xe7e   : > { %v2716_v24 = vadd.f32 %v3555_v3, %v2715_v18 }
 0xe80   : > { %v2723_v29 = vadd.f32 %v2716_v24, %v4253_v22 }
 0xe82   : > { %v2730_v9 = vsel %vm1011_vm1, %v2723_v29, 0.0 }
 0xe83   : > { %2731 = vadd.xlane.f32.xlu0 %v2730_v9 }
 0xe85   : > { %v2718_v8 = vpop.f32.mrf.mxu0 }
 0xe86   : > { %v2719_v15 = vadd.f32 %v3555_v3, %v2718_v8 }
 0xe88   : > { %v4510_v62 = vadd.f32 %v2719_v15, %v4258_v31 }
 0xe8a   : > { %v2733_v10 = vsel %vm1011_vm1, %v4510_v62, 0.0 }
 0xe8b   : > { %2734 = vadd.xlane.f32.xlu2 %v2733_v10 }
 0xe8d   : > { %v2720_v17 = vpop.f32.mrf.mxu0 }
 0xeee   : > { %v2729_v34 = vpop.xlane.xlu1 %2728 }
 0xeef   : > { %v2736_v35 = vmul.f32 %v2729_v34, %v3937_v25  ;;  %v3462_v34 = vld [vmem:[%s4591_s10 + $0x38] sm:$0xff] }
 0xef0   : > { %2964 = vmatpush.bf16.msra.mxu2 %v3462_v34 }
 0xef1   : > { %v2739_v30 = vsub.f32 %v2722_v7, %v2736_v35  ;;  %v3461_v35 = vld [vmem:[%s4591_s10 + $0x30] sm:$0xff] }
 0xef3   : > { %v2742_v16 = vmul.f32 %v2739_v30, %v2739_v30 }
 0xef4   : > { %2965 = vmatpush.bf16.msra.mxu2 %v3461_v35 }
 0xef5   : > { %v2745_v22 = vsel %vm1011_vm1, %v2742_v16, 0.0  ;;  %v3459_v16 = vld [vmem:[%s4591_s10 + $0x20] sm:$0xff] }
 0xef6   : > { %v2732_v37 = vpop.xlane.xlu0 %2731  ;;  %2746 = vadd.xlane.f32.xlu1 %v2745_v22  ;;  %v3458_v22 = vld [vmem:[%s4591_s10 + $0x18] sm:$0xff] }
 0xef7   : > { %v2737_v31 = vmul.f32 %v2732_v37, %v3937_v25  ;;  %v3457_v37 = vld [vmem:[%s4591_s10 + $0x10] sm:$0xff] }
 0xef9   : > { %v2740_v59 = vsub.f32 %v2723_v29, %v2737_v31  ;;  %v3456_v31 = vld [vmem:[%s4591_s10 + $0x8] sm:$0xff] }
 0xefb   : > { %v2743_v13 = vmul.f32 %v2740_v59, %v2740_v59 }
 0xefd   : > { %v2748_v39 = vsel %vm1011_vm1, %v2743_v13, 0.0 }
 0xefe   : > { %v2735_v40 = vpop.xlane.xlu2 %2734  ;;  %2749 = vadd.xlane.f32.xlu2 %v2748_v39  ;;  %v3455_v39 = vld [vmem:[%s4591_s10] sm:$0xff] }
 0xeff   : > { %v2738_v19 = vmul.f32 %v2735_v40, %v3937_v25 }
 0xf01   : > { %v4520_v23 = vsub.f32 %v4510_v62, %v2738_v19 }
 0xf03   : > { %v2744_v32 = vmul.f32 %v4520_v23, %v4520_v23 }
 0xf05   : > { %v2751_v48 = vsel %vm1011_vm1, %v2744_v32, 0.0 }
 0xf06   : > { %2752 = vadd.xlane.f32.xlu0 %v2751_v48 }
 0xf69   : > { %v2747_v12 = vpop.xlane.xlu1 %2746 }
 0xf6a   : > { %v2754_v20 = vmul.f32 %v2747_v12, %v3937_v25 }
 0xf6c   : > { %v2757_v28 = vadd.f32 1e-05, %v2754_v20 }
 0xf6e   : > { %3682 = vrsqrt.f32 %v2757_v28  ;;  %vm2766_vm12 = vweird.f32 %v2757_v28 }
 0xf71   : > { %v2750_v14 = vpop.xlane.xlu2 %2749 }
 0xf72   : > { %v2755_v26 = vmul.f32 %v2750_v14, %v3937_v25 }
 0xf74   : > { %v3683_v21 = vpop.eup %3682  ;;  %v2758_v49 = vadd.f32 1e-05, %v2755_v26 }
 0xf75   : > { %v2761_v51 = vmul.f32 %v3683_v21, %v2757_v28  ;;  %vm2767_vm0 = vweird.f32 %v3683_v21 }
 0xf76   : > { %3684 = vrsqrt.f32 %v2758_v49  ;;  %vm2768_vm14 = vmor %vm2766_vm12, %vm2767_vm0  ;;  %vm2776_vm2 = vweird.f32 %v2758_v49 }
 0xf77   : > { %v2762_v52 = vmul.f32 %v3683_v21, %v2761_v51 }
 0xf79   : > { %v2763_v36 = vmul.f32 0.5, %v2762_v52  ;;  %v2753_v41 = vpop.xlane.xlu0 %2752 }
 0xf7a   : > { %v2756_v46 = vmul.f32 %v2753_v41, %v3937_v25 }
 0xf7b   : > { %v2764_v33 = vsub.f32 1.5, %v2763_v36 }
 0xf7c   : > { %v3685_v27 = vpop.eup %3684  ;;  %v2759_v54 = vadd.f32 1e-05, %v2756_v46 }
 0xf7d   : > { %v2765_v55 = vmul.f32 %v3683_v21, %v2764_v33  ;;  %v2771_v56 = vmul.f32 %v3685_v27, %v2758_v49  ;;  %vm2777_vm15 = vweird.f32 %v3685_v27 }
 0xf7e   : > { %3686 = vrsqrt.f32 %v2759_v54  ;;  %vm2778_vm11 = vmor %vm2776_vm2, %vm2777_vm15  ;;  %vm2786_vm3 = vweird.f32 %v2759_v54 }
 0xf7f   : > { %v2772_v45 = vmul.f32 %v3685_v27, %v2771_v56  ;;  %v2769_v50 = vsel %vm2768_vm14, %v3683_v21, %v2765_v55 }
 0xf80   : > { %v2790_v42 = vmul.f32 %v2769_v50, %v2739_v30  ;;  %v3460_v30 = vld [vmem:[%s4591_s10 + $0x28] sm:$0xff] }
 0xf81   : > { %v2773_v57 = vmul.f32 0.5, %v2772_v45  ;;  %2966 = vmatpush.bf16.msra.mxu2 %v3460_v30 }
 0xf82   : > { %v2796_v1 = vmul.f32 %v3556_v60, %v2790_v42 }
 0xf83   : > { %v2774_v58 = vsub.f32 1.5, %v2773_v57 }
 0xf84   : > { %v3687_v53 = vpop.eup %3686  ;;  %v2802_v11 = vadd.f32 %v3557_v2, %v2796_v1 }
 0xf85   : > { %v2775_v38 = vmul.f32 %v3685_v27, %v2774_v58  ;;  %v2781_v61 = vmul.f32 %v3687_v53, %v2759_v54  ;;  %vm2787_vm13 = vweird.f32 %v3687_v53  ;;  %2967 = vmatpush.bf16.msra.mxu2 %v3459_v16 }
 0xf86   : > { %vm2788_vm4 = vmor %vm2786_vm3, %vm2787_vm13 }
 0xf87   : > { %v2779_v63 = vsel %vm2778_vm11, %v3685_v27, %v2775_v38  ;;  %v2782_v0 = vmul.f32 %v3687_v53, %v2781_v61 }
 0xf88   : > { %v2791_v3 = vmul.f32 %v2779_v63, %v2740_v59  ;;  %v3558_v59 = vld [vmem:[%s4592_s11] ss:$0 sm:$0xff] }
 0xf89   : > { %v2783_v4 = vmul.f32 0.5, %v2782_v0  ;;  %2968 = vmatpush.bf16.msra.mxu2 %v3458_v22 }
 0xf8a   : > { %v2797_v5 = vmul.f32 %v3556_v60, %v2791_v3 }
 0xf8b   : > { %v2784_v7 = vsub.f32 1.5, %v2783_v4 }
 0xf8c   : > { %v2803_v18 = vadd.f32 %v3557_v2, %v2797_v5 }
 0xf8d   : > { %v2785_v24 = vmul.f32 %v3687_v53, %v2784_v7  ;;  %2969 = vmatpush.bf16.msra.mxu2 %v3457_v37 }
 0xf8e   : > { %v2805_v29 = vpack.c.bf16 %v2803_v18, %v2802_v11 }
 0xf8f   : > { %v2789_v9 = vsel %vm2788_vm4, %v3687_v53, %v2785_v24 }
 0xf90   : > { %3360 = vmatmul.msk.bf16.vlgmr.msra.gmra.mxu1 %vm1011_vm1, %v2805_v29  ;;  %v2792_v8 = vmul.f32 %v2789_v9, %v4520_v23 }
 0xf91   : > { %2970 = vmatpush.bf16.msra.mxu2 %v3456_v31 }
 0xf92   : > { %v2798_v15 = vmul.f32 %v3556_v60, %v2792_v8  ;;  %v3466_v8 = vld [vmem:[%s3897_s4 + $0x18] sm:$0xff] }
 0xf93   : > { %3049 = vmatpush.bf16.msra.mxu3 %v3466_v8 }
 0xf94   : > { %v2804_v10 = vadd.f32 %v3557_v2, %v2798_v15  ;;  %v3559_v2 = vld [vmem:[%s4593_s16] ss:$0 sm:$0xff]  ;;  %v3465_v15 = vld [vmem:[%s3897_s4 + $0x10] sm:$0xff] }
 0xf95   : > { %2971 = vmatpush.bf16.msra.mxu2 %v3455_v39 }
 0xf96   : > { %v2806_v17 = vpack.c.bf16 %v2804_v10, %v2804_v10  ;;  %v3464_v10 = vld [vmem:[%s3897_s4 + $0x8] sm:$0xff] }
 0xf97   : > { %3050 = vmatpush.bf16.msra.mxu3 %v3465_v15 }
 0xf9b   : > { %3051 = vmatpush.bf16.msra.mxu3 %v3464_v10 }
 0xfa0   : > { %3361 = vmatmul.msk.bf16.gmra.mxu1 %vm1011_vm1, %v2806_v17  ;;  %v3463_v17 = vld [vmem:[%s3897_s4] sm:$0xff] }
 0xfa1   : > { %3052 = vmatpush.bf16.msra.mxu3 %v3463_v17 }
0x100d   : > { %v2858_v13 = vpop.f32.mrf.mxu1 }
0x100e   : > { %v2859_v40 = vadd.f32 %v3558_v59, %v2858_v13  ;;  %v2981_v13 = vld [vmem:[%s4594_s18] sm:$0x1] }
0x1010   : > { %v2867_v19 = vmul.f32 %v2859_v40, %v2859_v40 }
0x1012   : > { %v2870_v23 = vmul.f32 %v2867_v19, %v2859_v40  ;;  %v2982_v19 = vld [vmem:[%s3892_s27] sm:$0x1] }
0x1014   : > { %v2873_v32 = vmul.f32 0.044715, %v2870_v23 }
0x1015   : > { %v2860_v48 = vpop.f32.mrf.mxu1 }
0x1016   : > { %v2876_v43 = vadd.f32 %v2873_v32, %v2859_v40  ;;  %v2861_v6 = vadd.f32 %v3558_v59, %v2860_v48  ;;  %v3017_v48 = vld [vmem:[#allocation2] sm:$0x1] }
0x1018   : > { %v2879_v44 = vmul.f32 0.7978846, %v2876_v43  ;;  %v2868_v12 = vmul.f32 %v2861_v6, %v2861_v6 }
0x101a   : > { %v2871_v20 = vmul.f32 %v2868_v12, %v2861_v6  ;;  %3688 = vtanh.f32 %v2879_v44 }
0x101c   : > { %v2874_v28 = vmul.f32 0.044715, %v2871_v20 }
0x101d   : > { %v2863_v47 = vpop.f32.mrf.mxu1 }
0x101e   : > { %v2877_v14 = vadd.f32 %v2874_v28, %v2861_v6  ;;  %v2864_v26 = vadd.f32 %v3558_v59, %v2863_v47 }
0x1020   : > { %v2880_v21 = vmul.f32 0.7978846, %v2877_v14  ;;  %v2869_v49 = vmul.f32 %v2864_v26, %v2864_v26  ;;  %v3689_v51 = vpop.eup %3688 }
0x1021   : > { %v2885_v41 = vadd.f32 1.0, %v3689_v51 }
0x1022   : > { %3690 = vtanh.f32 %v2880_v21  ;;  %v2872_v52 = vmul.f32 %v2869_v49, %v2864_v26 }
0x1023   : > { %v2888_v55 = vmul.f32 0.5, %v2885_v41 }
0x1024   : > { %v2875_v36 = vmul.f32 0.044715, %v2872_v52 }
0x1025   : > { %v2865_v46 = vpop.f32.mrf.mxu1  ;;  %v2891_v50 = vmul.f32 %v2888_v55, %v2859_v40 }
0x1026   : > { %v2878_v33 = vadd.f32 %v2875_v36, %v2864_v26 }
0x1028   : > { %v3691_v27 = vpop.eup %3690  ;;  %v2881_v54 = vmul.f32 0.7978846, %v2878_v33 }
0x1029   : > { %v2886_v56 = vadd.f32 1.0, %v3691_v27 }
0x102a   : > { %3692 = vtanh.f32 %v2881_v54 }
0x102b   : > { %v2889_v45 = vmul.f32 0.5, %v2886_v56 }
0x102d   : > { %v2892_v57 = vmul.f32 %v2889_v45, %v2861_v6 }
0x102f   : > { %v2894_v58 = vpack.c.bf16 %v2892_v57, %v2891_v50 }
0x1030   : > { %v3693_v53 = vpop.eup %3692 }
0x1031   : > { %2972 = vmatmul.bf16.vlgmr.msra.gmra.mxu2 %v2894_v58  ;;  %v2887_v60 = vadd.f32 1.0, %v3693_v53 }
0x1033   : > { %v2890_v42 = vmul.f32 0.5, %v2887_v60 }
0x1035   : > { %v2893_v38 = vmul.f32 %v2890_v42, %v2864_v26 }
0x1037   : > { %v2895_v61 = vpack.c.bf16 %v2893_v38, %v2893_v38 }
0x1041   : > { %2975 = vmatmul.bf16.gmra.mxu2 %v2895_v61 }
0x10b4   : > { %v2973_v63 = vpop.f32.mrf.mxu2 }
0x10bc   : > { %v2974_v0 = vpop.f32.mrf.mxu2 }
0x10c4   : > { %v2976_v1 = vpop.f32.mrf.mxu2 }
0x10c5   : > { %v2977_v3 = vadd.f32 %v3559_v2, %v2976_v1 }
0x10c7   : > { %v2980_v4 = vadd.f32 %v2977_v3, %v4510_v62 }
0x10c9   : > { %v2984_v5 = vsel %vm2983_vm5, %v2980_v4, 0.0 }
0x10ca   : > { %2985 = vadd.xlane.f32.xlu1 %v2984_v5 }
0x10cc   : > { %v2978_v7 = vpop.f32.mrf.mxu2 }
0x113d   : > { %v2986_v11 = vpop.xlane.xlu1 %2985 }
0x113e   : > { %v2987_v18 = vmul.f32 %v2986_v11, %v3937_v25 }
0x1140   : > { %v2988_v24 = vsub.f32 %v2980_v4, %v2987_v18 }
0x1142   : > { %v2989_v29 = vmul.f32 %v2988_v24, %v2988_v24 }
0x1144   : > { %v2990_v9 = vsel %vm2983_vm5, %v2989_v29, 0.0 }
0x1145   : > { %2991 = vadd.xlane.f32.xlu2 %v2990_v9 }
0x11b8   : > { %v2992_v62 = vpop.xlane.xlu2 %2991 }
0x11b9   : > { %v2993_v34 = vmul.f32 %v2992_v62, %v3937_v25 }
0x11bb   : > { %v2994_v35 = vadd.f32 1e-05, %v2993_v34 }
0x11bd   : > { %3694 = vrsqrt.f32 %v2994_v35  ;;  %vm3001_vm7 = vweird.f32 %v2994_v35 }
0x11c3   : > { %v3695_v30 = vpop.eup %3694 }
0x11c4   : > { %v2996_v16 = vmul.f32 %v3695_v30, %v2994_v35  ;;  %vm3002_vm6 = vweird.f32 %v3695_v30 }
0x11c5   : > { %vm3003_vm8 = vmor %vm3001_vm7, %vm3002_vm6 }
0x11c6   : > { %v2997_v22 = vmul.f32 %v3695_v30, %v2996_v16 }
0x11c8   : > { %v2998_v37 = vmul.f32 0.5, %v2997_v22 }
0x11ca   : > { %v2999_v31 = vsub.f32 1.5, %v2998_v37 }
0x11cc   : > { %v3000_v59 = vmul.f32 %v3695_v30, %v2999_v31 }
0x11ce   : > { %v3004_v39 = vsel %vm3003_vm8, %v3695_v30, %v3000_v59 }
0x11cf   : > { %v3005_v40 = vmul.f32 %v3004_v39, %v2988_v24 }
0x11d1   : > { %v3006_v23 = vmul.f32 %v3005_v40, %v2981_v13 }
0x11d3   : > { %v3007_v32 = vadd.f32 %v3006_v23, %v2982_v19 }
0x11d5   : > { %v3008_v25 = vpack.c.bf16 %v3007_v32, %v3007_v32 }
0x11d7   : > { %3410 = vmatmul.msk.bf16.vlgmr.msra.gmra.mxu3 %vm1011_vm1, %v3008_v25 }
0x125a   : > { %v3054_v43 = vpop.f32.mrf.mxu3 }
0x125b   : > { %v3055_v6 = vadd.f32 %v3054_v43, %v3017_v48 }
0x125d   : > { %3059 = vst.msk [vmem:[%s956_s0] sm:$0x1] %vm3058_vm9, %v3055_v6 }
0x1262   : > { %v3056_v44 = vpop.f32.mrf.mxu3 }
0x1263 PF: > { %s75_s22 = sadd.s32 1, %s3702_s22  }
0x1264   : > { %p72_p4 = scmp.ge.s32.totalorder %s75_s22, 4  }
0x1266   :  { %74 = sbr.rel (!%p72_p4) target bundleno = 61 (0x3d), region = 205 }

</bundles_post_ra>
